<compile_context>
chip_gen: v7x
topology: tpu7x:2x2x1
jax: 0.10.0
libtpu: 0.0.40
codegen_flags: <defaults>
</compile_context>

<pallas_src>
import functools

import jax
import jax.numpy as jnp
from jax.experimental import pallas as pl
from jax.experimental.pallas import tpu as pltpu


# ---------------------------------------------------------------------------
# Kernel: one (batch, Co-block) program.
#   x_ref    : [1, CiP, L]  f32  2x2 nearest-replicated input, channel 3 = ones
#                                (carries the bias), channels 4..7 = zero pad.
#                                L = (2H)*(2W).
#   w_ref    : [CoB, CiP]   f32  1x1 conv weights; column 3 = bias, 4..7 = 0.
#   coef_ref : [8, L]       f32  per-lane bilinear tap weights
#                                rows 0..3: W-direction taps (self, l-1, l-2, l+1)
#                                rows 4..7: H-direction taps (self, l-2W, l-4W, l+2W)
#   o_ref    : [1, CoB, L]  f32  output block (flattened NCHW)
# ---------------------------------------------------------------------------
def _tiny_model_kernel(x_ref, w_ref, coef_ref, o_ref, *, two_w):
    L = o_ref.shape[2]
    x = x_ref[0]                                                  # [CiP, L]

    # --- 2x bilinear lerp on the tiny input (commutes with the 1x1 conv).
    # Zero tap weights at row/array boundaries make the circular rolls safe.
    # W direction:
    t = (coef_ref[0:1, :] * x
         + coef_ref[1:2, :] * pltpu.roll(x, 1, axis=1)            # X[l-1]
         + coef_ref[2:3, :] * pltpu.roll(x, 2, axis=1)            # X[l-2]
         + coef_ref[3:4, :] * pltpu.roll(x, L - 1, axis=1))       # X[l+1]
    # H direction (row-sized lane shifts of 2W):
    u = (coef_ref[4:5, :] * t
         + coef_ref[5:6, :] * pltpu.roll(t, two_w, axis=1)        # T[l-2W]
         + coef_ref[6:7, :] * pltpu.roll(t, 2 * two_w, axis=1)    # T[l-4W]
         + coef_ref[7:8, :] * pltpu.roll(t, L - two_w, axis=1))   # T[l+2W]

    # --- 1x1 conv (+ bias via the ones channel) on the MXU, full f32 precision
    # so the result matches the f32 reference to 1e-4.
    o_ref[0] = jnp.dot(w_ref[...], u,
                       preferred_element_type=jnp.float32,
                       precision=jax.lax.Precision.HIGHEST)


def _axis_tap_coeffs(n_in):
    """Tap weights for 2x bilinear (align_corners=False) applied to the 2x
    nearest-replicated signal R (R[j] = y[j // 2]):
        out[j] = w_self[j]*R[j] + w_prev1[j]*R[j-1] + w_prev2[j]*R[j-2] + w_next1[j]*R[j+1]
    Edge clamping is folded into the weights; every row of taps sums to 1
    (which is what lets the ones/bias channel pass through unchanged)."""
    n_out = 2 * n_in
    j = jnp.arange(n_out)
    even = (j % 2) == 0
    first = j == 0
    last = j == (n_out - 1)
    w_self = jnp.where(even, jnp.where(first, 1.0, 0.75), 0.0)
    w_prev1 = jnp.where(even, 0.0, jnp.where(last, 1.0, 0.75))
    w_prev2 = jnp.where(even & (~first), 0.25, 0.0)
    w_next1 = jnp.where((~even) & (~last), 0.25, 0.0)
    return jnp.stack([w_self, w_prev1, w_prev2, w_next1]).astype(jnp.float32)


def _pick_co_block(n_batch, co):
    # Fewer, larger grid steps: each step carries ~0.35us fixed overhead and
    # the whole kernel only moves ~1.6 MB.  With N >= 2 the batch axis already
    # feeds both v7x TensorCores, so use a single Co block (also optimal for
    # single-TC v5e/v6e).  Only split Co in two when N == 1 so v7x still has
    # two parallel programs.
    if n_batch >= 2:
        return co
    half = co // 2
    if co % 2 == 0 and half % 8 == 0:
        return half
    return co


def tiny_model_forward(x_nchw, weight, bias):
    """x_nchw: [N, 3, H, W]; weight: [192, 3, 1, 1]; bias: [192] -> [N, 192, 2H, 2W]."""
    N, Ci, H, W = x_nchw.shape
    Co = weight.shape[0]
    two_h, two_w = 2 * H, 2 * W
    L = two_h * two_w
    CiP = 8  # 3 real channels + 1 ones (bias) channel + 4 zero-pad channels

    # Wrapper glue (plain JAX, all few-channel / tiny):
    #  * 2x2 nearest replication of the Ci=3 input (a few KB),
    #  * ones channel (carries the bias through the MXU) + zero pad to 8,
    #  * weight|bias packing, per-lane tap tables.
    # All Co=192-wide arithmetic stays inside the kernel, whose output is
    # already flattened-NCHW (no post-kernel transpose).
    x_rep = jnp.repeat(jnp.repeat(x_nchw.astype(jnp.float32), 2, axis=2), 2, axis=3)
    x_rep = x_rep.reshape(N, Ci, L)
    x_aug = jnp.concatenate(
        [x_rep,
         jnp.ones((N, 1, L), jnp.float32),
         jnp.zeros((N, CiP - Ci - 1, L), jnp.float32)], axis=1)   # [N, CiP, L]

    w_aug = jnp.concatenate(
        [weight.reshape(Co, Ci).astype(jnp.float32),
         bias.reshape(Co, 1).astype(jnp.float32),
         jnp.zeros((Co, CiP - Ci - 1), jnp.float32)], axis=1)     # [Co, CiP]

    col_c = _axis_tap_coeffs(W)                                   # [4, 2W]
    row_c = _axis_tap_coeffs(H)                                   # [4, 2H]
    coef = jnp.concatenate(
        [jnp.tile(col_c, (1, two_h)),                             # a_k[l] = col_c[k, l %  2W]
         jnp.repeat(row_c, two_w, axis=1)],                       # b_k[l] = row_c[k, l // 2W]
        axis=0)                                                   # [8, L] (32 KB; DMA'd once)

    co_blk = _pick_co_block(N, Co)
    n_co = Co // co_blk

    kernel = functools.partial(_tiny_model_kernel, two_w=two_w)

    out_flat = pl.pallas_call(
        kernel,
        out_shape=jax.ShapeDtypeStruct((N, Co, L), jnp.float32),
        grid_spec=pltpu.PrefetchScalarGridSpec(
            num_scalar_prefetch=0,
            grid=(N, n_co),
            in_specs=[
                pl.BlockSpec((1, CiP, L), lambda n, c: (n, 0, 0)),    # x (per batch)
                pl.BlockSpec((co_blk, CiP), lambda n, c: (c, 0)),     # weight|bias block
                pl.BlockSpec((8, L), lambda n, c: (0, 0)),            # taps, VMEM-resident
            ],
            out_specs=pl.BlockSpec((1, co_blk, L), lambda n, c: (n, c, 0)),
        ),
        compiler_params=pltpu.CompilerParams(
            dimension_semantics=("parallel", "parallel")),
    )(x_aug, w_aug, coef)

    # [N, Co, (2H)*(2W)] -> NCHW: contiguous, i.e. a free reshape (no transpose).
    return out_flat.reshape(N, Co, two_h, two_w)


# ---------------------------------------------------------------------------
# Independent plain-JAX reference (conv -> gather + lerp), validation only.
# ---------------------------------------------------------------------------
def _ref_forward(x_nchw, weight, bias):
    N, Ci, H, W = x_nchw.shape
    Co = weight.shape[0]
    y = jnp.einsum('nchw,oc->nohw', x_nchw, weight.reshape(Co, Ci)) \
        + bias[None, :, None, None]

    def axis_idx(n):
        src = jnp.maximum((jnp.arange(2 * n, dtype=jnp.float32) + 0.5) / 2.0 - 0.5, 0.0)
        i0 = jnp.floor(src).astype(jnp.int32)
        i1 = jnp.minimum(i0 + 1, n - 1)
        return i0, i1, src - i0.astype(jnp.float32)

    i0, i1, fh = axis_idx(H)
    yh = y[:, :, i0, :] * (1 - fh)[None, None, :, None] \
        + y[:, :, i1, :] * fh[None, None, :, None]
    j0, j1, fw = axis_idx(W)
    out = yh[:, :, :, j0] * (1 - fw) + yh[:, :, :, j1] * fw
    return out


if __name__ == "__main__":
    key = jax.random.PRNGKey(0)
    k_x, k_w, k_b = jax.random.split(key, 3)

    N, Ci, H, W, Co = 2, 3, 16, 16, 192
    x = jax.random.normal(k_x, (N, Ci, H, W), dtype=jnp.float32)
    # Deterministic synthetic parameters (shapes from nn.Conv2d(3, 192, 1, 1)).
    weight = jax.random.normal(k_w, (Co, Ci, 1, 1), dtype=jnp.float32) * 0.1
    bias = jax.random.normal(k_b, (Co,), dtype=jnp.float32) * 0.1

    out = tiny_model_forward(x, weight, bias)
    jax.block_until_ready(out)

    ref = _ref_forward(x, weight, bias)
    assert out.shape == (N, Co, 2 * H, 2 * W), out.shape
    assert jnp.allclose(out, ref, atol=1e-4, rtol=1e-4), \
        float(jnp.max(jnp.abs(out - ref)))

    print("KERNEL_OK")
</pallas_src>

<mosaic_0001>
module attributes {stable_mosaic.version = 11 : i64} {
  func.func @_tiny_model_kernel(%arg0: i32, %arg1: i32, %arg2: memref<1x8x1024xf32, #tpu.memory_space<vmem>>, %arg3: memref<192x8xf32, #tpu.memory_space<vmem>>, %arg4: memref<8x1024xf32, #tpu.memory_space<vmem>>, %arg5: memref<1x192x1024xf32, #tpu.memory_space<vmem>>) attributes {dimension_semantics = [#tpu.dimension_semantics<parallel>, #tpu.dimension_semantics<parallel>], iteration_bounds = array<i64: 2, 1>, scalar_prefetch = 0 : i64, scratch_operands = 0 : i64, tpu.core_type = #tpu.core_type<tc>, window_params = [{transform_indices = @transform_0, window_bounds = array<i64: 1, 8, 1024>}, {transform_indices = @transform_1, window_bounds = array<i64: 192, 8>}, {pipeline_mode = #tpu.pipeline_mode<synchronous>, transform_indices = @transform_2, window_bounds = array<i64: 8, 1024>}, {transform_indices = @transform_3, window_bounds = array<i64: 1, 192, 1024>}]} {
    %c0 = arith.constant 0 : index
    %c0_0 = arith.constant 0 : index
    %c0_1 = arith.constant 0 : index
    %0 = vector.load %arg2[%c0, %c0_0, %c0_1] : memref<1x8x1024xf32, #tpu.memory_space<vmem>>, vector<1x8x1024xf32>
    %1 = vector.shape_cast %0 : vector<1x8x1024xf32> to vector<8x1024xf32>
    %c0_2 = arith.constant 0 : index
    %c0_3 = arith.constant 0 : index
    %2 = vector.load %arg4[%c0_2, %c0_3] : memref<8x1024xf32, #tpu.memory_space<vmem>>, vector<1x1024xf32>
    %3 = vector.broadcast %2 : vector<1x1024xf32> to vector<8x1024xf32>
    %4 = arith.mulf %3, %1 : vector<8x1024xf32>
    %c1 = arith.constant 1 : index
    %c0_4 = arith.constant 0 : index
    %5 = vector.load %arg4[%c1, %c0_4] : memref<8x1024xf32, #tpu.memory_space<vmem>>, vector<1x1024xf32>
    %c1_i32 = arith.constant 1 : i32
    %6 = tpu.dynamic_rotate %1 by %c1_i32 dim 1 : vector<8x1024xf32>, i32 -> vector<8x1024xf32>
    %7 = vector.broadcast %5 : vector<1x1024xf32> to vector<8x1024xf32>
    %8 = arith.mulf %7, %6 : vector<8x1024xf32>
    %9 = arith.addf %4, %8 : vector<8x1024xf32>
    %c2 = arith.constant 2 : index
    %c0_5 = arith.constant 0 : index
    %10 = vector.load %arg4[%c2, %c0_5] : memref<8x1024xf32, #tpu.memory_space<vmem>>, vector<1x1024xf32>
    %c2_i32 = arith.constant 2 : i32
    %11 = tpu.dynamic_rotate %1 by %c2_i32 dim 1 : vector<8x1024xf32>, i32 -> vector<8x1024xf32>
    %12 = vector.broadcast %10 : vector<1x1024xf32> to vector<8x1024xf32>
    %13 = arith.mulf %12, %11 : vector<8x1024xf32>
    %14 = arith.addf %9, %13 : vector<8x1024xf32>
    %c3 = arith.constant 3 : index
    %c0_6 = arith.constant 0 : index
    %15 = vector.load %arg4[%c3, %c0_6] : memref<8x1024xf32, #tpu.memory_space<vmem>>, vector<1x1024xf32>
    %c1023_i32 = arith.constant 1023 : i32
    %16 = tpu.dynamic_rotate %1 by %c1023_i32 dim 1 : vector<8x1024xf32>, i32 -> vector<8x1024xf32>
    %17 = vector.broadcast %15 : vector<1x1024xf32> to vector<8x1024xf32>
    %18 = arith.mulf %17, %16 : vector<8x1024xf32>
    %19 = arith.addf %14, %18 : vector<8x1024xf32>
    %c4 = arith.constant 4 : index
    %c0_7 = arith.constant 0 : index
    %20 = vector.load %arg4[%c4, %c0_7] : memref<8x1024xf32, #tpu.memory_space<vmem>>, vector<1x1024xf32>
    %21 = vector.broadcast %20 : vector<1x1024xf32> to vector<8x1024xf32>
    %22 = arith.mulf %21, %19 : vector<8x1024xf32>
    %c5 = arith.constant 5 : index
    %c0_8 = arith.constant 0 : index
    %23 = vector.load %arg4[%c5, %c0_8] : memref<8x1024xf32, #tpu.memory_space<vmem>>, vector<1x1024xf32>
    %c32_i32 = arith.constant 32 : i32
    %24 = tpu.dynamic_rotate %19 by %c32_i32 dim 1 : vector<8x1024xf32>, i32 -> vector<8x1024xf32>
    %25 = vector.broadcast %23 : vector<1x1024xf32> to vector<8x1024xf32>
    %26 = arith.mulf %25, %24 : vector<8x1024xf32>
    %27 = arith.addf %22, %26 : vector<8x1024xf32>
    %c6 = arith.constant 6 : index
    %c0_9 = arith.constant 0 : index
    %28 = vector.load %arg4[%c6, %c0_9] : memref<8x1024xf32, #tpu.memory_space<vmem>>, vector<1x1024xf32>
    %c64_i32 = arith.constant 64 : i32
    %29 = tpu.dynamic_rotate %19 by %c64_i32 dim 1 : vector<8x1024xf32>, i32 -> vector<8x1024xf32>
    %30 = vector.broadcast %28 : vector<1x1024xf32> to vector<8x1024xf32>
    %31 = arith.mulf %30, %29 : vector<8x1024xf32>
    %32 = arith.addf %27, %31 : vector<8x1024xf32>
    %c7 = arith.constant 7 : index
    %c0_10 = arith.constant 0 : index
    %33 = vector.load %arg4[%c7, %c0_10] : memref<8x1024xf32, #tpu.memory_space<vmem>>, vector<1x1024xf32>
    %c992_i32 = arith.constant 992 : i32
    %34 = tpu.dynamic_rotate %19 by %c992_i32 dim 1 : vector<8x1024xf32>, i32 -> vector<8x1024xf32>
    %35 = vector.broadcast %33 : vector<1x1024xf32> to vector<8x1024xf32>
    %36 = arith.mulf %35, %34 : vector<8x1024xf32>
    %37 = arith.addf %32, %36 : vector<8x1024xf32>
    %c0_11 = arith.constant 0 : index
    %c0_12 = arith.constant 0 : index
    %38 = vector.load %arg3[%c0_11, %c0_12] : memref<192x8xf32, #tpu.memory_space<vmem>>, vector<192x8xf32>
    %cst = arith.constant dense<0.000000e+00> : vector<192x1024xf32>
    %39 = tpu.matmul %38, %37, %cst {dimension_numbers = #tpu.dot_dimension_numbers<[1], [0], [0], [1], [0, 0, 1, 1], [], []>, precision = #tpu.contract_precision<fp32>} : vector<192x8xf32>, vector<8x1024xf32>, vector<192x1024xf32> -> vector<192x1024xf32>
    %c0_13 = arith.constant 0 : index
    %c0_14 = arith.constant 0 : index
    %c0_15 = arith.constant 0 : index
    %40 = vector.load %arg5[%c0_13, %c0_14, %c0_15] : memref<1x192x1024xf32, #tpu.memory_space<vmem>>, vector<1x192x1024xf32>
    %41 = vector.shape_cast %40 : vector<1x192x1024xf32> to vector<192x1024xf32>
    %42 = vector.shape_cast %39 : vector<192x1024xf32> to vector<1x192x1024xf32>
    tpu.vector_store %arg5[%c0_13, %c0_14, %c0_15], %42 {strides = array<i32>} : memref<1x192x1024xf32, #tpu.memory_space<vmem>>, vector<1x192x1024xf32>,
    return
  }
  func.func @transform_0(%arg0: i32, %arg1: i32) -> (i32, i32, i32) {
    %c0_i32 = arith.constant 0 : i32
    %c0_i32_0 = arith.constant 0 : i32
    %c0_i32_1 = arith.constant 0 : i32
    return %arg0, %c0_i32, %c0_i32_0 : i32, i32, i32
  }
  func.func @transform_1(%arg0: i32, %arg1: i32) -> (i32, i32) {
    %c0_i32 = arith.constant 0 : i32
    %c0_i32_0 = arith.constant 0 : i32
    return %arg1, %c0_i32 : i32, i32
  }
  func.func @transform_2(%arg0: i32, %arg1: i32) -> (i32, i32) {
    %c0_i32 = arith.constant 0 : i32
    %c0_i32_0 = arith.constant 0 : i32
    %c0_i32_1 = arith.constant 0 : i32
    return %c0_i32, %c0_i32_0 : i32, i32
  }
  func.func @transform_3(%arg0: i32, %arg1: i32) -> (i32, i32, i32) {
    %c0_i32 = arith.constant 0 : i32
    %c0_i32_0 = arith.constant 0 : i32
    return %arg0, %arg1, %c0_i32 : i32, i32, i32
  }
}

</mosaic_0001>

<bundles_post_ra>
// kernel: tpu_custom_call.1
= control target key start
LH: loop header
LB: loop body
LE: loop exit
PB: predicated region body
PF: predicated region fallthrough
CT: control target
= control target key end

     0   :  { %8 = vsyncpa [#allocation3], 0  ;;  %s11545_s0 = inlined_call_operand.hbm [shape: f32[2,8,1024], index: 0, kind: input, shape index: {}]   ;;  %s11546_s1 = inlined_call_operand.vmem [shape: f32[192,8], index: 1, kind: input, shape index: {}]   ;;  %s11547_s2 = inlined_call_operand.hbm [shape: f32[8,1024], index: 2, kind: input, shape index: {}]   ;;  %s11548_s3 = inlined_call_operand.hbm [shape: f32[2,192,1024], index: 3, kind: output, shape index: {}]  }
   0x1   :  { %10 = vsyncpa [#allocation3 + $0x1], 0 }
   0x2   :  { %11 = vsyncpa [#allocation6], 0 }
   0x3   :  { %12 = vsyncpa [#allocation4], 0 }
   0x4   :  { %14 = vsyncpa [#allocation4 + $0x1], 0  ;;  %s8887_s12 = smov 0   ;;  %s8889_s13 = smov 0  }
   0x5   :  { %s8891_s14 = smov 0   ;;  %s8893_s15 = smov 0  }
   0x6   :  { %s8895_s16 = smov 0   ;;  %s8897_s17 = smov 0  }
   0x7 LB: > { %s7651_s18 = sadd.s32 4294967295, %s8854_s17   ;;  %s7652_s19 = sadd.s32 4294967294, %s8854_s17   ;;  %s8854_s17 = sphi %s8897_s17, %s20_s17   ;;  %s8850_s16 = sphi %s8895_s16, %s11963_s16   ;;  %s8846_s15 = sphi %s8893_s15, %s11962_s15   ;;  %s8842_s14 = sphi %s8891_s14, %s11961_s14   ;;  %s8838_s13 = sphi %s8889_s13, %s11960_s13   ;;  %s8834_s12 = sphi %s8887_s12, %s11959_s12  }
   0x8   : > { %p52_p0 = scmp.ne.s32.totalorder %s8838_s13, %s8834_s12  ;;  %p8921_p1 = scmp.eq.s32.totalorder %s7651_s18, 0 }
   0x9   : > { %p8925_p2 = scmp.eq.s32.totalorder %s7651_s18, 1  ;;  %p131_p3 = scmp.eq.s32.totalorder %s7652_s19, 1 }
   0xa   : > { %s11741_s20 = scalar_select %p8921_p1, 1, 0 }
   0xb   : > { %s11742_s21 = scalar_select %p8925_p2, 1, 0 }
   0xc   : > { %p8931_p4 = por %p8921_p1, %p52_p0  ;;  %p7653_p5 = scmp.ge.s32.totalorder %s8854_s17, 1 }
   0xd   : > { %p8936_p6 = por %p131_p3, %p52_p0  ;;  %p138_p7 = scmp.lt.s32.totalorder %s8854_s17, 3 }
   0xe   : > { %s11743_s22 = scalar_select %p8931_p4, 1, 0 }
   0xf   : > { %s11744_s23 = scalar_select %p8936_p6, 1, 0 }
  0x10   : > { %p8941_p8 = pnand %p7653_p5, %p138_p7  ;;  %s8856_s25 = smov [#allocation5]  }
  0x11   : > { %s160_s26 = sshll.u32 %s8856_s25, 4  ;;  %s32_s28 = sadd.s32 1, %s8850_s16  ;;  %s161_s26 = int_to_ptr.vmem [resolvable:$true] %s160_s26 }
  0x12   : > { %s11745_s24 = scalar_select %p8941_p8, 1, 0 }
  0x13   : > { %p8637_p10 = pneg %p8941_p8  ;;  %s39_s29 = sadd.s32 1, %s8842_s14 }
  0x14   : > { %p8956_p12 = scmp.ge.s32.totalorder %s32_s28, 2  ;;  %s8710_s6 = scalar_lea.hbm %s11547_s2, 1024 }
  0x15   : > { %p8950_p11 = pnand %p8637_p10, %p8921_p1  ;;  %p8711_p13 = scmp.ne.s32.totalorder %s11547_s2, %s8710_s6 }
  0x16   : > { %s11747_s30 = scalar_select %p8956_p12, 1, 0 }
  0x17   : > { %p8712_p0 = pneg %p8950_p11  ;;  %p8717_p7 = scmp.lt.u32.totalorder %s8710_s6, %s11547_s2 }
  0x19   : > { %p8713_p3 = pnand %p8712_p0, %p8711_p13 }
  0x1b   : > { %p8714_p5 = pneg %p8713_p3 }
  0x1d   : > { %p8719_p10 = pnand %p8717_p7, %p8714_p5 }
  0x1f   : > { %8722 = shalt.err (!%p8719_p10)
}
  0x20   : > { %s8723_s11 = scalar_lea.vmem %s161_s26, 1024  ;;  %p8731_p4 = scmp.lt.s32.totalorder %s161_s26, %s161_s26 }
  0x21   : > { %p8724_p9 = scmp.ne.s32.totalorder %s161_s26, %s8723_s11  ;;  %p8732_p8 = scmp.lt.s32.totalorder %s8723_s11, %s8723_s11 }
  0x23   : > { %p8726_p6 = pnand %p8724_p9, %p8712_p0  ;;  %p8733_p2 = por %p8732_p8, %p8731_p4 }
  0x25   : > { %p8727_p1 = pneg %p8726_p6 }
  0x27   : > { %p8734_p12 = pnand %p8733_p2, %p8727_p1 }
  0x29   : > { %8737 = shalt.err (!%p8734_p12)
}
  0x2a   : > { %8640 = dma.hbm_to_vmem [thread:$0]  (!%p8950_p11), %s11547_s2, 1024, %s161_s26, [#allocation6]  }
  0x2b   : > { %p11748_p4 = scmp.ne.s32.totalorder %s11747_s30, 0  ;;  %p46_p1 = scmp.ne.s32.totalorder %s8842_s14, %s8838_s13 }
  0x2c   : > { %p47_p2 = scmp.eq.s32.totalorder %s8854_s17, 0  ;;  %p8650_p6 = scmp.lt.s32.totalorder %s8854_s17, 2 }
  0x2d   : > { %s11965_s28 = smov (%p11748_p4, %s32_s28), 0  ;;  %p11749_p12 = scmp.ne.s32.totalorder %s11742_s21, 0 }
  0x2e   : > { %s36_s25 = ssub.s32 %s8850_s16, %s11965_s28  ;;  %p48_p9 = por %p47_p2, %p46_p1 }
  0x2f   : > { %p37_p8 = scmp.eq.s32.totalorder %s36_s25, 0  ;;  %p8988_p13 = por %p11749_p12, %p46_p1 }
  0x30   : > { %s171_s4 = sand.u32 1, %s8842_s14   ;;  %s7666_s30 = sshll.u32 %s8850_s16, 10 }
  0x31   : > { %s8996_s5 = scalar_select %p37_p8, %s8842_s14, %s39_s29  }
  0x32   : > { %s7657_s26 = sshll.u32 %s171_s4, 6  ;;  %s9002_s8 = scalar_lea.hbm %s11545_s0, %s7666_s30 }
  0x33   : > { %s175_s21 = scalar_lea.vmem [#allocation2], %s7657_s26  ;;  %p9006_p11 = pnand %p8650_p6, %p48_p9 }
  0x34   : > { %s183_s9 = sshll.u32 %s175_s21, 4  ;;  %s172_s29 = scalar_lea.sflag [#allocation3], %s171_s4  ;;  %s9004_s9 = int_to_ptr.vmem [resolvable:$true] %s183_s9 }
  0x35   : > { %s8738_s11 = scalar_lea.hbm %s9002_s8, 1024  ;;  %p8740_p3 = pneg %p9006_p11 }
  0x36   : > { %p8739_p0 = scmp.ne.s32.totalorder %s9002_s8, %s8738_s11  ;;  %s8743_s25 = scalar_lea.hbm %s11545_s0, 2048 }
  0x37   : > { %p8744_p10 = scmp.lt.u32.totalorder %s9002_s8, %s11545_s0  ;;  %p8745_p4 = scmp.lt.u32.totalorder %s8743_s25, %s8738_s11 }
  0x38   : > { %p8741_p5 = pnand %p8740_p3, %p8739_p0  ;;  %p8747_p2 = scmp.lt.u32.totalorder %s8738_s11, %s9002_s8 }
  0x39   : > { %p8746_p1 = por %p8745_p4, %p8744_p10 }
  0x3a   : > { %p8742_p7 = pneg %p8741_p5 }
  0x3b   : > { %p8748_p6 = por %p8747_p2, %p8746_p1 }
  0x3d   : > { %p8749_p8 = pnand %p8748_p6, %p8742_p7 }
  0x3f   : > { %8752 = shalt.err (!%p8749_p8)
}
  0x40   : > { %s8753_s4 = scalar_lea.vmem %s9004_s9, 1024  ;;  %s8857_s6 = smov [#allocation2]  }
  0x41   : > { %p8754_p9 = scmp.ne.s32.totalorder %s9004_s9, %s8753_s4  ;;  %s8758_s7 = sshll.u32 %s8857_s6, 4  ;;  %s8759_s7 = int_to_ptr.vmem [resolvable:$false] %s8758_s7 }
  0x42   : > { %s8760_s21 = scalar_lea.vmem %s8759_s7, 2048  ;;  %p8761_p5 = scmp.lt.s32.totalorder %s9004_s9, %s8759_s7 }
  0x43   : > { %p8756_p12 = pnand %p8754_p9, %p8740_p3  ;;  %p8762_p10 = scmp.lt.s32.totalorder %s8760_s21, %s8753_s4 }
  0x45   : > { %p8757_p0 = pneg %p8756_p12  ;;  %p8763_p4 = por %p8762_p10, %p8761_p5 }
  0x47   : > { %p8764_p1 = pnand %p8763_p4, %p8757_p0 }
  0x49   : > { %8767 = shalt.err (!%p8764_p1)
}
  0x4a   : > { %8644 = dma.hbm_to_vmem [thread:$0]  (!%p9006_p11), %s9002_s8, 1024, %s9004_s9, %s172_s29  }
  0x4b   : > { %p11752_p7 = scmp.ne.s32.totalorder %s11745_s24, 0 }
  0x4d   : > { %192 = sbr.rel (%p11752_p7) target bundleno = 1770 (0x6ea), region = 32 }
  0x54   : > { %s9038_s11 = sand.u32 1, %s8838_s13   ;;  %p11753_p3 = scmp.ne.s32.totalorder %s11743_s22, 0 }
  0x55   : > { %s7661_s18 = sshll.u32 %s9038_s11, 6  ;;  %s195_s19 = scalar_lea.sflag [#allocation3], %s9038_s11 }
  0x56   : > { %s9042_s25 = scalar_lea.vmem [#allocation2], %s7661_s18 }
  0x57   : > { %8821 = dma.done.wait (%p11753_p3), %s195_s19, 1024  }
  0x58   : > { %8823 = vsyncadd (%p11753_p3), %s195_s19, 4294966272  ;;  %p11754_p11 = scmp.ne.s32.totalorder %s11741_s20, 0 }
  0x5a   : > { %8825 = dma.done.wait (%p11754_p11), [#allocation6], 1024  }
  0x5b   : > { %8827 = vsyncadd (%p11754_p11), [#allocation6], 4294966272  ;;  %v9053_v0 = vld [vmem:[%s9042_s25 + $0x10] sm:$0xff]  ;;  %v9056_v1 = vld [vmem:[%s9042_s25] sm:$0xff]  ;;  %s8858_s24 = smov 1   ;;  %s8859_s20 = smov 2   ;;  %v249_v10 = vlaneseq }
  0x5c   : > { %305 = vrot.lane.b32.xlu1 %v9053_v0, %s8858_s24  ;;  %301 = vrot.lane.b32.xlu0 %v9056_v1, %s8858_s24  ;;  %v9063_v2 = vld [vmem:[%s9042_s25 + $0x18] sm:$0xff]  ;;  %v9066_v3 = vld [vmem:[%s9042_s25 + $0x8] sm:$0xff]  ;;  %s8860_s22 = smov 127   ;;  %s8861_s8 = smov 32   ;;  %vm892_vm3 = vcmask 64512  }
  0x5d   : > { %v9073_v4 = vld [vmem:[%s9042_s25 + $0x30] sm:$0xff]  ;;  %v9076_v5 = vld [vmem:[%s9042_s25 + $0x38] sm:$0xff]  ;;  %v9095_v6 = vld [vmem:[%s9042_s25 + $0x20] sm:$0xff]  ;;  %v9120_v13 = vshrl.u32 %v249_v10, 7  ;;  %v9131_v24 = vand.u32 127, %v249_v10  ;;  %s8862_s9 = smov 64  }
  0x5e   : > { %v9114_v7 = vld [vmem:[%s9042_s25 + $0x28] sm:$0xff]  ;;  %s8863_s10 = smov 96   ;;  %s8628_s21 = smul.u32 24576, %s8846_s15 }
  0x5f   : > { %v245_v16 = vld [vmem:[#allocation5] ss:$8 sm:$0xf]  ;;  %v9127_v18 = vsub.s32 3, %v9120_v13  ;;  %v9134_v25 = vsub.s32 1, %v9120_v13  ;;  %v9137_v26 = vsub.s32 2, %v9120_v13 }
  0x60   : > { %307 = vrot.lane.b32.xlu1 %v9063_v2, %s8858_s24  ;;  %303 = vrot.lane.b32.xlu0 %v9066_v3, %s8858_s24  ;;  %v246_v17 = vld [vmem:[#allocation5] ss:$8 sm:$0xf0]  ;;  %v298_v20 = vld [vmem:[#allocation5 + $0x1] ss:$8 sm:$0xf] }
  0x61   : > { %v9129_v19 = vor.u32 %v246_v17, %v245_v16  ;;  %v299_v21 = vld [vmem:[#allocation5 + $0x1] ss:$8 sm:$0xf0]  ;;  %v9140_v27 = vsub.s32 0, %v9120_v13  ;;  %v9147_v32 = vsub.s32 7, %v9120_v13  ;;  %vm319_vm0 = vcmp.lt.s32.totalorder %v9131_v24, 1 }
  0x62   : > { %v9142_v28 = vor.u32 %v299_v21, %v298_v20  ;;  %v386_v29 = vld [vmem:[#allocation5 + $0x2] ss:$8 sm:$0xf]  ;;  %v472_v38 = vld [vmem:[#allocation5 + $0x3] ss:$8 sm:$0xf] }
  0x63   : > { %v387_v30 = vld [vmem:[#allocation5 + $0x2] ss:$8 sm:$0xf0]  ;;  %v264_v31 = vrot.slane %v9129_v19, %v9127_v18  ;;  %11755 = vst [vmem:[#allocation11_spill] sm:$0xff] %v9147_v32  ;;  %v256_v35 = vrot.slane %v9129_v19, %v9134_v25  ;;  %v260_v36 = vrot.slane %v9129_v19, %v9137_v26  ;;  %v252_v42 = vrot.slane %v9129_v19, %v9140_v27  ;;  %s7526_s15 = scalar_lea.sflag [#allocation4], %s9038_s11 }
  0x64   : > { %313 = vrot.lane.b32.xlu1 %v9073_v4, %s8858_s24  ;;  %315 = vrot.lane.b32.xlu0 %v9076_v5, %s8858_s24  ;;  %v9156_v37 = vor.u32 %v387_v30, %v386_v29  ;;  %v473_v39 = vld [vmem:[#allocation5 + $0x3] ss:$8 sm:$0xf0]  ;;  %v344_v40 = vrot.slane %v9142_v28, %v9127_v18  ;;  %v336_v41 = vrot.slane %v9142_v28, %v9134_v25  ;;  %vm405_vm1 = vcmp.lt.s32.totalorder %v9131_v24, 2 }
  0x65   : > { %v292_v43 = vmul.f32 %v264_v31, %v9063_v2  ;;  %v340_v44 = vrot.slane %v9142_v28, %v9137_v26  ;;  %v280_v45 = vrot.slane %v9129_v19, %v9147_v32  ;;  %v332_v46 = vrot.slane %v9142_v28, %v9140_v27 }
  0x66   : > { %v290_v49 = vmul.f32 %v256_v35, %v9066_v3  ;;  %v9180_v52 = vor.u32 %v473_v39, %v472_v38  ;;  %v291_v53 = vmul.f32 %v260_v36, %v9053_v0  ;;  %v360_v54 = vrot.slane %v9142_v28, %v9147_v32 }
  0x67   : > { %v422_v55 = vrot.slane %v9156_v37, %v9134_v25  ;;  %v418_v56 = vrot.slane %v9156_v37, %v9140_v27  ;;  %v289_v57 = vmul.f32 %v252_v42, %v9056_v1  ;;  %v426_v59 = vrot.slane %v9156_v37, %v9137_v26 }
  0x68   : > { %391 = vrot.lane.b32.xlu1 %v9066_v3, %s8859_s20  ;;  %389 = vrot.lane.b32.xlu0 %v9056_v1, %s8859_s20  ;;  %vm491_vm2 = vcmp.lt.s32.totalorder %v9131_v24, 127  ;;  %v508_v10 = vrot.slane %v9180_v52, %v9134_v25  ;;  %v512_v29 = vrot.slane %v9180_v52, %v9137_v26  ;;  %vm630_vm4 = vcmp.lt.s32.totalorder %v9131_v24, 32 }
  0x69   : > { %vm716_vm5 = vcmp.lt.s32.totalorder %v9131_v24, 64  ;;  %vm802_vm6 = vcmp.lt.s32.totalorder %v9131_v24, 96 }
  0x6c   : > { %395 = vrot.lane.b32.xlu1 %v9063_v2, %s8859_s20  ;;  %393 = vrot.lane.b32.xlu0 %v9053_v0, %s8859_s20 }
  0x70   : > { %401 = vrot.lane.b32.xlu1 %v9073_v4, %s8859_s20  ;;  %403 = vrot.lane.b32.xlu0 %v9076_v5, %s8859_s20 }
  0x74   : > { %475 = vrot.lane.b32.xlu1 %v9056_v1, %s8860_s22  ;;  %309 = vrot.lane.b32.xlu0 %v9095_v6, %s8858_s24 }
  0x78   : > { %479 = vrot.lane.b32.xlu1 %v9053_v0, %s8860_s22  ;;  %477 = vrot.lane.b32.xlu0 %v9066_v3, %s8860_s22  ;;  %v430_v3 = vrot.slane %v9156_v37, %v9127_v18 }
  0x7c   : > { %483 = vrot.lane.b32.xlu1 %v9095_v6, %s8860_s22  ;;  %481 = vrot.lane.b32.xlu0 %v9063_v2, %s8860_s22 }
  0x80   : > { %397 = vrot.lane.b32.xlu1 %v9095_v6, %s8859_s20  ;;  %489 = vrot.lane.b32.xlu0 %v9076_v5, %s8860_s22 }
  0x84   : > { %485 = vrot.lane.b32.xlu0 %v9114_v7, %s8860_s22 }
  0xce   : > { %v306_v8 = vpop.permute.xlu1 %305  ;;  %v302_v9 = vpop.permute.xlu0 %301 }
  0xd2   : > { %v9118_v11 = vpop.permute.xlu1 %307  ;;  %v304_v12 = vpop.permute.xlu0 %303 }
  0xd3   : > { %v326_v50 = vsel %vm319_vm0, %v302_v9, %v304_v12  ;;  %v324_v61 = vsel %vm319_vm0, %v306_v8, %v9118_v11  ;;  %v325_v62 = vsel %vm319_vm0, %v304_v12, %v306_v8 }
  0xd4   : > { %v370_v63 = vmul.f32 %v336_v41, %v326_v50  ;;  %v372_v20 = vmul.f32 %v344_v40, %v324_v61  ;;  %v371_v21 = vmul.f32 %v340_v44, %v325_v62  ;;  %v532_v61 = vrot.slane %v9180_v52, %v9147_v32 }
  0xd6   : > { %v9122_v14 = vpop.permute.xlu1 %313  ;;  %v9124_v15 = vpop.permute.xlu0 %315  ;;  %v378_v30 = vadd.f32 %v370_v63, %v290_v49  ;;  %v380_v50 = vadd.f32 %v372_v20, %v292_v43 }
  0xd7   : > { %v327_v51 = vsel %vm319_vm0, %v9124_v15, %v302_v9  ;;  %v504_v9 = vrot.slane %v9180_v52, %v9140_v27  ;;  %v320_v31 = vsel %vm319_vm0, %v9122_v14, %v9124_v15  ;;  %v379_v15 = vadd.f32 %v371_v21, %v291_v53 }
  0xd8   : > { %v369_v0 = vmul.f32 %v332_v46, %v327_v51  ;;  %v296_v51 = vmul.f32 %v280_v45, %v9076_v5 }
  0xda   : > { %v392_v22 = vpop.permute.xlu1 %391  ;;  %v390_v23 = vpop.permute.xlu0 %389  ;;  %v377_v35 = vadd.f32 %v369_v0, %v289_v57 }
  0xdb   : > { %v412_v58 = vsel %vm405_vm1, %v390_v23, %v392_v22 }
  0xdc   : > { %v456_v16 = vmul.f32 %v422_v55, %v412_v58 }
  0xde   : > { %v9149_v33 = vpop.permute.xlu1 %395  ;;  %v394_v34 = vpop.permute.xlu0 %393  ;;  %v464_v42 = vadd.f32 %v456_v16, %v378_v30 }
  0xdf   : > { %v410_v8 = vsel %vm405_vm1, %v394_v34, %v9149_v33  ;;  %v411_v12 = vsel %vm405_vm1, %v392_v22, %v394_v34  ;;  %v516_v22 = vrot.slane %v9180_v52, %v9127_v18 }
  0xe0   : > { %v457_v34 = vmul.f32 %v426_v59, %v411_v12  ;;  %v458_v39 = vmul.f32 %v430_v3, %v410_v8  ;;  %v9261_v12 = vsub.s32 4, %v9120_v13 }
  0xe2   : > { %v9172_v47 = vpop.permute.xlu1 %401  ;;  %v404_v48 = vpop.permute.xlu0 %403  ;;  %v465_v62 = vadd.f32 %v457_v34, %v379_v15  ;;  %v466_v63 = vadd.f32 %v458_v39, %v380_v50  ;;  %v348_v20 = vrot.slane %v9142_v28, %v9261_v12  ;;  %v612_v15 = vld [vmem:[#allocation5 + $0x5] ss:$8 sm:$0xf0] }
  0xe3   : > { %v413_v60 = vsel %vm405_vm1, %v404_v48, %v390_v23  ;;  %v446_v23 = vrot.slane %v9156_v37, %v9147_v32  ;;  %v406_v55 = vsel %vm405_vm1, %v9172_v47, %v404_v48 }
  0xe4   : > { %v455_v17 = vmul.f32 %v418_v56, %v413_v60  ;;  %v376_v56 = vmul.f32 %v360_v54, %v320_v31 }
  0xe5   : > { %v462_v45 = vmul.f32 %v446_v23, %v406_v55 }
  0xe6   : > { %v476_v2 = vpop.permute.xlu1 %475  ;;  %v9201_v1 = vpop.permute.xlu0 %309  ;;  %v463_v44 = vadd.f32 %v455_v17, %v377_v35  ;;  %v384_v54 = vadd.f32 %v376_v56, %v296_v51  ;;  %v869_v51 = vld [vmem:[%s11546_s1 + $0x8] sm:$0xff] }
  0xe7   : > { %v323_v23 = vsel %vm319_vm0, %v9118_v11, %v9201_v1  ;;  %v520_v11 = vrot.slane %v9180_v52, %v9261_v12 }
  0xe8   : > { %v470_v16 = vadd.f32 %v462_v45, %v384_v54 }
  0xea   : > { %v480_v36 = vpop.permute.xlu1 %479  ;;  %v478_v38 = vpop.permute.xlu0 %477 }
  0xeb   : > { %v497_v40 = vsel %vm491_vm2, %v478_v38, %v480_v36  ;;  %v498_v41 = vsel %vm491_vm2, %v476_v2, %v478_v38 }
  0xec   : > { %v541_v46 = vmul.f32 %v504_v9, %v498_v41  ;;  %v542_v49 = vmul.f32 %v508_v10, %v497_v40  ;;  %v558_v41 = vld [vmem:[#allocation5 + $0x4] ss:$8 sm:$0xf] }
  0xee   : > { %v9233_v57 = vadd.f32 %v541_v46, %v463_v44  ;;  %v9235_v58 = vadd.f32 %v542_v49, %v464_v42  ;;  %v484_v59 = vpop.permute.xlu1 %483  ;;  %v482_v60 = vpop.permute.xlu0 %481  ;;  %v559_v42 = vld [vmem:[#allocation5 + $0x4] ss:$8 sm:$0xf0]  ;;  %v611_v49 = vld [vmem:[#allocation5 + $0x5] ss:$8 sm:$0xf] }
  0xef   : > { %v495_v43 = vsel %vm491_vm2, %v482_v60, %v484_v59  ;;  %v496_v5 = vsel %vm491_vm2, %v480_v36, %v482_v60  ;;  %v373_v36 = vmul.f32 %v348_v20, %v323_v23  ;;  %v868_v44 = vld [vmem:[%s11546_s1] sm:$0xff]  ;;  %v9331_v55 = vor.u32 %v559_v42, %v558_v41 }
  0xf0   : > { %v543_v48 = vmul.f32 %v512_v29, %v496_v5  ;;  %v544_v53 = vmul.f32 %v516_v22, %v495_v43  ;;  %616 = vrot.lane.b32.xlu0 %v9235_v58, %s8861_s8  ;;  %614 = vrot.lane.b32.xlu1 %v9233_v57, %s8861_s8  ;;  %v434_v29 = vrot.slane %v9156_v37, %v9261_v12  ;;  %v894_v56 = vsel %vm892_vm3, %v868_v44, 0  ;;  %v698_v60 = vld [vmem:[#allocation5 + $0x6] ss:$8 sm:$0xf0] }
  0xf1   : > { %11757 = vst [vmem:[#allocation13_spill] sm:$0xff] %v9331_v55  ;;  %v897_v43 = vsel %vm892_vm3, %v869_v51, 0  ;;  %v9339_v5 = vand.u32 4294901760, %v894_v56  ;;  %v569_v45 = vrot.slane %v9331_v55, %v9134_v25  ;;  %v573_v54 = vrot.slane %v9331_v55, %v9137_v26 }
  0xf2   : > { %v9247_v0 = vadd.f32 %v543_v48, %v465_v62  ;;  %v9249_v3 = vadd.f32 %v544_v53, %v466_v63  ;;  %v9251_v9 = vpop.permute.xlu0 %489  ;;  %v9273_v21 = vpop.permute.xlu1 %397  ;;  %v783_v53 = vld [vmem:[#allocation5 + $0x7] ss:$8 sm:$0xf] }
  0xf3   : > { %v499_v10 = vsel %vm491_vm2, %v9251_v9, %v476_v2  ;;  %v268_v2 = vrot.slane %v9129_v19, %v9261_v12  ;;  %v409_v31 = vsel %vm405_vm1, %v9149_v33, %v9273_v21  ;;  %11758 = vst [vmem:[#allocation14_spill] sm:$0xff] %v9339_v5 }
  0xf4   : > { %v548_v8 = vmul.f32 %v532_v61, %v499_v10  ;;  %620 = vrot.lane.b32.xlu0 %v9249_v3, %s8861_s8  ;;  %618 = vrot.lane.b32.xlu1 %v9247_v0, %s8861_s8  ;;  %v459_v22 = vmul.f32 %v434_v29, %v409_v31  ;;  %v9334_v61 = vor.u32 %v612_v15, %v611_v49 }
  0xf5   : > { %v293_v35 = vmul.f32 %v268_v2, %v9095_v6  ;;  %v11553_v6 = vmov 0.0   ;;  %v577_v10 = vrot.slane %v9331_v55, %v9127_v18  ;;  %v9351_v2 = vand.u32 4294901760, %v897_v43 }
  0xf6   : > { %v9263_v17 = vadd.f32 %v548_v8, %v470_v16  ;;  %v9281_v30 = vpop.permute.xlu0 %485  ;;  %2623 = vmatprep.mubr.f32.mxu1 %v11553_v6  ;;  %1031 = vmatprep.mubr.f32.mxu0 %v11553_v6  ;;  %v565_v16 = vrot.slane %v9331_v55, %v9140_v27  ;;  %v784_v8 = vld [vmem:[#allocation5 + $0x7] ss:$8 sm:$0xf0]  ;;  %v647_v20 = vrot.slane %v9334_v61, %v9134_v25 }
  0xf7   : > { %v494_v38 = vsel %vm491_vm2, %v484_v59, %v9281_v30  ;;  %v381_v34 = vadd.f32 %v373_v36, %v293_v35  ;;  %v697_v59 = vld [vmem:[#allocation5 + $0x6] ss:$8 sm:$0xf]  ;;  %11759 = vst [vmem:[#allocation15_spill] sm:$0xff] %v9351_v2  ;;  %v651_v23 = vrot.slane %v9334_v61, %v9137_v26  ;;  %v655_v29 = vrot.slane %v9334_v61, %v9127_v18 }
  0xf8   : > { %11756 = vst [vmem:[#allocation12_spill] sm:$0xff] %v9263_v17  ;;  %700 = vrot.lane.b32.xlu0 %v9233_v57, %s8862_s9  ;;  %628 = vrot.lane.b32.xlu1 %v9263_v17, %s8861_s8  ;;  %v545_v39 = vmul.f32 %v520_v11, %v494_v38  ;;  %v9343_v48 = vor.u32 %v698_v60, %v697_v59  ;;  %v9367_v11 = vsub.s32 5, %v9120_v13  ;;  %v9370_v38 = vsub.s32 6, %v9120_v13 }
  0xf9   : > { %v467_v33 = vadd.f32 %v459_v22, %v381_v34  ;;  %v9373_v22 = vsub.f32 %v894_v56, %v9339_v5  ;;  %v870_v34 = vld [vmem:[%s11546_s1 + $0x10] sm:$0xff]  ;;  %v9383_v41 = vor.u32 %v784_v8, %v783_v53  ;;  %v603_v13 = vmul.f32 %v569_v45, %v9235_v58 }
  0xfa   : > { %11761 = vst [vmem:[#allocation17_spill] sm:$0xff] %v9367_v11  ;;  %v9387_v42 = vmul.f32 %v565_v16, %v9233_v57  ;;  %v9392_v49 = vsub.f32 %v897_v43, %v9351_v2  ;;  %v604_v15 = vmul.f32 %v573_v54, %v9247_v0  ;;  %v605_v51 = vmul.f32 %v577_v10, %v9249_v3 }
  0xfb   : > { %v9307_v40 = vadd.f32 %v545_v39, %v467_v33  ;;  %11762 = vst [vmem:[#allocation18_spill] sm:$0xff] %v9373_v22  ;;  %v733_v39 = vrot.slane %v9343_v48, %v9134_v25  ;;  %v737_v33 = vrot.slane %v9343_v48, %v9137_v26  ;;  %v741_v60 = vrot.slane %v9343_v48, %v9127_v18 }
  0xfc   : > { %704 = vrot.lane.b32.xlu0 %v9247_v0, %s8862_s9  ;;  %702 = vrot.lane.b32.xlu1 %v9235_v58, %s8862_s9  ;;  %11763 = vst [vmem:[#allocation19_spill] sm:$0xff] %v9392_v49  ;;  %v272_v45 = vrot.slane %v9129_v19, %v9367_v11  ;;  %v276_v43 = vrot.slane %v9129_v19, %v9370_v38  ;;  %v9422_v16 = vand.u32 4294901760, %v9392_v49 }
  0xfd   : > { %v823_v53 = vrot.slane %v9383_v41, %v9137_v26  ;;  %v827_v54 = vrot.slane %v9383_v41, %v9127_v18 }
  0xfe   : > { %11765 = vst [vmem:[#allocation21_spill] sm:$0xff] %v9422_v16  ;;  %v9440_v36 = vmul.f32 %v272_v45, %v9114_v7 }
 0x100   : > { %714 = vrot.lane.b32.xlu0 %v9263_v17, %s8862_s9  ;;  %706 = vrot.lane.b32.xlu1 %v9249_v3, %s8862_s9 }
 0x104   : > { %790 = vrot.lane.b32.xlu0 %v9247_v0, %s8863_s10  ;;  %788 = vrot.lane.b32.xlu1 %v9235_v58, %s8863_s10  ;;  %v900_v58 = vsel %vm892_vm3, %v870_v34, 0  ;;  %v9407_v0 = vand.u32 4294901760, %v9373_v22 }
 0x105   : > { %v9424_v8 = vand.u32 4294901760, %v900_v58 }
 0x106   : > { %11764 = vst [vmem:[#allocation20_spill] sm:$0xff] %v9407_v0 }
 0x107   : > { %11766 = vst [vmem:[#allocation22_spill] sm:$0xff] %v9424_v8  ;;  %v9462_v32 = vsub.f32 %v900_v58, %v9424_v8 }
 0x108   : > { %794 = vrot.lane.b32.xlu0 %v9307_v40, %s8863_s10  ;;  %792 = vrot.lane.b32.xlu1 %v9249_v3, %s8863_s10  ;;  %v819_v3 = vrot.slane %v9383_v41, %v9134_v25 }
 0x10c   : > { %311 = vrot.lane.b32.xlu0 %v9114_v7, %s8858_s24  ;;  %786 = vrot.lane.b32.xlu1 %v9233_v57, %s8863_s10 }
 0x110   : > { %487 = vrot.lane.b32.xlu0 %v9073_v4, %s8860_s22  ;;  %399 = vrot.lane.b32.xlu1 %v9114_v7, %s8859_s20  ;;  %s8865_s20 = smov [#allocation7]  }
 0x111   : > { %s8772_s22 = sshll.u32 %s8865_s20, 4  ;;  %s8773_s22 = int_to_ptr.vmem [resolvable:$false] %s8772_s22 }
 0x112   : > { %s8774_s29 = scalar_lea.vmem %s8773_s22, 49152 }
 0x114   : > { %622 = vrot.lane.b32.xlu1 %v9307_v40, %s8861_s8 }
 0x162   : > { %v617_v46 = vpop.permute.xlu0 %616  ;;  %v9326_v50 = vpop.permute.xlu1 %614 }
 0x163   : > { %v637_v57 = vsel %vm630_vm4, %v9326_v50, %v617_v46 }
 0x164   : > { %v681_v34 = vmul.f32 %v647_v20, %v637_v57  ;;  %v9443_v20 = vmul.f32 %v276_v43, %v9073_v4  ;;  %v871_v57 = vld [vmem:[%s11546_s1 + $0x18] sm:$0xff]  ;;  %v1046_v43 = vsub.f32 %v9392_v49, %v9422_v16 }
 0x165   : > { %v903_v7 = vsel %vm892_vm3, %v871_v57, 0  ;;  %v9483_v57 = vand.u32 4294901760, %v9462_v32 }
 0x166   : > { %v9336_v62 = vpop.permute.xlu0 %620  ;;  %v619_v63 = vpop.permute.xlu1 %618 }
 0x167   : > { %v636_v25 = vsel %vm630_vm4, %v617_v46, %v619_v63  ;;  %v635_v19 = vsel %vm630_vm4, %v619_v63, %v9336_v62  ;;  %v1035_v46 = vsub.f32 %v9373_v22, %v9407_v0  ;;  %v689_v0 = vadd.f32 %v681_v34, %v603_v13  ;;  %11770 = vst [vmem:[#allocation26_spill] sm:$0xff] %v9483_v57 }
 0x168   : > { %v682_v45 = vmul.f32 %v651_v23, %v636_v25  ;;  %v9480_v34 = vand.u32 4294901760, %v1046_v43 }
 0x169   : > { %v9471_v16 = vand.u32 4294901760, %v1035_v46  ;;  %v9485_v46 = vand.u32 4294901760, %v903_v7 }
 0x16a   : > { %v9360_v31 = vpop.permute.xlu0 %700  ;;  %v9362_v35 = vpop.permute.xlu1 %628  ;;  %11769 = vst [vmem:[#allocation25_spill] sm:$0xff] %v9480_v34 }
 0x16b   : > { %11760 = vst [vmem:[#allocation16_spill] sm:$0xff] %v9362_v35  ;;  %11768 = vst [vmem:[#allocation24_spill] sm:$0xff] %v9471_v16  ;;  %v638_v13 = vsel %vm630_vm4, %v9362_v35, %v9326_v50 }
 0x16c   : > { %11771 = vst [vmem:[#allocation27_spill] sm:$0xff] %v9485_v46 }
 0x16e   : > { %v705_v56 = vpop.permute.xlu0 %704  ;;  %v703_v59 = vpop.permute.xlu1 %702 }
 0x16f   : > { %v723_v10 = vsel %vm716_vm5, %v9360_v31, %v703_v59  ;;  %v722_v44 = vsel %vm716_vm5, %v703_v59, %v705_v56  ;;  %v683_v59 = vmul.f32 %v655_v29, %v635_v19  ;;  %v872_v29 = vld [vmem:[%s11546_s1 + $0x20] sm:$0xff] }
 0x170   : > { %v767_v18 = vmul.f32 %v733_v39, %v723_v10  ;;  %v768_v23 = vmul.f32 %v737_v33, %v722_v44  ;;  %v690_v44 = vadd.f32 %v682_v45, %v604_v15  ;;  %v11772_v15 = vrot.slane %v9334_v61, %v9140_v27 }
 0x171   : > { %v691_v63 = vadd.f32 %v683_v59, %v605_v51 }
 0x172   : > { %v9428_v26 = vpop.permute.xlu0 %714  ;;  %v9430_v6 = vpop.permute.xlu1 %706  ;;  %v775_v58 = vadd.f32 %v767_v18, %v689_v0  ;;  %v680_v0 = vmul.f32 %v11772_v15, %v638_v13  ;;  %v9513_v13 = vsub.f32 %v903_v7, %v9485_v46 }
 0x173   : > { %11767 = vst [vmem:[#allocation23_spill] sm:$0xff] %v9428_v26  ;;  %v721_v4 = vsel %vm716_vm5, %v705_v56, %v9430_v6  ;;  %v724_v56 = vsel %vm716_vm5, %v9428_v26, %v9360_v31  ;;  %v873_v31 = vld [vmem:[%s11546_s1 + $0x28] sm:$0xff]  ;;  %v882_v26 = vld [vmem:[%s11546_s1 + $0x70] sm:$0xff] }
 0x174   : > { %v769_v19 = vmul.f32 %v741_v60, %v721_v4  ;;  %v906_v60 = vsel %vm892_vm3, %v872_v29, 0  ;;  %v1057_v29 = vsub.f32 %v9462_v32, %v9483_v57 }
 0x176   : > { %v791_v39 = vpop.permute.xlu0 %790  ;;  %v789_v10 = vpop.permute.xlu1 %788  ;;  %v777_v45 = vadd.f32 %v769_v19, %v691_v63 }
 0x177   : > { %v808_v25 = vsel %vm802_vm6, %v789_v10, %v791_v39 }
 0x178   : > { %v853_v33 = vmul.f32 %v819_v3, %v808_v25  ;;  %v776_v3 = vadd.f32 %v768_v23, %v690_v44  ;;  %v11773_v25 = vrot.slane %v9343_v48, %v9140_v27 }
 0x17a   : > { %v861_v49 = vadd.f32 %v853_v33, %v775_v58  ;;  %v9491_v22 = vpop.permute.xlu0 %794  ;;  %v793_v50 = vpop.permute.xlu1 %792  ;;  %v766_v23 = vmul.f32 %v11773_v25, %v724_v56  ;;  %v688_v56 = vadd.f32 %v680_v0, %v9387_v42  ;;  %v11777_v0 = vrot.slane %v9142_v28, %v9370_v38 }
 0x17b   : > { %v806_v51 = vsel %vm802_vm6, %v793_v50, %v9491_v22  ;;  %v807_v18 = vsel %vm802_vm6, %v791_v39, %v793_v50  ;;  %v9515_v39 = vand.u32 4294901760, %v906_v60 }
 0x17c   : > { %v9505_v4 = vand.u32 4294901760, %v861_v49  ;;  %v854_v43 = vmul.f32 %v823_v53, %v807_v18  ;;  %v855_v59 = vmul.f32 %v827_v54, %v806_v51  ;;  %v909_v54 = vsel %vm892_vm3, %v873_v31, 0 }
 0x17d   : > { %11774 = vst [vmem:[#allocation28_spill] sm:$0xff] %v9515_v39  ;;  %v774_v51 = vadd.f32 %v766_v23, %v688_v56  ;;  %v9559_v25 = vsub.f32 %v906_v60, %v9515_v39  ;;  %v874_v60 = vld [vmem:[%s11546_s1 + $0x30] sm:$0xff] }
 0x17e   : > { %v9518_v58 = vsub.f32 %v861_v49, %v9505_v4  ;;  %v862_v63 = vadd.f32 %v854_v43, %v776_v3  ;;  %v863_v19 = vadd.f32 %v855_v59, %v777_v45  ;;  %v312_v33 = vpop.permute.xlu0 %311  ;;  %966 = vmatprep.subr.mxu0 %v9505_v4  ;;  %v9521_v53 = vpop.permute.xlu1 %786  ;;  %v11776_v3 = vrot.slane %v9142_v28, %v9367_v11 }
 0x17f   : > { %11775 = vst [vmem:[#allocation29_spill] sm:$0xff] %v9521_v53  ;;  %v321_v7 = vsel %vm319_vm0, %v312_v33, %v9122_v14  ;;  %v322_v49 = vsel %vm319_vm0, %v9201_v1, %v312_v33  ;;  %v809_v44 = vsel %vm802_vm6, %v9521_v53, %v789_v10  ;;  %v11778_v1 = vrot.slane %v9383_v41, %v9140_v27 }
 0x180   : > { %v9534_v50 = vand.u32 4294901760, %v863_v19  ;;  %v9536_v15 = vand.u32 4294901760, %v862_v63  ;;  %v374_v42 = vmul.f32 %v11776_v3, %v322_v49  ;;  %v375_v14 = vmul.f32 %v11777_v0, %v321_v7 }
 0x181   : > { %v852_v18 = vmul.f32 %v11778_v1, %v809_v44  ;;  %v11567_v31 = vand.u32 4294901760, %v9518_v58  ;;  %v9549_v10 = vand.u32 4294901760, %v9513_v13  ;;  %v9561_v27 = vand.u32 4294901760, %v909_v54 }
 0x182   : > { %v9552_v45 = vsub.f32 %v863_v19, %v9534_v50  ;;  %v9555_v43 = vsub.f32 %v862_v63, %v9536_v15  ;;  %v488_v59 = vpop.permute.xlu0 %487  ;;  %2558 = vmatprep.subr.mxu1 %v9534_v50  ;;  %v400_v28 = vpop.permute.xlu1 %399  ;;  %v382_v23 = vadd.f32 %v374_v42, %v9440_v36  ;;  %v383_v56 = vadd.f32 %v375_v14, %v9443_v20 }
 0x183   : > { %11779 = vst [vmem:[#allocation30_spill] sm:$0xff] %v9549_v10  ;;  %11780 = vst [vmem:[#allocation31_spill] sm:$0xff] %v9561_v27  ;;  %v860_v33 = vadd.f32 %v852_v18, %v774_v51  ;;  %v492_v19 = vsel %vm491_vm2, %v488_v59, %v9251_v9  ;;  %v407_v63 = vsel %vm405_vm1, %v400_v28, %v9172_v47  ;;  %2560 = vmatpush1.msra.mxu1 %v9536_v15  ;;  %v11783_v3 = vmov 0.0  }
 0x184   : > { %v493_v36 = vsel %vm491_vm2, %v9281_v30, %v488_v59  ;;  %v408_v9 = vsel %vm405_vm1, %v9273_v21, %v400_v28  ;;  %v11781_v7 = vrot.slane %v9156_v37, %v9370_v38  ;;  %2629 = vmatmul.mubr.f32.vlgmr.msra.gmra.mrb[0].mxu1 %v9471_v16  ;;  %v11782_v44 = vrot.slane %v9156_v37, %v9367_v11 }
 0x185   : > { %v9585_v49 = vand.u32 4294901760, %v860_v33  ;;  %v1299_v30 = vsub.f32 %v9518_v58, %v11567_v31  ;;  %2634 = vmatprep.mubr.f32.mxu1 %v11783_v3  ;;  %v11568_v21 = vand.u32 4294901760, %v9552_v45  ;;  %v11784_v42 = vrot.slane %v9180_v52, %v9370_v38 }
 0x186   : > { %v461_v47 = vmul.f32 %v11781_v7, %v407_v63  ;;  %v460_v20 = vmul.f32 %v11782_v44, %v408_v9  ;;  %v11566_v51 = vand.u32 4294901760, %v9555_v43  ;;  %v912_v1 = vsel %vm892_vm3, %v874_v60, 0 }
 0x187   : > { %v547_v0 = vmul.f32 %v11784_v42, %v492_v19  ;;  %v9601_v37 = vsub.f32 %v860_v33, %v9585_v49  ;;  %v11785_v18 = vrot.slane %v9180_v52, %v9367_v11  ;;  %968 = vmatpush1.msra.mxu0 %v9585_v49  ;;  %v1300_v63 = vand.u32 4294901760, %v1299_v30  ;;  %v875_v52 = vld [vmem:[%s11546_s1 + $0x38] sm:$0xff] }
 0x188   : > { %v469_v14 = vadd.f32 %v461_v47, %v383_v56  ;;  %v468_v28 = vadd.f32 %v460_v20, %v382_v23  ;;  %1037 = vmatmul.mubr.f32.vlgmr.msra.gmra.mrb[0].mxu0 %v9471_v16  ;;  %2640 = vmatmul.mubr.f32.gmra.mrb[2].mxu1 %v9480_v34  ;;  %v2891_v19 = vsub.f32 %v9552_v45, %v11568_v21  ;;  %v9615_v33 = vand.u32 4294901760, %v9559_v25 }
 0x189   : > { %v546_v59 = vmul.f32 %v11785_v18, %v493_v36  ;;  %1301 = vmatprep.subr.mxu0 %v1300_v63  ;;  %1042 = vmatprep.mubr.f32.mxu0 %v11783_v3  ;;  %v2897_v60 = vsub.f32 %v9555_v43, %v11566_v51  ;;  %v11565_v56 = vand.u32 4294901760, %v9601_v37  ;;  %v9628_v36 = vsub.f32 %v909_v54, %v9561_v27 }
 0x18a   : > { %v9607_v9 = vadd.f32 %v547_v0, %v469_v14  ;;  %11786 = vst [vmem:[#allocation32_spill] sm:$0xff] %v9615_v33  ;;  %v2892_v7 = vand.u32 4294901760, %v2891_v19  ;;  %2645 = vmatprep.mubr.f32.mxu1 %v11783_v3  ;;  %v9636_v47 = vand.u32 4294901760, %v1057_v29  ;;  %v1068_v44 = vsub.f32 %v9513_v13, %v9549_v10  ;;  %v876_v29 = vld [vmem:[%s11546_s1 + $0x40] sm:$0xff] }
 0x18b   : > { %v9620_v23 = vadd.f32 %v546_v59, %v468_v28  ;;  %v9640_v20 = vand.u32 4294901760, %v912_v1  ;;  %v2898_v54 = vand.u32 4294901760, %v2897_v60  ;;  %v1305_v30 = vsub.f32 %v9601_v37, %v11565_v56 }
 0x18c   : > { %626 = vrot.lane.b32.xlu1 %v9607_v9, %s8861_s8  ;;  %11788 = vst [vmem:[#allocation34_spill] sm:$0xff] %v9636_v47  ;;  %v915_v42 = vsel %vm892_vm3, %v875_v52, 0  ;;  %2893 = vmatprep.subr.mxu1 %v2892_v7  ;;  %v1079_v14 = vsub.f32 %v9559_v25, %v9615_v33  ;;  %v9656_v18 = vand.u32 4294901760, %v9628_v36  ;;  %v9660_v59 = vand.u32 4294901760, %v1068_v44  ;;  %v877_v52 = vld [vmem:[%s11546_s1 + $0x48] sm:$0xff] }
 0x18d   : > { %11787 = vst [vmem:[#allocation33_spill] sm:$0xff] %v9620_v23  ;;  %624 = vrot.lane.b32.xlu0 %v9620_v23, %s8861_s8  ;;  %1048 = vmatmul.mubr.f32.gmra.mrb[2].mxu0 %v9480_v34  ;;  %v1306_v0 = vand.u32 4294901760, %v1305_v30  ;;  %v9663_v28 = vsub.f32 %v912_v1, %v9640_v20  ;;  %v9665_v63 = vand.u32 4294901760, %v915_v42  ;;  %v918_v19 = vsel %vm892_vm3, %v876_v29, 0  ;;  %v878_v29 = vld [vmem:[%s11546_s1 + $0x50] sm:$0xff]  ;;  %s8627_s8 = smul.u32 1536, %s9038_s11 }
 0x18e   : > { %2899 = vmatpush1.msra.mxu1 %v2898_v54  ;;  %1053 = vmatprep.mubr.f32.mxu0 %v11783_v3  ;;  %11789 = vst [vmem:[#allocation35_spill] sm:$0xff] %v9656_v18  ;;  %11790 = vst [vmem:[#allocation36_spill] sm:$0xff] %v9660_v59  ;;  %v9678_v1 = vand.u32 4294901760, %v1079_v14  ;;  %v1090_v60 = vsub.f32 %v9628_v36, %v9656_v18  ;;  %v9690_v54 = vand.u32 4294901760, %v918_v19  ;;  %v921_v30 = vsel %vm892_vm3, %v877_v52, 0 }
 0x18f   : > { %2651 = vmatmul.mubr.f32.gmra.mrb[4].mxu1 %v9636_v47  ;;  %3133 = vmatprep.subr.mxu1 %v9552_v45  ;;  %v9685_v7 = vand.u32 4294901760, %v9663_v28  ;;  %v9688_v44 = vsub.f32 %v915_v42, %v9665_v63  ;;  %v924_v51 = vsel %vm892_vm3, %v878_v29, 0  ;;  %s10821_s7 = scalar_lea.vmem [#allocation7], %s8627_s8 }
 0x190   : > { %710 = vrot.lane.b32.xlu1 %v9620_v23, %s8862_s9  ;;  %1307 = vmatpush1.msra.mxu0 %v1306_v0  ;;  %11791 = vst [vmem:[#allocation37_spill] sm:$0xff] %v9678_v1  ;;  %v9702_v42 = vand.u32 4294901760, %v1090_v60  ;;  %v9704_v0 = vand.u32 4294901760, %v921_v30  ;;  %v9714_v56 = vsub.f32 %v918_v19, %v9690_v54  ;;  %v879_v60 = vld [vmem:[%s11546_s1 + $0x58] sm:$0xff]  ;;  %v9729_v19 = vand.u32 4294901760, %v924_v51  ;;  %s7542_s18 = sshll.u32 %s10821_s7, 4  ;;  %s11493_s18 = int_to_ptr.vmem [resolvable:$true] %s7542_s18 }
 0x191   : > { %708 = vrot.lane.b32.xlu0 %v9307_v40, %s8862_s9  ;;  %2656 = vmatprep.mubr.f32.mxu1 %v11783_v3  ;;  %11792 = vst [vmem:[#allocation38_spill] sm:$0xff] %v9685_v7  ;;  %v1101_v14 = vsub.f32 %v9663_v28, %v9685_v7  ;;  %v9711_v52 = vand.u32 4294901760, %v9688_v44  ;;  %s8768_s24 = scalar_lea.vmem %s11493_s18, 24576  ;;  %p8775_p9 = scmp.lt.s32.totalorder %s11493_s18, %s8773_s22 }
 0x192   : > { %1059 = vmatmul.mubr.f32.gmra.mrb[4].mxu0 %v9636_v47  ;;  %1541 = vmatprep.subr.mxu0 %v9518_v58  ;;  %11793 = vst [vmem:[#allocation39_spill] sm:$0xff] %v9702_v42  ;;  %11795 = vst [vmem:[#allocation41_spill] sm:$0xff] %v9714_v56  ;;  %v9727_v31 = vsub.f32 %v921_v30, %v9704_v0  ;;  %v880_v30 = vld [vmem:[%s11546_s1 + $0x60] sm:$0xff]  ;;  %p8769_p2 = scmp.ne.s32.totalorder %s11493_s18, %s8768_s24  ;;  %p8776_p12 = scmp.lt.s32.totalorder %s8774_s29, %s8768_s24 }
 0x193   : > { %2662 = vmatmul.mubr.f32.gmra.mrb[6].mxu1 %v9660_v59  ;;  %1064 = vmatprep.mubr.f32.mxu0 %v11783_v3  ;;  %11794 = vst [vmem:[#allocation40_spill] sm:$0xff] %v9711_v52  ;;  %v9733_v29 = vand.u32 4294901760, %v1101_v14  ;;  %v1112_v21 = vsub.f32 %v9688_v44, %v9711_v52  ;;  %v9750_v14 = vsub.f32 %v924_v51, %v9729_v19  ;;  %v881_v51 = vld [vmem:[%s11546_s1 + $0x68] sm:$0xff] }
 0x194   : > { %796 = vrot.lane.b32.xlu1 %v9620_v23, %s8863_s10  ;;  %2667 = vmatprep.mubr.f32.mxu1 %v11783_v3  ;;  %11796 = vst [vmem:[#allocation42_spill] sm:$0xff] %v9727_v31  ;;  %v9747_v47 = vand.u32 4294901760, %v9727_v31  ;;  %p8770_p6 = pnand %p8769_p2, %p8988_p13  ;;  %p8777_p0 = por %p8776_p12, %p8775_p9 }
 0x195   : > { %712 = vrot.lane.b32.xlu0 %v9607_v9, %s8862_s9  ;;  %11797 = vst [vmem:[#allocation43_spill] sm:$0xff] %v9733_v29  ;;  %11800 = vst [vmem:[#allocation46_spill] sm:$0xff] %v9750_v14  ;;  %v9754_v34 = vand.u32 4294901760, %v1112_v21  ;;  %v9769_v21 = vand.u32 4294901760, %v9750_v14 }
 0x196   : > { %1070 = vmatmul.mubr.f32.gmra.mrb[6].mxu0 %v9660_v59  ;;  %v9738_v59 = vand.u32 4294901760, %v9714_v56  ;;  %11799 = vst [vmem:[#allocation45_spill] sm:$0xff] %v9747_v47  ;;  %v1134_v23 = vsub.f32 %v9727_v31, %v9747_v47  ;;  %v936_v47 = vsel %vm892_vm3, %v882_v26, 0  ;;  %v891_v31 = vld [vmem:[%s11546_s1 + $0xb8] sm:$0xff]  ;;  %p8771_p8 = pneg %p8770_p6 }
 0x197   : > { %2673 = vmatmul.mubr.f32.gmra.mrb[8].mxu1 %v9678_v1  ;;  %1075 = vmatprep.mubr.f32.mxu0 %v11783_v3  ;;  %11801 = vst [vmem:[#allocation47_spill] sm:$0xff] %v9754_v34  ;;  %11802 = vst [vmem:[#allocation48_spill] sm:$0xff] %v9769_v21 }
 0x198   : > { %800 = vrot.lane.b32.xlu1 %v9263_v17, %s8863_s10  ;;  %2678 = vmatprep.mubr.f32.mxu1 %v11783_v3  ;;  %11798 = vst [vmem:[#allocation44_spill] sm:$0xff] %v9738_v59  ;;  %v9786_v11 = vand.u32 4294901760, %v1134_v23  ;;  %v883_v23 = vld [vmem:[%s11546_s1 + $0x78] sm:$0xff]  ;;  %p8778_p5 = pnand %p8777_p0, %p8771_p8 }
 0x199   : > { %798 = vrot.lane.b32.xlu0 %v9607_v9, %s8863_s10  ;;  %v939_v52 = vsel %vm892_vm3, %v883_v23, 0  ;;  %s11491_s10 = scalar_lea.hbm %s11548_s3, %s8628_s21 }
 0x19a   : > { %1081 = vmatmul.mubr.f32.gmra.mrb[8].mxu0 %v9678_v1  ;;  %v927_v1 = vsel %vm892_vm3, %v879_v60, 0  ;;  %v1123_v60 = vsub.f32 %v9714_v56, %v9738_v59  ;;  %11805 = vst [vmem:[#allocation51_spill] sm:$0xff] %v9786_v11 }
 0x19b   : > { %2684 = vmatmul.mubr.f32.gmra.mrb[10].mxu1 %v9702_v42  ;;  %1086 = vmatprep.mubr.f32.mxu0 %v11783_v3  ;;  %v9758_v16 = vand.u32 4294901760, %v927_v1 }
 0x19c   : > { %2689 = vmatprep.mubr.f32.mxu1 %v11783_v3  ;;  %v9773_v17 = vand.u32 4294901760, %v1123_v60  ;;  %v1145_v60 = vsub.f32 %v9750_v14, %v9769_v21  ;;  %v9808_v21 = vand.u32 4294901760, %v936_v47 }
 0x19e   : > { %1092 = vmatmul.mubr.f32.gmra.mrb[10].mxu0 %v9702_v42  ;;  %v930_v42 = vsel %vm892_vm3, %v880_v30, 0  ;;  %11803 = vst [vmem:[#allocation49_spill] sm:$0xff] %v9773_v17  ;;  %v9776_v30 = vsub.f32 %v927_v1, %v9758_v16 }
 0x19f   : > { %2695 = vmatmul.mubr.f32.gmra.mrb[12].mxu1 %v9733_v29  ;;  %1097 = vmatprep.mubr.f32.mxu0 %v11783_v3  ;;  %v9778_v53 = vand.u32 4294901760, %v930_v42 }
 0x1a0   : > { %2700 = vmatprep.mubr.f32.mxu1 %v11783_v3  ;;  %11804 = vst [vmem:[#allocation50_spill] sm:$0xff] %v9776_v30  ;;  %v9793_v1 = vand.u32 4294901760, %v9776_v30 }
 0x1a2   : > { %1103 = vmatmul.mubr.f32.gmra.mrb[12].mxu0 %v9733_v29  ;;  %v933_v29 = vsel %vm892_vm3, %v881_v51, 0  ;;  %11806 = vst [vmem:[#allocation52_spill] sm:$0xff] %v9793_v1  ;;  %v9796_v51 = vsub.f32 %v930_v42, %v9778_v53  ;;  %v1156_v42 = vsub.f32 %v9776_v30, %v9793_v1  ;;  %v9829_v1 = vand.u32 4294901760, %v939_v52  ;;  %v889_v30 = vld [vmem:[%s11546_s1 + $0xa8] sm:$0xff] }
 0x1a3   : > { %2706 = vmatmul.mubr.f32.gmra.mrb[14].mxu1 %v9754_v34  ;;  %1108 = vmatprep.mubr.f32.mxu0 %v11783_v3  ;;  %v9798_v35 = vand.u32 4294901760, %v933_v29 }
 0x1a4   : > { %2711 = vmatprep.mubr.f32.mxu1 %v11783_v3  ;;  %11807 = vst [vmem:[#allocation53_spill] sm:$0xff] %v9796_v51  ;;  %v9815_v26 = vand.u32 4294901760, %v9796_v51 }
 0x1a5   : > { %v9818_v59 = vsub.f32 %v933_v29, %v9798_v35  ;;  %v9833_v29 = vand.u32 4294901760, %v1156_v42  ;;  %v9850_v42 = vsub.f32 %v939_v52, %v9829_v1  ;;  %v886_v52 = vld [vmem:[%s11546_s1 + $0x90] sm:$0xff] }
 0x1a6   : > { %1114 = vmatmul.mubr.f32.gmra.mrb[14].mxu0 %v9754_v34  ;;  %v9806_v34 = vand.u32 4294901760, %v1145_v60  ;;  %11809 = vst [vmem:[#allocation55_spill] sm:$0xff] %v9815_v26  ;;  %v884_v60 = vld [vmem:[%s11546_s1 + $0x80] sm:$0xff]  ;;  %v1167_v23 = vsub.f32 %v9796_v51, %v9815_v26 }
 0x1a7   : > { %2717 = vmatmul.mubr.f32.gmra.mrb[16].mxu1 %v9773_v17  ;;  %1119 = vmatprep.mubr.f32.mxu0 %v11783_v3  ;;  %11810 = vst [vmem:[#allocation56_spill] sm:$0xff] %v9818_v59  ;;  %11812 = vst [vmem:[#allocation58_spill] sm:$0xff] %v9833_v29  ;;  %v9838_v7 = vand.u32 4294901760, %v9818_v59 }
 0x1a8   : > { %2722 = vmatprep.mubr.f32.mxu1 %v11783_v3  ;;  %11808 = vst [vmem:[#allocation54_spill] sm:$0xff] %v9806_v34  ;;  %11815 = vst [vmem:[#allocation61_spill] sm:$0xff] %v9850_v42  ;;  %v9854_v26 = vand.u32 4294901760, %v1167_v23  ;;  %v9869_v23 = vand.u32 4294901760, %v9850_v42 }
 0x1a9   : > { %11813 = vst [vmem:[#allocation59_spill] sm:$0xff] %v9838_v7 }
 0x1aa   : > { %1125 = vmatmul.mubr.f32.gmra.mrb[16].mxu0 %v9773_v17  ;;  %v9827_v17 = vsub.f32 %v936_v47, %v9808_v21  ;;  %v885_v47 = vld [vmem:[%s11546_s1 + $0x88] sm:$0xff]  ;;  %11816 = vst [vmem:[#allocation62_spill] sm:$0xff] %v9854_v26  ;;  %11817 = vst [vmem:[#allocation63_spill] sm:$0xff] %v9869_v23 }
 0x1ab   : > { %2728 = vmatmul.mubr.f32.gmra.mrb[18].mxu1 %v9786_v11  ;;  %1130 = vmatprep.mubr.f32.mxu0 %v11783_v3 }
 0x1ac   : > { %2733 = vmatprep.mubr.f32.mxu1 %v11783_v3  ;;  %11811 = vst [vmem:[#allocation57_spill] sm:$0xff] %v9827_v17  ;;  %v9847_v18 = vand.u32 4294901760, %v9827_v17 }
 0x1ae   : > { %1136 = vmatmul.mubr.f32.gmra.mrb[18].mxu0 %v9786_v11  ;;  %v942_v11 = vsel %vm892_vm3, %v884_v60, 0  ;;  %11814 = vst [vmem:[#allocation60_spill] sm:$0xff] %v9847_v18  ;;  %v1178_v60 = vsub.f32 %v9818_v59, %v9838_v7  ;;  %v1189_v10 = vsub.f32 %v9827_v17, %v9847_v18  ;;  %v887_v18 = vld [vmem:[%s11546_s1 + $0x98] sm:$0xff] }
 0x1af   : > { %2739 = vmatmul.mubr.f32.gmra.mrb[20].mxu1 %v9806_v34  ;;  %1141 = vmatprep.mubr.f32.mxu0 %v11783_v3  ;;  %v9858_v33 = vand.u32 4294901760, %v942_v11  ;;  %v951_v51 = vsel %vm892_vm3, %v887_v18, 0 }
 0x1b0   : > { %2744 = vmatprep.mubr.f32.mxu1 %v11783_v3  ;;  %v9873_v7 = vand.u32 4294901760, %v1178_v60  ;;  %v9886_v17 = vand.u32 4294901760, %v1189_v10  ;;  %v1200_v60 = vsub.f32 %v9850_v42, %v9869_v23  ;;  %v888_v10 = vld [vmem:[%s11546_s1 + $0xa0] sm:$0xff] }
 0x1b2   : > { %1147 = vmatmul.mubr.f32.gmra.mrb[20].mxu0 %v9806_v34  ;;  %v945_v34 = vsel %vm892_vm3, %v885_v47, 0  ;;  %11818 = vst [vmem:[#allocation64_spill] sm:$0xff] %v9873_v7  ;;  %v9876_v47 = vsub.f32 %v942_v11, %v9858_v33  ;;  %11820 = vst [vmem:[#allocation66_spill] sm:$0xff] %v9886_v17 }
 0x1b3   : > { %2750 = vmatmul.mubr.f32.gmra.mrb[22].mxu1 %v9833_v29  ;;  %1152 = vmatprep.mubr.f32.mxu0 %v11783_v3  ;;  %v9878_v57 = vand.u32 4294901760, %v945_v34 }
 0x1b4   : > { %2755 = vmatprep.mubr.f32.mxu1 %v11783_v3  ;;  %11819 = vst [vmem:[#allocation65_spill] sm:$0xff] %v9876_v47  ;;  %v9893_v11 = vand.u32 4294901760, %v9876_v47 }
 0x1b6   : > { %1158 = vmatmul.mubr.f32.gmra.mrb[22].mxu0 %v9833_v29  ;;  %v948_v29 = vsel %vm892_vm3, %v886_v52, 0  ;;  %11821 = vst [vmem:[#allocation67_spill] sm:$0xff] %v9893_v11  ;;  %v9896_v52 = vsub.f32 %v945_v34, %v9878_v57  ;;  %v9910_v34 = vand.u32 4294901760, %v1200_v60  ;;  %v1211_v23 = vsub.f32 %v9876_v47, %v9893_v11 }
 0x1b7   : > { %2761 = vmatmul.mubr.f32.gmra.mrb[24].mxu1 %v9854_v26  ;;  %1163 = vmatprep.mubr.f32.mxu0 %v11783_v3  ;;  %v9898_v59 = vand.u32 4294901760, %v948_v29 }
 0x1b8   : > { %2766 = vmatprep.mubr.f32.mxu1 %v11783_v3  ;;  %11822 = vst [vmem:[#allocation68_spill] sm:$0xff] %v9896_v52  ;;  %11823 = vst [vmem:[#allocation69_spill] sm:$0xff] %v9910_v34  ;;  %v9915_v18 = vand.u32 4294901760, %v9896_v52  ;;  %v9931_v11 = vand.u32 4294901760, %v1211_v23 }
 0x1b9   : > { %v9918_v42 = vsub.f32 %v948_v29, %v9898_v59 }
 0x1ba   : > { %1169 = vmatmul.mubr.f32.gmra.mrb[24].mxu0 %v9854_v26  ;;  %v9906_v26 = vand.u32 4294901760, %v951_v51  ;;  %11824 = vst [vmem:[#allocation70_spill] sm:$0xff] %v9915_v18  ;;  %11827 = vst [vmem:[#allocation73_spill] sm:$0xff] %v9931_v11  ;;  %v1222_v29 = vsub.f32 %v9896_v52, %v9915_v18 }
 0x1bb   : > { %2772 = vmatmul.mubr.f32.gmra.mrb[26].mxu1 %v9873_v7  ;;  %1174 = vmatprep.mubr.f32.mxu0 %v11783_v3  ;;  %11825 = vst [vmem:[#allocation71_spill] sm:$0xff] %v9918_v42 }
 0x1bc   : > { %2777 = vmatprep.mubr.f32.mxu1 %v11783_v3  ;;  %v9927_v60 = vsub.f32 %v951_v51, %v9906_v26  ;;  %v890_v51 = vld [vmem:[%s11546_s1 + $0xb0] sm:$0xff]  ;;  %v9951_v18 = vand.u32 4294901760, %v1222_v29 }
 0x1be   : > { %1180 = vmatmul.mubr.f32.gmra.mrb[26].mxu0 %v9873_v7  ;;  %v954_v7 = vsel %vm892_vm3, %v888_v10, 0  ;;  %11826 = vst [vmem:[#allocation72_spill] sm:$0xff] %v9927_v60  ;;  %v9936_v10 = vand.u32 4294901760, %v9918_v42  ;;  %v9947_v23 = vand.u32 4294901760, %v9927_v60  ;;  %11830 = vst [vmem:[#allocation76_spill] sm:$0xff] %v9951_v18 }
 0x1bf   : > { %2783 = vmatmul.mubr.f32.gmra.mrb[28].mxu1 %v9886_v17  ;;  %1185 = vmatprep.mubr.f32.mxu0 %v11783_v3  ;;  %v9938_v47 = vand.u32 4294901760, %v954_v7 }
 0x1c0   : > { %2788 = vmatprep.mubr.f32.mxu1 %v11783_v3  ;;  %11828 = vst [vmem:[#allocation74_spill] sm:$0xff] %v9936_v10  ;;  %11829 = vst [vmem:[#allocation75_spill] sm:$0xff] %v9947_v23  ;;  %v1233_v52 = vsub.f32 %v9918_v42, %v9936_v10  ;;  %v1244_v29 = vsub.f32 %v9927_v60, %v9947_v23 }
 0x1c2   : > { %1191 = vmatmul.mubr.f32.gmra.mrb[28].mxu0 %v9886_v17  ;;  %v957_v17 = vsel %vm892_vm3, %v889_v30, 0  ;;  %v9956_v30 = vsub.f32 %v954_v7, %v9938_v47  ;;  %v9970_v7 = vand.u32 4294901760, %v1233_v52  ;;  %v9983_v23 = vand.u32 4294901760, %v1244_v29 }
 0x1c3   : > { %2794 = vmatmul.mubr.f32.gmra.mrb[30].mxu1 %v9910_v34  ;;  %1196 = vmatprep.mubr.f32.mxu0 %v11783_v3  ;;  %v9958_v14 = vand.u32 4294901760, %v957_v17 }
 0x1c4   : > { %2799 = vmatprep.mubr.f32.mxu1 %v11783_v3  ;;  %11831 = vst [vmem:[#allocation77_spill] sm:$0xff] %v9956_v30  ;;  %11832 = vst [vmem:[#allocation78_spill] sm:$0xff] %v9970_v7  ;;  %v9973_v10 = vand.u32 4294901760, %v9956_v30 }
 0x1c5   : > { %11835 = vst [vmem:[#allocation81_spill] sm:$0xff] %v9983_v23 }
 0x1c6   : > { %1202 = vmatmul.mubr.f32.gmra.mrb[30].mxu0 %v9910_v34  ;;  %v960_v34 = vsel %vm892_vm3, %v890_v51, 0  ;;  %11833 = vst [vmem:[#allocation79_spill] sm:$0xff] %v9973_v10  ;;  %v9976_v51 = vsub.f32 %v957_v17, %v9958_v14  ;;  %v1255_v52 = vsub.f32 %v9956_v30, %v9973_v10 }
 0x1c7   : > { %2805 = vmatmul.mubr.f32.gmra.mrb[32].mxu1 %v9931_v11  ;;  %1207 = vmatprep.mubr.f32.mxu0 %v11783_v3  ;;  %v9978_v42 = vand.u32 4294901760, %v960_v34 }
 0x1c8   : > { %2810 = vmatprep.mubr.f32.mxu1 %v11783_v3  ;;  %11834 = vst [vmem:[#allocation80_spill] sm:$0xff] %v9976_v51  ;;  %v9990_v17 = vand.u32 4294901760, %v9976_v51 }
 0x1c9   : > { %v9993_v60 = vsub.f32 %v960_v34, %v9978_v42 }
 0x1ca   : > { %1213 = vmatmul.mubr.f32.gmra.mrb[32].mxu0 %v9931_v11  ;;  %v963_v11 = vsel %vm892_vm3, %v891_v31, 0  ;;  %11836 = vst [vmem:[#allocation82_spill] sm:$0xff] %v9990_v17  ;;  %v10001_v31 = vand.u32 4294901760, %v1255_v52  ;;  %v1266_v29 = vsub.f32 %v9976_v51, %v9990_v17 }
 0x1cb   : > { %2816 = vmatmul.mubr.f32.gmra.mrb[34].mxu1 %v9951_v18  ;;  %1218 = vmatprep.mubr.f32.mxu0 %v11783_v3  ;;  %11837 = vst [vmem:[#allocation83_spill] sm:$0xff] %v9993_v60  ;;  %v9995_v56 = vand.u32 4294901760, %v963_v11 }
 0x1cc   : > { %2821 = vmatprep.mubr.f32.mxu1 %v11783_v3  ;;  %11838 = vst [vmem:[#allocation84_spill] sm:$0xff] %v10001_v31 }
 0x1cd   : > { %v10009_v34 = vsub.f32 %v963_v11, %v9995_v56 }
 0x1ce   : > { %1224 = vmatmul.mubr.f32.gmra.mrb[34].mxu0 %v9951_v18  ;;  %v10006_v18 = vand.u32 4294901760, %v9993_v60 }
 0x1cf   : > { %2827 = vmatmul.mubr.f32.gmra.mrb[36].mxu1 %v9970_v7  ;;  %1229 = vmatprep.mubr.f32.mxu0 %v11783_v3  ;;  %11840 = vst [vmem:[#allocation86_spill] sm:$0xff] %v10009_v34  ;;  %v10020_v17 = vand.u32 4294901760, %v10009_v34 }
 0x1d0   : > { %2832 = vmatprep.mubr.f32.mxu1 %v11783_v3  ;;  %11839 = vst [vmem:[#allocation85_spill] sm:$0xff] %v10006_v18  ;;  %v1277_v52 = vsub.f32 %v9993_v60, %v10006_v18 }
 0x1d1   : > { %11842 = vst [vmem:[#allocation88_spill] sm:$0xff] %v10020_v17 }
 0x1d2   : > { %1235 = vmatmul.mubr.f32.gmra.mrb[36].mxu0 %v9970_v7  ;;  %v10015_v7 = vand.u32 4294901760, %v1266_v29  ;;  %v10026_v11 = vand.u32 4294901760, %v1277_v52  ;;  %v1288_v29 = vsub.f32 %v10009_v34, %v10020_v17  ;;  %v10065_v52 = vpop.permute.xlu1 %622 }
 0x1d3   : > { %2838 = vmatmul.mubr.f32.gmra.mrb[38].mxu1 %v9983_v23  ;;  %1240 = vmatprep.mubr.f32.mxu0 %v11783_v3  ;;  %11845 = vst [vmem:[#allocation91_spill] sm:$0xff] %v10065_v52 }
 0x1d4   : > { %2843 = vmatprep.mubr.f32.mxu1 %v11783_v3  ;;  %11841 = vst [vmem:[#allocation87_spill] sm:$0xff] %v10015_v7  ;;  %11843 = vst [vmem:[#allocation89_spill] sm:$0xff] %v10026_v11 }
 0x1d6   : > { %1246 = vmatmul.mubr.f32.gmra.mrb[38].mxu0 %v9983_v23  ;;  %v10034_v23 = vand.u32 4294901760, %v1288_v29  ;;  %v659_v29 = vrot.slane %v9334_v61, %v9261_v12 }
 0x1d7   : > { %2849 = vmatmul.mubr.f32.gmra.mrb[40].mxu1 %v10001_v31  ;;  %1251 = vmatprep.mubr.f32.mxu0 %v11783_v3 }
 0x1d8   : > { %2854 = vmatprep.mubr.f32.mxu1 %v11783_v3  ;;  %11844 = vst [vmem:[#allocation90_spill] sm:$0xff] %v10034_v23 }
 0x1da   : > { %1257 = vmatmul.mubr.f32.gmra.mrb[40].mxu0 %v10001_v31 }
 0x1db   : > { %2860 = vmatmul.mubr.f32.gmra.mrb[42].mxu1 %v10015_v7  ;;  %1262 = vmatprep.mubr.f32.mxu0 %v11783_v3 }
 0x1dc   : > { %2865 = vmatprep.mubr.f32.mxu1 %v11783_v3 }
 0x1de   : > { %1268 = vmatmul.mubr.f32.gmra.mrb[42].mxu0 %v10015_v7  ;;  %v634_v7 = vsel %vm630_vm4, %v9336_v62, %v10065_v52 }
 0x1df   : > { %2871 = vmatmul.mubr.f32.gmra.mrb[44].mxu1 %v10026_v11  ;;  %1273 = vmatprep.mubr.f32.mxu0 %v11783_v3 }
 0x1e0   : > { %2876 = vmatprep.mubr.f32.mxu1 %v11783_v3 }
 0x1e2   : > { %1279 = vmatmul.mubr.f32.gmra.mrb[44].mxu0 %v10026_v11  ;;  %v667_v11 = vrot.slane %v9334_v61, %v9370_v38 }
 0x1e3   : > { %2882 = vmatmul.mubr.f32.gmra.mrb[46].mxu1 %v10034_v23  ;;  %1284 = vmatprep.mubr.f32.mxu0 %v11783_v3 }
 0x1e4   : > { %2962 = vmatprep.mubr.f32.mxu1 %v11783_v3 }
 0x1e6   : > { %1290 = vmatmul.mubr.f32.gmra.mrb[46].mxu0 %v10034_v23  ;;  %v589_v23 = vrot.slane %v9331_v55, %v9370_v38 }
 0x1e7   : > { %2964 = vmatmul.mubr.f32.vlgmr.msra.gmra.mrb[0].mxu1 %v9339_v5  ;;  %1370 = vmatprep.mubr.f32.mxu0 %v11783_v3 }
 0x1e8   : > { %3136 = vmatpush1.msra.mxu1 %v9555_v43  ;;  %2969 = vmatprep.mubr.f32.mxu1 %v11783_v3  ;;  %v608_v62 = vmul.f32 %v589_v23, %v9607_v9 }
 0x1e9   : > { %3393 = vmatprep.subr.mxu1 %v9534_v50 }
 0x1ea   : > { %1372 = vmatmul.mubr.f32.vlgmr.msra.gmra.mrb[0].mxu0 %v9339_v5 }
 0x1eb   : > { %1544 = vmatpush1.msra.mxu0 %v9601_v37  ;;  %2971 = vmatmul.mubr.f32.gmra.mrb[2].mxu1 %v9351_v2 }
 0x1ec   : > { %1801 = vmatprep.subr.mxu0 %v9505_v4  ;;  %1377 = vmatprep.mubr.f32.mxu0 %v11783_v3 }
 0x1ed   : > { %2976 = vmatprep.mubr.f32.mxu1 %v11783_v3 }
 0x1ee   : > { %1379 = vmatmul.mubr.f32.gmra.mrb[2].mxu0 %v9351_v2  ;;  %v684_v2 = vmul.f32 %v659_v29, %v634_v7 }
 0x1ef   : > { %2978 = vmatmul.mubr.f32.gmra.mrb[4].mxu1 %v9424_v8  ;;  %1384 = vmatprep.mubr.f32.mxu0 %v11783_v3 }
 0x1f0   : > { %2983 = vmatprep.mubr.f32.mxu1 %v11783_v3 }
 0x1f2   : > { %1386 = vmatmul.mubr.f32.gmra.mrb[4].mxu0 %v9424_v8 }
 0x1f3   : > { %2985 = vmatmul.mubr.f32.gmra.mrb[6].mxu1 %v9485_v46  ;;  %1391 = vmatprep.mubr.f32.mxu0 %v11783_v3 }
 0x1f4   : > { %2990 = vmatprep.mubr.f32.mxu1 %v11783_v3 }
 0x1f6   : > { %1393 = vmatmul.mubr.f32.gmra.mrb[6].mxu0 %v9485_v46 }
 0x1f7   : > { %2992 = vmatmul.mubr.f32.gmra.mrb[8].mxu1 %v9515_v39  ;;  %1398 = vmatprep.mubr.f32.mxu0 %v11783_v3 }
 0x1f8   : > { %2997 = vmatprep.mubr.f32.mxu1 %v11783_v3 }
 0x1fa   : > { %1400 = vmatmul.mubr.f32.gmra.mrb[8].mxu0 %v9515_v39  ;;  %v581_v39 = vrot.slane %v9331_v55, %v9261_v12 }
 0x1fb   : > { %2999 = vmatmul.mubr.f32.gmra.mrb[10].mxu1 %v9561_v27  ;;  %1405 = vmatprep.mubr.f32.mxu0 %v11783_v3 }
 0x1fc   : > { %3004 = vmatprep.mubr.f32.mxu1 %v11783_v3  ;;  %v606_v17 = vmul.f32 %v581_v39, %v9307_v40  ;;  %v753_v40 = vrot.slane %v9343_v48, %v9370_v38 }
 0x1fe   : > { %v10081_v31 = vpop.permute.xlu1 %626  ;;  %1407 = vmatmul.mubr.f32.gmra.mrb[10].mxu0 %v9561_v27  ;;  %v745_v27 = vrot.slane %v9343_v48, %v9261_v12  ;;  %v692_v9 = vadd.f32 %v684_v2, %v606_v17  ;;  %v839_v17 = vrot.slane %v9383_v41, %v9370_v38 }
 0x1ff   : > { %v10086_v46 = vpop.permute.xlu0 %624  ;;  %3006 = vmatmul.mubr.f32.gmra.mrb[12].mxu1 %v9640_v20  ;;  %1412 = vmatprep.mubr.f32.mxu0 %v11783_v3 }
 0x200   : > { %v632_v8 = vsel %vm630_vm4, %v10086_v46, %v10081_v31  ;;  %3011 = vmatprep.mubr.f32.mxu1 %v11783_v3 }
 0x201   : > { %v686_v5 = vmul.f32 %v667_v11, %v632_v8 }
 0x202   : > { %1414 = vmatmul.mubr.f32.gmra.mrb[12].mxu0 %v9640_v20  ;;  %v10102_v55 = vpop.permute.xlu1 %710 }
 0x203   : > { %v694_v18 = vadd.f32 %v686_v5, %v608_v62  ;;  %v10100_v52 = vpop.permute.xlu0 %708  ;;  %3013 = vmatmul.mubr.f32.gmra.mrb[14].mxu1 %v9665_v63  ;;  %1419 = vmatprep.mubr.f32.mxu0 %v11783_v3  ;;  %v831_v5 = vrot.slane %v9383_v41, %v9261_v12 }
 0x204   : > { %v720_v8 = vsel %vm716_vm5, %v9430_v6, %v10100_v52  ;;  %3018 = vmatprep.mubr.f32.mxu1 %v11783_v3 }
 0x205   : > { %v770_v23 = vmul.f32 %v745_v27, %v720_v8 }
 0x206   : > { %1421 = vmatmul.mubr.f32.gmra.mrb[14].mxu0 %v9665_v63  ;;  %v10118_v11 = vpop.permute.xlu1 %796 }
 0x207   : > { %v778_v39 = vadd.f32 %v770_v23, %v692_v9  ;;  %v10116_v7 = vpop.permute.xlu0 %712  ;;  %3020 = vmatmul.mubr.f32.gmra.mrb[16].mxu1 %v9690_v54  ;;  %v805_v2 = vsel %vm802_vm6, %v9491_v22, %v10118_v11  ;;  %1426 = vmatprep.mubr.f32.mxu0 %v11783_v3 }
 0x208   : > { %v718_v6 = vsel %vm716_vm5, %v10102_v55, %v10116_v7  ;;  %v856_v27 = vmul.f32 %v831_v5, %v805_v2  ;;  %3025 = vmatprep.mubr.f32.mxu1 %v11783_v3  ;;  %v11848_v5 = vld [vmem:[#allocation19_spill] sm:$0xff]  ;;  %v11853_v2 = vld [vmem:[#allocation50_spill] sm:$0xff] }
 0x209   : > { %v772_v12 = vmul.f32 %v753_v40, %v718_v6  ;;  %v11847_v40 = vand.u32 4294901760, %v9552_v45  ;;  %v11851_v45 = vld [vmem:[#allocation42_spill] sm:$0xff] }
 0x20a   : > { %v10133_v62 = vadd.f32 %v856_v27, %v778_v39  ;;  %1428 = vmatmul.mubr.f32.gmra.mrb[16].mxu0 %v9690_v54  ;;  %v10138_v9 = vpop.permute.xlu1 %800  ;;  %v11849_v39 = vand.u32 4294901760, %v9518_v58  ;;  %v11850_v58 = vld [vmem:[#allocation41_spill] sm:$0xff]  ;;  %v11852_v6 = vld [vmem:[#allocation46_spill] sm:$0xff]  ;;  %v11855_v27 = vld [vmem:[#allocation56_spill] sm:$0xff] }
 0x20b   : > { %v780_v29 = vadd.f32 %v772_v12, %v694_v18  ;;  %v10136_v8 = vpop.permute.xlu0 %798  ;;  %3027 = vmatmul.mubr.f32.gmra.mrb[18].mxu1 %v9704_v0  ;;  %1433 = vmatprep.mubr.f32.mxu0 %v11783_v3  ;;  %v11846_v18 = vld [vmem:[#allocation18_spill] sm:$0xff]  ;;  %v11854_v12 = vld [vmem:[#allocation53_spill] sm:$0xff] }
 0x20c   : > { %v803_v22 = vsel %vm802_vm6, %v10136_v8, %v10138_v9  ;;  %3032 = vmatprep.mubr.f32.mxu1 %v11783_v3 }
 0x20d   : > { %v858_v23 = vmul.f32 %v839_v17, %v803_v22  ;;  %v11856_v17 = vld [vmem:[#allocation57_spill] sm:$0xff] }
 0x20e   : > { %1435 = vmatmul.mubr.f32.gmra.mrb[18].mxu0 %v9704_v0  ;;  %v11858_v22 = vld [vmem:[#allocation65_spill] sm:$0xff] }
 0x20f   : > { %v10147_v38 = vadd.f32 %v858_v23, %v780_v29  ;;  %3034 = vmatmul.mubr.f32.gmra.mrb[20].mxu1 %v9729_v19  ;;  %1440 = vmatprep.mubr.f32.mxu0 %v11783_v3  ;;  %v11857_v29 = vld [vmem:[#allocation61_spill] sm:$0xff]  ;;  %v11859_v23 = vld [vmem:[#allocation68_spill] sm:$0xff] }
 0x210   : > { %3039 = vmatprep.mubr.f32.mxu1 %v11783_v3 }
 0x212   : > { %1442 = vmatmul.mubr.f32.gmra.mrb[20].mxu0 %v9729_v19 }
 0x213   : > { %3041 = vmatmul.mubr.f32.gmra.mrb[22].mxu1 %v9758_v16  ;;  %1447 = vmatprep.mubr.f32.mxu0 %v11783_v3 }
 0x214   : > { %3046 = vmatprep.mubr.f32.mxu1 %v11783_v3 }
 0x216   : > { %1449 = vmatmul.mubr.f32.gmra.mrb[22].mxu0 %v9758_v16 }
 0x217   : > { %3048 = vmatmul.mubr.f32.gmra.mrb[24].mxu1 %v9778_v53  ;;  %1454 = vmatprep.mubr.f32.mxu0 %v11783_v3 }
 0x218   : > { %3053 = vmatprep.mubr.f32.mxu1 %v11783_v3 }
 0x21a   : > { %1456 = vmatmul.mubr.f32.gmra.mrb[24].mxu0 %v9778_v53 }
 0x21b   : > { %3055 = vmatmul.mubr.f32.gmra.mrb[26].mxu1 %v9798_v35  ;;  %1461 = vmatprep.mubr.f32.mxu0 %v11783_v3 }
 0x21c   : > { %3060 = vmatprep.mubr.f32.mxu1 %v11783_v3 }
 0x21e   : > { %1463 = vmatmul.mubr.f32.gmra.mrb[26].mxu0 %v9798_v35 }
 0x21f   : > { %3062 = vmatmul.mubr.f32.gmra.mrb[28].mxu1 %v9808_v21  ;;  %1468 = vmatprep.mubr.f32.mxu0 %v11783_v3 }
 0x220   : > { %3067 = vmatprep.mubr.f32.mxu1 %v11783_v3 }
 0x222   : > { %1470 = vmatmul.mubr.f32.gmra.mrb[28].mxu0 %v9808_v21 }
 0x223   : > { %3069 = vmatmul.mubr.f32.gmra.mrb[30].mxu1 %v9829_v1  ;;  %1475 = vmatprep.mubr.f32.mxu0 %v11783_v3 }
 0x224   : > { %3074 = vmatprep.mubr.f32.mxu1 %v11783_v3 }
 0x226   : > { %1477 = vmatmul.mubr.f32.gmra.mrb[30].mxu0 %v9829_v1 }
 0x227   : > { %3076 = vmatmul.mubr.f32.gmra.mrb[32].mxu1 %v9858_v33  ;;  %1482 = vmatprep.mubr.f32.mxu0 %v11783_v3 }
 0x228   : > { %3081 = vmatprep.mubr.f32.mxu1 %v11783_v3 }
 0x22a   : > { %1484 = vmatmul.mubr.f32.gmra.mrb[32].mxu0 %v9858_v33 }
 0x22b   : > { %3083 = vmatmul.mubr.f32.gmra.mrb[34].mxu1 %v9878_v57  ;;  %1489 = vmatprep.mubr.f32.mxu0 %v11783_v3 }
 0x22c   : > { %3088 = vmatprep.mubr.f32.mxu1 %v11783_v3 }
 0x22e   : > { %1491 = vmatmul.mubr.f32.gmra.mrb[34].mxu0 %v9878_v57 }
 0x22f   : > { %3090 = vmatmul.mubr.f32.gmra.mrb[36].mxu1 %v9898_v59  ;;  %1496 = vmatprep.mubr.f32.mxu0 %v11783_v3 }
 0x230   : > { %3095 = vmatprep.mubr.f32.mxu1 %v11783_v3 }
 0x232   : > { %1498 = vmatmul.mubr.f32.gmra.mrb[36].mxu0 %v9898_v59 }
 0x233   : > { %3097 = vmatmul.mubr.f32.gmra.mrb[38].mxu1 %v9906_v26  ;;  %1503 = vmatprep.mubr.f32.mxu0 %v11783_v3 }
 0x234   : > { %3102 = vmatprep.mubr.f32.mxu1 %v11783_v3 }
 0x236   : > { %1505 = vmatmul.mubr.f32.gmra.mrb[38].mxu0 %v9906_v26 }
 0x237   : > { %3104 = vmatmul.mubr.f32.gmra.mrb[40].mxu1 %v9938_v47  ;;  %1510 = vmatprep.mubr.f32.mxu0 %v11783_v3 }
 0x238   : > { %3109 = vmatprep.mubr.f32.mxu1 %v11783_v3 }
 0x23a   : > { %1512 = vmatmul.mubr.f32.gmra.mrb[40].mxu0 %v9938_v47 }
 0x23b   : > { %3111 = vmatmul.mubr.f32.gmra.mrb[42].mxu1 %v9958_v14  ;;  %1517 = vmatprep.mubr.f32.mxu0 %v11783_v3 }
 0x23c   : > { %3116 = vmatprep.mubr.f32.mxu1 %v11783_v3 }
 0x23e   : > { %1519 = vmatmul.mubr.f32.gmra.mrb[42].mxu0 %v9958_v14 }
 0x23f   : > { %3118 = vmatmul.mubr.f32.gmra.mrb[44].mxu1 %v9978_v42  ;;  %1524 = vmatprep.mubr.f32.mxu0 %v11783_v3 }
 0x240   : > { %3123 = vmatprep.mubr.f32.mxu1 %v11783_v3 }
 0x242   : > { %1526 = vmatmul.mubr.f32.gmra.mrb[44].mxu0 %v9978_v42 }
 0x243   : > { %3125 = vmatmul.mubr.f32.gmra.mrb[46].mxu1 %v9995_v56  ;;  %1531 = vmatprep.mubr.f32.mxu0 %v11783_v3 }
 0x244   : > { %3199 = vmatprep.mubr.f32.mxu1 %v11783_v3 }
 0x246   : > { %1533 = vmatmul.mubr.f32.gmra.mrb[46].mxu0 %v9995_v56 }
 0x247   : > { %3202 = vmatmul.mubr.f32.vlgmr.msra.gmra.mrb[0].mxu1 %v11846_v18  ;;  %1607 = vmatprep.mubr.f32.mxu0 %v11783_v3 }
 0x248   : > { %3395 = vmatpush1.msra.mxu1 %v9536_v15  ;;  %3207 = vmatprep.mubr.f32.mxu1 %v11783_v3 }
 0x249   : > { %3678 = vmatprep.subr.mxu1 %v11847_v40  ;;  %v11860_v40 = vld [vmem:[#allocation71_spill] sm:$0xff] }
 0x24a   : > { %1610 = vmatmul.mubr.f32.vlgmr.msra.gmra.mrb[0].mxu0 %v11846_v18 }
 0x24b   : > { %1803 = vmatpush1.msra.mxu0 %v9585_v49  ;;  %3210 = vmatmul.mubr.f32.gmra.mrb[2].mxu1 %v11848_v5 }
 0x24c   : > { %2086 = vmatprep.subr.mxu0 %v11849_v39  ;;  %1615 = vmatprep.mubr.f32.mxu0 %v11783_v3  ;;  %v11861_v39 = vld [vmem:[#allocation72_spill] sm:$0xff] }
 0x24d   : > { %3215 = vmatprep.mubr.f32.mxu1 %v11783_v3 }
 0x24e   : > { %1618 = vmatmul.mubr.f32.gmra.mrb[2].mxu0 %v11848_v5 }
 0x24f   : > { %3218 = vmatmul.mubr.f32.gmra.mrb[4].mxu1 %v9462_v32  ;;  %1623 = vmatprep.mubr.f32.mxu0 %v11783_v3 }
 0x250   : > { %3223 = vmatprep.mubr.f32.mxu1 %v11783_v3 }
 0x252   : > { %1626 = vmatmul.mubr.f32.gmra.mrb[4].mxu0 %v9462_v32 }
 0x253   : > { %3226 = vmatmul.mubr.f32.gmra.mrb[6].mxu1 %v9513_v13  ;;  %1631 = vmatprep.mubr.f32.mxu0 %v11783_v3 }
 0x254   : > { %3231 = vmatprep.mubr.f32.mxu1 %v11783_v3 }
 0x256   : > { %1634 = vmatmul.mubr.f32.gmra.mrb[6].mxu0 %v9513_v13 }
 0x257   : > { %3234 = vmatmul.mubr.f32.gmra.mrb[8].mxu1 %v9559_v25  ;;  %1639 = vmatprep.mubr.f32.mxu0 %v11783_v3 }
 0x258   : > { %3239 = vmatprep.mubr.f32.mxu1 %v11783_v3 }
 0x25a   : > { %1642 = vmatmul.mubr.f32.gmra.mrb[8].mxu0 %v9559_v25 }
 0x25b   : > { %3242 = vmatmul.mubr.f32.gmra.mrb[10].mxu1 %v9628_v36  ;;  %1647 = vmatprep.mubr.f32.mxu0 %v11783_v3 }
 0x25c   : > { %3247 = vmatprep.mubr.f32.mxu1 %v11783_v3 }
 0x25e   : > { %1650 = vmatmul.mubr.f32.gmra.mrb[10].mxu0 %v9628_v36 }
 0x25f   : > { %3250 = vmatmul.mubr.f32.gmra.mrb[12].mxu1 %v9663_v28  ;;  %1655 = vmatprep.mubr.f32.mxu0 %v11783_v3 }
 0x260   : > { %3255 = vmatprep.mubr.f32.mxu1 %v11783_v3 }
 0x262   : > { %1658 = vmatmul.mubr.f32.gmra.mrb[12].mxu0 %v9663_v28 }
 0x263   : > { %3258 = vmatmul.mubr.f32.gmra.mrb[14].mxu1 %v9688_v44  ;;  %1663 = vmatprep.mubr.f32.mxu0 %v11783_v3 }
 0x264   : > { %3263 = vmatprep.mubr.f32.mxu1 %v11783_v3 }
 0x266   : > { %1666 = vmatmul.mubr.f32.gmra.mrb[14].mxu0 %v9688_v44 }
 0x267   : > { %3266 = vmatmul.mubr.f32.gmra.mrb[16].mxu1 %v11850_v58  ;;  %1671 = vmatprep.mubr.f32.mxu0 %v11783_v3 }
 0x268   : > { %3271 = vmatprep.mubr.f32.mxu1 %v11783_v3 }
 0x26a   : > { %1674 = vmatmul.mubr.f32.gmra.mrb[16].mxu0 %v11850_v58 }
 0x26b   : > { %3274 = vmatmul.mubr.f32.gmra.mrb[18].mxu1 %v11851_v45  ;;  %1679 = vmatprep.mubr.f32.mxu0 %v11783_v3 }
 0x26c   : > { %3279 = vmatprep.mubr.f32.mxu1 %v11783_v3 }
 0x26e   : > { %1682 = vmatmul.mubr.f32.gmra.mrb[18].mxu0 %v11851_v45 }
 0x26f   : > { %3282 = vmatmul.mubr.f32.gmra.mrb[20].mxu1 %v11852_v6  ;;  %1687 = vmatprep.mubr.f32.mxu0 %v11783_v3 }
 0x270   : > { %3287 = vmatprep.mubr.f32.mxu1 %v11783_v3 }
 0x272   : > { %1690 = vmatmul.mubr.f32.gmra.mrb[20].mxu0 %v11852_v6 }
 0x273   : > { %3290 = vmatmul.mubr.f32.gmra.mrb[22].mxu1 %v11853_v2  ;;  %1695 = vmatprep.mubr.f32.mxu0 %v11783_v3 }
 0x274   : > { %3295 = vmatprep.mubr.f32.mxu1 %v11783_v3 }
 0x276   : > { %1698 = vmatmul.mubr.f32.gmra.mrb[22].mxu0 %v11853_v2 }
 0x277   : > { %3298 = vmatmul.mubr.f32.gmra.mrb[24].mxu1 %v11854_v12  ;;  %1703 = vmatprep.mubr.f32.mxu0 %v11783_v3 }
 0x278   : > { %3303 = vmatprep.mubr.f32.mxu1 %v11783_v3 }
 0x27a   : > { %1706 = vmatmul.mubr.f32.gmra.mrb[24].mxu0 %v11854_v12 }
 0x27b   : > { %3306 = vmatmul.mubr.f32.gmra.mrb[26].mxu1 %v11855_v27  ;;  %1711 = vmatprep.mubr.f32.mxu0 %v11783_v3 }
 0x27c   : > { %3311 = vmatprep.mubr.f32.mxu1 %v11783_v3 }
 0x27e   : > { %1714 = vmatmul.mubr.f32.gmra.mrb[26].mxu0 %v11855_v27 }
 0x27f   : > { %3314 = vmatmul.mubr.f32.gmra.mrb[28].mxu1 %v11856_v17  ;;  %1719 = vmatprep.mubr.f32.mxu0 %v11783_v3 }
 0x280   : > { %3319 = vmatprep.mubr.f32.mxu1 %v11783_v3 }
 0x282   : > { %1722 = vmatmul.mubr.f32.gmra.mrb[28].mxu0 %v11856_v17  ;;  %v11890_v17 = vld [vmem:[#allocation82_spill] sm:$0xff] }
 0x283   : > { %3322 = vmatmul.mubr.f32.gmra.mrb[30].mxu1 %v11857_v29  ;;  %1727 = vmatprep.mubr.f32.mxu0 %v11783_v3 }
 0x284   : > { %3327 = vmatprep.mubr.f32.mxu1 %v11783_v3 }
 0x286   : > { %1730 = vmatmul.mubr.f32.gmra.mrb[30].mxu0 %v11857_v29 }
 0x287   : > { %3330 = vmatmul.mubr.f32.gmra.mrb[32].mxu1 %v11858_v22  ;;  %1735 = vmatprep.mubr.f32.mxu0 %v11783_v3 }
 0x288   : > { %3335 = vmatprep.mubr.f32.mxu1 %v11783_v3 }
 0x28a   : > { %1738 = vmatmul.mubr.f32.gmra.mrb[32].mxu0 %v11858_v22 }
 0x28b   : > { %3338 = vmatmul.mubr.f32.gmra.mrb[34].mxu1 %v11859_v23  ;;  %1743 = vmatprep.mubr.f32.mxu0 %v11783_v3 }
 0x28c   : > { %3343 = vmatprep.mubr.f32.mxu1 %v11783_v3 }
 0x28e   : > { %1746 = vmatmul.mubr.f32.gmra.mrb[34].mxu0 %v11859_v23 }
 0x28f   : > { %3346 = vmatmul.mubr.f32.gmra.mrb[36].mxu1 %v11860_v40  ;;  %1751 = vmatprep.mubr.f32.mxu0 %v11783_v3 }
 0x290   : > { %3351 = vmatprep.mubr.f32.mxu1 %v11783_v3 }
 0x292   : > { %1754 = vmatmul.mubr.f32.gmra.mrb[36].mxu0 %v11860_v40  ;;  %v11888_v40 = vld [vmem:[#allocation23_spill] sm:$0xff] }
 0x293   : > { %3354 = vmatmul.mubr.f32.gmra.mrb[38].mxu1 %v11861_v39  ;;  %1759 = vmatprep.mubr.f32.mxu0 %v11783_v3  ;;  %v717_v23 = vsel %vm716_vm5, %v10116_v7, %v11888_v40  ;;  %v11891_v40 = vld [vmem:[#allocation29_spill] sm:$0xff] }
 0x294   : > { %3359 = vmatprep.mubr.f32.mxu1 %v11783_v3 }
 0x296   : > { %1762 = vmatmul.mubr.f32.gmra.mrb[38].mxu0 %v11861_v39  ;;  %v11865_v39 = vld [vmem:[#allocation21_spill] sm:$0xff] }
 0x297   : > { %3362 = vmatmul.mubr.f32.gmra.mrb[40].mxu1 %v9956_v30  ;;  %1767 = vmatprep.mubr.f32.mxu0 %v11783_v3 }
 0x298   : > { %3367 = vmatprep.mubr.f32.mxu1 %v11783_v3 }
 0x29a   : > { %1770 = vmatmul.mubr.f32.gmra.mrb[40].mxu0 %v9956_v30  ;;  %v11862_v30 = vld [vmem:[#allocation20_spill] sm:$0xff] }
 0x29b   : > { %3370 = vmatmul.mubr.f32.gmra.mrb[42].mxu1 %v9976_v51  ;;  %1775 = vmatprep.mubr.f32.mxu0 %v11783_v3 }
 0x29c   : > { %3375 = vmatprep.mubr.f32.mxu1 %v11783_v3 }
 0x29e   : > { %1778 = vmatmul.mubr.f32.gmra.mrb[42].mxu0 %v9976_v51  ;;  %v11863_v51 = vand.u32 4294901760, %v9555_v43  ;;  %v11866_v43 = vld [vmem:[#allocation26_spill] sm:$0xff] }
 0x29f   : > { %3378 = vmatmul.mubr.f32.gmra.mrb[44].mxu1 %v9993_v60  ;;  %1783 = vmatprep.mubr.f32.mxu0 %v11783_v3 }
 0x2a0   : > { %3383 = vmatprep.mubr.f32.mxu1 %v11783_v3 }
 0x2a2   : > { %1786 = vmatmul.mubr.f32.gmra.mrb[44].mxu0 %v9993_v60  ;;  %v11864_v60 = vand.u32 4294901760, %v9601_v37  ;;  %v11869_v37 = vld [vmem:[#allocation35_spill] sm:$0xff] }
 0x2a3   : > { %3386 = vmatmul.mubr.f32.gmra.mrb[46].mxu1 %v10009_v34  ;;  %1791 = vmatprep.mubr.f32.mxu0 %v11783_v3 }
 0x2a4   : > { %3458 = vmatprep.mubr.f32.mxu1 %v11783_v3 }
 0x2a6   : > { %1794 = vmatmul.mubr.f32.gmra.mrb[46].mxu0 %v10009_v34 }
 0x2a7   : > { %3462 = vmatmul.mubr.f32.vlgmr.msra.gmra.mrb[0].mxu1 %v11862_v30  ;;  %1866 = vmatprep.mubr.f32.mxu0 %v11783_v3 }
 0x2a8   : > { %3682 = vmatpush1.msra.mxu1 %v11863_v51  ;;  %3467 = vmatprep.mubr.f32.mxu1 %v11783_v3  ;;  %v11871_v51 = vld [vmem:[#allocation40_spill] sm:$0xff] }
 0x2a9   : > { %3915 = vmatprep.subr.mxu1 %v9534_v50  ;;  %v11867_v50 = vld [vmem:[#allocation30_spill] sm:$0xff] }
 0x2aa   : > { %1870 = vmatmul.mubr.f32.vlgmr.msra.gmra.mrb[0].mxu0 %v11862_v30  ;;  %v11887_v30 = vld [vmem:[#allocation17_spill] sm:$0xff] }
 0x2ab   : > { %2090 = vmatpush1.msra.mxu0 %v11864_v60  ;;  %3471 = vmatmul.mubr.f32.gmra.mrb[2].mxu1 %v11865_v39  ;;  %v11870_v60 = vld [vmem:[#allocation38_spill] sm:$0xff]  ;;  %v663_v34 = vrot.slane %v9334_v61, %v11887_v30  ;;  %v749_v7 = vrot.slane %v9343_v48, %v11887_v30 }
 0x2ac   : > { %2323 = vmatprep.subr.mxu0 %v9505_v4  ;;  %1875 = vmatprep.mubr.f32.mxu0 %v11783_v3  ;;  %v11868_v4 = vld [vmem:[#allocation32_spill] sm:$0xff] }
 0x2ad   : > { %3476 = vmatprep.mubr.f32.mxu1 %v11783_v3 }
 0x2ae   : > { %1879 = vmatmul.mubr.f32.gmra.mrb[2].mxu0 %v11865_v39 }
 0x2af   : > { %3480 = vmatmul.mubr.f32.gmra.mrb[4].mxu1 %v11866_v43  ;;  %1884 = vmatprep.mubr.f32.mxu0 %v11783_v3 }
 0x2b0   : > { %3485 = vmatprep.mubr.f32.mxu1 %v11783_v3 }
 0x2b2   : > { %1888 = vmatmul.mubr.f32.gmra.mrb[4].mxu0 %v11866_v43  ;;  %v11886_v43 = vld [vmem:[#allocation13_spill] sm:$0xff] }
 0x2b3   : > { %3489 = vmatmul.mubr.f32.gmra.mrb[6].mxu1 %v11867_v50  ;;  %1893 = vmatprep.mubr.f32.mxu0 %v11783_v3 }
 0x2b4   : > { %3494 = vmatprep.mubr.f32.mxu1 %v11783_v3 }
 0x2b6   : > { %1897 = vmatmul.mubr.f32.gmra.mrb[6].mxu0 %v11867_v50 }
 0x2b7   : > { %3498 = vmatmul.mubr.f32.gmra.mrb[8].mxu1 %v11868_v4  ;;  %1902 = vmatprep.mubr.f32.mxu0 %v11783_v3 }
 0x2b8   : > { %3503 = vmatprep.mubr.f32.mxu1 %v11783_v3 }
 0x2ba   : > { %1906 = vmatmul.mubr.f32.gmra.mrb[8].mxu0 %v11868_v4  ;;  %v11872_v4 = vld [vmem:[#allocation44_spill] sm:$0xff] }
 0x2bb   : > { %3507 = vmatmul.mubr.f32.gmra.mrb[10].mxu1 %v11869_v37  ;;  %1911 = vmatprep.mubr.f32.mxu0 %v11783_v3 }
 0x2bc   : > { %3512 = vmatprep.mubr.f32.mxu1 %v11783_v3 }
 0x2be   : > { %1915 = vmatmul.mubr.f32.gmra.mrb[10].mxu0 %v11869_v37  ;;  %v11873_v37 = vld [vmem:[#allocation45_spill] sm:$0xff] }
 0x2bf   : > { %3516 = vmatmul.mubr.f32.gmra.mrb[12].mxu1 %v11870_v60  ;;  %1920 = vmatprep.mubr.f32.mxu0 %v11783_v3 }
 0x2c0   : > { %3521 = vmatprep.mubr.f32.mxu1 %v11783_v3 }
 0x2c2   : > { %1924 = vmatmul.mubr.f32.gmra.mrb[12].mxu0 %v11870_v60  ;;  %v11874_v60 = vld [vmem:[#allocation48_spill] sm:$0xff] }
 0x2c3   : > { %3525 = vmatmul.mubr.f32.gmra.mrb[14].mxu1 %v11871_v51  ;;  %1929 = vmatprep.mubr.f32.mxu0 %v11783_v3 }
 0x2c4   : > { %3530 = vmatprep.mubr.f32.mxu1 %v11783_v3 }
 0x2c6   : > { %1933 = vmatmul.mubr.f32.gmra.mrb[14].mxu0 %v11871_v51  ;;  %v11875_v51 = vld [vmem:[#allocation52_spill] sm:$0xff] }
 0x2c7   : > { %3534 = vmatmul.mubr.f32.gmra.mrb[16].mxu1 %v11872_v4  ;;  %1938 = vmatprep.mubr.f32.mxu0 %v11783_v3 }
 0x2c8   : > { %3539 = vmatprep.mubr.f32.mxu1 %v11783_v3 }
 0x2ca   : > { %1942 = vmatmul.mubr.f32.gmra.mrb[16].mxu0 %v11872_v4  ;;  %v11876_v4 = vld [vmem:[#allocation55_spill] sm:$0xff] }
 0x2cb   : > { %3543 = vmatmul.mubr.f32.gmra.mrb[18].mxu1 %v11873_v37  ;;  %1947 = vmatprep.mubr.f32.mxu0 %v11783_v3 }
 0x2cc   : > { %3548 = vmatprep.mubr.f32.mxu1 %v11783_v3 }
 0x2ce   : > { %1951 = vmatmul.mubr.f32.gmra.mrb[18].mxu0 %v11873_v37  ;;  %v11877_v37 = vld [vmem:[#allocation59_spill] sm:$0xff] }
 0x2cf   : > { %3552 = vmatmul.mubr.f32.gmra.mrb[20].mxu1 %v11874_v60  ;;  %1956 = vmatprep.mubr.f32.mxu0 %v11783_v3 }
 0x2d0   : > { %3557 = vmatprep.mubr.f32.mxu1 %v11783_v3 }
 0x2d2   : > { %1960 = vmatmul.mubr.f32.gmra.mrb[20].mxu0 %v11874_v60  ;;  %v11878_v60 = vld [vmem:[#allocation60_spill] sm:$0xff] }
 0x2d3   : > { %3561 = vmatmul.mubr.f32.gmra.mrb[22].mxu1 %v11875_v51  ;;  %1965 = vmatprep.mubr.f32.mxu0 %v11783_v3 }
 0x2d4   : > { %3566 = vmatprep.mubr.f32.mxu1 %v11783_v3 }
 0x2d6   : > { %1969 = vmatmul.mubr.f32.gmra.mrb[22].mxu0 %v11875_v51  ;;  %v11879_v51 = vld [vmem:[#allocation63_spill] sm:$0xff] }
 0x2d7   : > { %3570 = vmatmul.mubr.f32.gmra.mrb[24].mxu1 %v11876_v4  ;;  %1974 = vmatprep.mubr.f32.mxu0 %v11783_v3 }
 0x2d8   : > { %3575 = vmatprep.mubr.f32.mxu1 %v11783_v3 }
 0x2da   : > { %1978 = vmatmul.mubr.f32.gmra.mrb[24].mxu0 %v11876_v4  ;;  %v11880_v4 = vld [vmem:[#allocation67_spill] sm:$0xff] }
 0x2db   : > { %3579 = vmatmul.mubr.f32.gmra.mrb[26].mxu1 %v11877_v37  ;;  %1983 = vmatprep.mubr.f32.mxu0 %v11783_v3 }
 0x2dc   : > { %3584 = vmatprep.mubr.f32.mxu1 %v11783_v3 }
 0x2de   : > { %1987 = vmatmul.mubr.f32.gmra.mrb[26].mxu0 %v11877_v37  ;;  %v11881_v37 = vld [vmem:[#allocation70_spill] sm:$0xff] }
 0x2df   : > { %3588 = vmatmul.mubr.f32.gmra.mrb[28].mxu1 %v11878_v60  ;;  %1992 = vmatprep.mubr.f32.mxu0 %v11783_v3 }
 0x2e0   : > { %3593 = vmatprep.mubr.f32.mxu1 %v11783_v3 }
 0x2e2   : > { %1996 = vmatmul.mubr.f32.gmra.mrb[28].mxu0 %v11878_v60  ;;  %v11882_v60 = vld [vmem:[#allocation74_spill] sm:$0xff] }
 0x2e3   : > { %3597 = vmatmul.mubr.f32.gmra.mrb[30].mxu1 %v11879_v51  ;;  %2001 = vmatprep.mubr.f32.mxu0 %v11783_v3 }
 0x2e4   : > { %3602 = vmatprep.mubr.f32.mxu1 %v11783_v3 }
 0x2e6   : > { %2005 = vmatmul.mubr.f32.gmra.mrb[30].mxu0 %v11879_v51  ;;  %v11883_v51 = vld [vmem:[#allocation75_spill] sm:$0xff] }
 0x2e7   : > { %3606 = vmatmul.mubr.f32.gmra.mrb[32].mxu1 %v11880_v4  ;;  %2010 = vmatprep.mubr.f32.mxu0 %v11783_v3 }
 0x2e8   : > { %3611 = vmatprep.mubr.f32.mxu1 %v11783_v3 }
 0x2ea   : > { %2014 = vmatmul.mubr.f32.gmra.mrb[32].mxu0 %v11880_v4  ;;  %v11884_v4 = vld [vmem:[#allocation11_spill] sm:$0xff] }
 0x2eb   : > { %3615 = vmatmul.mubr.f32.gmra.mrb[34].mxu1 %v11881_v37  ;;  %2019 = vmatprep.mubr.f32.mxu0 %v11783_v3  ;;  %v671_v50 = vrot.slane %v9334_v61, %v11884_v4  ;;  %v593_v39 = vrot.slane %v11886_v43, %v11884_v4  ;;  %v843_v29 = vrot.slane %v9383_v41, %v11884_v4 }
 0x2ec   : > { %3620 = vmatprep.mubr.f32.mxu1 %v11783_v3  ;;  %v585_v61 = vrot.slane %v11886_v43, %v11887_v30  ;;  %v835_v43 = vrot.slane %v9383_v41, %v11887_v30 }
 0x2ee   : > { %2023 = vmatmul.mubr.f32.gmra.mrb[34].mxu0 %v11881_v37  ;;  %v11885_v37 = vld [vmem:[#allocation16_spill] sm:$0xff] }
 0x2ef   : > { %3624 = vmatmul.mubr.f32.gmra.mrb[36].mxu1 %v11882_v60  ;;  %2028 = vmatprep.mubr.f32.mxu0 %v11783_v3 }
 0x2f0   : > { %3629 = vmatprep.mubr.f32.mxu1 %v11783_v3 }
 0x2f2   : > { %2032 = vmatmul.mubr.f32.gmra.mrb[36].mxu0 %v11882_v60  ;;  %v631_v60 = vsel %vm630_vm4, %v10081_v31, %v11885_v37  ;;  %v11889_v31 = vld [vmem:[#allocation91_spill] sm:$0xff] }
 0x2f3   : > { %3633 = vmatmul.mubr.f32.gmra.mrb[38].mxu1 %v11883_v51  ;;  %2037 = vmatprep.mubr.f32.mxu0 %v11783_v3  ;;  %v633_v37 = vsel %vm630_vm4, %v11889_v31, %v10086_v46  ;;  %v687_v22 = vmul.f32 %v671_v50, %v631_v60  ;;  %v11892_v46 = vld [vmem:[#allocation12_spill] sm:$0xff] }
 0x2f4   : > { %3638 = vmatprep.mubr.f32.mxu1 %v11783_v3  ;;  %v609_v50 = vmul.f32 %v593_v39, %v11892_v46  ;;  %v685_v31 = vmul.f32 %v663_v34, %v633_v37  ;;  %v11893_v39 = vld [vmem:[#allocation85_spill] sm:$0xff]  ;;  %v11899_v37 = vld [vmem:[#allocation27_spill] sm:$0xff] }
 0x2f5   : > { %v11894_v46 = vld [vmem:[#allocation33_spill] sm:$0xff] }
 0x2f6   : > { %2041 = vmatmul.mubr.f32.gmra.mrb[38].mxu0 %v11883_v51  ;;  %v757_v51 = vrot.slane %v9343_v48, %v11884_v4  ;;  %v719_v4 = vsel %vm716_vm5, %v10100_v52, %v10102_v55  ;;  %v695_v48 = vadd.f32 %v687_v22, %v609_v50  ;;  %v607_v55 = vmul.f32 %v585_v61, %v11894_v46  ;;  %v11901_v61 = vld [vmem:[#allocation31_spill] sm:$0xff] }
 0x2f7   : > { %3642 = vmatmul.mubr.f32.gmra.mrb[40].mxu1 %v9973_v10  ;;  %2046 = vmatprep.mubr.f32.mxu0 %v11783_v3  ;;  %v771_v52 = vmul.f32 %v749_v7, %v719_v4 }
 0x2f8   : > { %3647 = vmatprep.mubr.f32.mxu1 %v11783_v3  ;;  %v773_v60 = vmul.f32 %v757_v51, %v717_v23  ;;  %v693_v41 = vadd.f32 %v685_v31, %v607_v55  ;;  %v11895_v23 = vld [vmem:[#allocation88_spill] sm:$0xff]  ;;  %v11897_v51 = vld [vmem:[#allocation15_spill] sm:$0xff] }
 0x2fa   : > { %2050 = vmatmul.mubr.f32.gmra.mrb[40].mxu0 %v9973_v10  ;;  %v810_v10 = vsel %vm802_vm6, %v10138_v9, %v11891_v40  ;;  %v804_v9 = vsel %vm802_vm6, %v10118_v11, %v10136_v8  ;;  %v781_v34 = vadd.f32 %v773_v60, %v695_v48  ;;  %v779_v24 = vadd.f32 %v771_v52, %v693_v41  ;;  %v11896_v8 = vld [vmem:[#allocation14_spill] sm:$0xff] }
 0x2fb   : > { %3651 = vmatmul.mubr.f32.gmra.mrb[42].mxu1 %v11890_v17  ;;  %2055 = vmatprep.mubr.f32.mxu0 %v11783_v3  ;;  %v859_v40 = vmul.f32 %v843_v29, %v810_v10  ;;  %v857_v30 = vmul.f32 %v835_v43, %v804_v9  ;;  %v10575_v43 = vand.u32 4294901760, %v10147_v38 }
 0x2fc   : > { %3656 = vmatprep.mubr.f32.mxu1 %v11783_v3 }
 0x2fd   : > { %v10448_v22 = vadd.f32 %v859_v40, %v781_v34  ;;  %v10453_v10 = vadd.f32 %v857_v30, %v779_v24  ;;  %v10586_v40 = vand.u32 4294901760, %v10133_v62  ;;  %v10671_v55 = vsub.f32 %v10147_v38, %v10575_v43 }
 0x2fe   : > { %2059 = vmatmul.mubr.f32.gmra.mrb[42].mxu0 %v11890_v17 }
 0x2ff   : > { %3660 = vmatmul.mubr.f32.gmra.mrb[44].mxu1 %v11893_v39  ;;  %2064 = vmatprep.mubr.f32.mxu0 %v11783_v3  ;;  %v10457_v11 = vand.u32 4294901760, %v10448_v22  ;;  %v10465_v29 = vand.u32 4294901760, %v10453_v10  ;;  %v10679_v52 = vsub.f32 %v10133_v62, %v10586_v40  ;;  %v6080_v34 = vand.u32 4294901760, %v10671_v55 }
 0x300   : > { %3665 = vmatprep.mubr.f32.mxu1 %v11783_v3 }
 0x301   : > { %v10552_v7 = vsub.f32 %v10448_v22, %v10457_v11  ;;  %v10559_v50 = vsub.f32 %v10453_v10, %v10465_v29  ;;  %v4488_v38 = vand.u32 4294901760, %v10679_v52  ;;  %v6081_v41 = vsub.f32 %v10671_v55, %v6080_v34  ;;  %v11902_v22 = vld [vmem:[#allocation24_spill] sm:$0xff]  ;;  %v11903_v10 = vld [vmem:[#allocation25_spill] sm:$0xff] }
 0x302   : > { %2068 = vmatmul.mubr.f32.gmra.mrb[44].mxu0 %v11893_v39 }
 0x303   : > { %3669 = vmatmul.mubr.f32.gmra.mrb[46].mxu1 %v11895_v23  ;;  %2073 = vmatprep.mubr.f32.mxu0 %v11783_v3  ;;  %v6074_v4 = vand.u32 4294901760, %v10552_v7  ;;  %v4482_v60 = vand.u32 4294901760, %v10559_v50  ;;  %v4489_v62 = vsub.f32 %v10679_v52, %v4488_v38  ;;  %v6082_v30 = vand.u32 4294901760, %v6081_v41  ;;  %v11908_v41 = vld [vmem:[#allocation43_spill] sm:$0xff] }
 0x304   : > { %3745 = vmatprep.mubr.f32.mxu1 %v11783_v3 }
 0x305   : > { %v6075_v31 = vsub.f32 %v10552_v7, %v6074_v4  ;;  %v4483_v48 = vsub.f32 %v10559_v50, %v4482_v60  ;;  %v4490_v24 = vand.u32 4294901760, %v4489_v62  ;;  %v11909_v62 = vld [vmem:[#allocation47_spill] sm:$0xff] }
 0x306   : > { %2077 = vmatmul.mubr.f32.gmra.mrb[46].mxu0 %v11895_v23 }
 0x307   : > { %3747 = vmatmul.mubr.f32.vlgmr.msra.gmra.mrb[0].mxu1 %v11896_v8  ;;  %2153 = vmatprep.mubr.f32.mxu0 %v11783_v3  ;;  %v6076_v9 = vand.u32 4294901760, %v6075_v31  ;;  %v4484_v46 = vand.u32 4294901760, %v4483_v48  ;;  %v11904_v31 = vld [vmem:[#allocation34_spill] sm:$0xff]  ;;  %v11905_v48 = vld [vmem:[#allocation36_spill] sm:$0xff] }
 0x308   : > { %3917 = vmatpush1.msra.mxu1 %v9536_v15  ;;  %3752 = vmatprep.mubr.f32.mxu1 %v11783_v3  ;;  %v11898_v15 = vld [vmem:[#allocation22_spill] sm:$0xff] }
 0x309   : > { %5742 = vmatprep.subr.mxu1 %v10457_v11 }
 0x30a   : > { %2155 = vmatmul.mubr.f32.vlgmr.msra.gmra.mrb[0].mxu0 %v11896_v8 }
 0x30b   : > { %2325 = vmatpush1.msra.mxu0 %v9585_v49  ;;  %3754 = vmatmul.mubr.f32.gmra.mrb[2].mxu1 %v11897_v51  ;;  %v11900_v49 = vld [vmem:[#allocation28_spill] sm:$0xff] }
 0x30c   : > { %4150 = vmatprep.subr.mxu0 %v10465_v29  ;;  %2160 = vmatprep.mubr.f32.mxu0 %v11783_v3 }
 0x30d   : > { %3759 = vmatprep.mubr.f32.mxu1 %v11783_v3 }
 0x30e   : > { %2162 = vmatmul.mubr.f32.gmra.mrb[2].mxu0 %v11897_v51 }
 0x30f   : > { %3761 = vmatmul.mubr.f32.gmra.mrb[4].mxu1 %v11898_v15  ;;  %2167 = vmatprep.mubr.f32.mxu0 %v11783_v3 }
 0x310   : > { %3766 = vmatprep.mubr.f32.mxu1 %v11783_v3 }
 0x312   : > { %2169 = vmatmul.mubr.f32.gmra.mrb[4].mxu0 %v11898_v15 }
 0x313   : > { %3768 = vmatmul.mubr.f32.gmra.mrb[6].mxu1 %v11899_v37  ;;  %2174 = vmatprep.mubr.f32.mxu0 %v11783_v3 }
 0x314   : > { %3773 = vmatprep.mubr.f32.mxu1 %v11783_v3 }
 0x316   : > { %2176 = vmatmul.mubr.f32.gmra.mrb[6].mxu0 %v11899_v37 }
 0x317   : > { %3775 = vmatmul.mubr.f32.gmra.mrb[8].mxu1 %v11900_v49  ;;  %2181 = vmatprep.mubr.f32.mxu0 %v11783_v3 }
 0x318   : > { %3780 = vmatprep.mubr.f32.mxu1 %v11783_v3 }
 0x31a   : > { %2183 = vmatmul.mubr.f32.gmra.mrb[8].mxu0 %v11900_v49 }
 0x31b   : > { %3782 = vmatmul.mubr.f32.gmra.mrb[10].mxu1 %v11901_v61  ;;  %2188 = vmatprep.mubr.f32.mxu0 %v11783_v3 }
 0x31c   : > { %3787 = vmatprep.mubr.f32.mxu1 %v11783_v3 }
 0x31e   : > { %2190 = vmatmul.mubr.f32.gmra.mrb[10].mxu0 %v11901_v61 }
 0x31f   : > { %3789 = vmatmul.mubr.f32.gmra.mrb[12].mxu1 %v9640_v20  ;;  %2195 = vmatprep.mubr.f32.mxu0 %v11783_v3 }
 0x320   : > { %3794 = vmatprep.mubr.f32.mxu1 %v11783_v3 }
 0x322   : > { %2197 = vmatmul.mubr.f32.gmra.mrb[12].mxu0 %v9640_v20 }
 0x323   : > { %3796 = vmatmul.mubr.f32.gmra.mrb[14].mxu1 %v9665_v63  ;;  %2202 = vmatprep.mubr.f32.mxu0 %v11783_v3 }
 0x324   : > { %3801 = vmatprep.mubr.f32.mxu1 %v11783_v3 }
 0x326   : > { %2204 = vmatmul.mubr.f32.gmra.mrb[14].mxu0 %v9665_v63 }
 0x327   : > { %3803 = vmatmul.mubr.f32.gmra.mrb[16].mxu1 %v9690_v54  ;;  %2209 = vmatprep.mubr.f32.mxu0 %v11783_v3 }
 0x328   : > { %3808 = vmatprep.mubr.f32.mxu1 %v11783_v3 }
 0x32a   : > { %2211 = vmatmul.mubr.f32.gmra.mrb[16].mxu0 %v9690_v54 }
 0x32b   : > { %3810 = vmatmul.mubr.f32.gmra.mrb[18].mxu1 %v9704_v0  ;;  %2216 = vmatprep.mubr.f32.mxu0 %v11783_v3 }
 0x32c   : > { %3815 = vmatprep.mubr.f32.mxu1 %v11783_v3 }
 0x32e   : > { %2218 = vmatmul.mubr.f32.gmra.mrb[18].mxu0 %v9704_v0 }
 0x32f   : > { %3817 = vmatmul.mubr.f32.gmra.mrb[20].mxu1 %v9729_v19  ;;  %2223 = vmatprep.mubr.f32.mxu0 %v11783_v3 }
 0x330   : > { %3822 = vmatprep.mubr.f32.mxu1 %v11783_v3 }
 0x332   : > { %2225 = vmatmul.mubr.f32.gmra.mrb[20].mxu0 %v9729_v19 }
 0x333   : > { %3824 = vmatmul.mubr.f32.gmra.mrb[22].mxu1 %v9758_v16  ;;  %2230 = vmatprep.mubr.f32.mxu0 %v11783_v3 }
 0x334   : > { %3829 = vmatprep.mubr.f32.mxu1 %v11783_v3 }
 0x336   : > { %2232 = vmatmul.mubr.f32.gmra.mrb[22].mxu0 %v9758_v16 }
 0x337   : > { %3831 = vmatmul.mubr.f32.gmra.mrb[24].mxu1 %v9778_v53  ;;  %2237 = vmatprep.mubr.f32.mxu0 %v11783_v3 }
 0x338   : > { %3836 = vmatprep.mubr.f32.mxu1 %v11783_v3 }
 0x33a   : > { %2239 = vmatmul.mubr.f32.gmra.mrb[24].mxu0 %v9778_v53 }
 0x33b   : > { %3838 = vmatmul.mubr.f32.gmra.mrb[26].mxu1 %v9798_v35  ;;  %2244 = vmatprep.mubr.f32.mxu0 %v11783_v3 }
 0x33c   : > { %3843 = vmatprep.mubr.f32.mxu1 %v11783_v3 }
 0x33e   : > { %2246 = vmatmul.mubr.f32.gmra.mrb[26].mxu0 %v9798_v35 }
 0x33f   : > { %3845 = vmatmul.mubr.f32.gmra.mrb[28].mxu1 %v9808_v21  ;;  %2251 = vmatprep.mubr.f32.mxu0 %v11783_v3 }
 0x340   : > { %3850 = vmatprep.mubr.f32.mxu1 %v11783_v3 }
 0x342   : > { %2253 = vmatmul.mubr.f32.gmra.mrb[28].mxu0 %v9808_v21 }
 0x343   : > { %3852 = vmatmul.mubr.f32.gmra.mrb[30].mxu1 %v9829_v1  ;;  %2258 = vmatprep.mubr.f32.mxu0 %v11783_v3 }
 0x344   : > { %3857 = vmatprep.mubr.f32.mxu1 %v11783_v3 }
 0x346   : > { %2260 = vmatmul.mubr.f32.gmra.mrb[30].mxu0 %v9829_v1 }
 0x347   : > { %3859 = vmatmul.mubr.f32.gmra.mrb[32].mxu1 %v9858_v33  ;;  %2265 = vmatprep.mubr.f32.mxu0 %v11783_v3 }
 0x348   : > { %3864 = vmatprep.mubr.f32.mxu1 %v11783_v3 }
 0x34a   : > { %2267 = vmatmul.mubr.f32.gmra.mrb[32].mxu0 %v9858_v33 }
 0x34b   : > { %3866 = vmatmul.mubr.f32.gmra.mrb[34].mxu1 %v9878_v57  ;;  %2272 = vmatprep.mubr.f32.mxu0 %v11783_v3 }
 0x34c   : > { %3871 = vmatprep.mubr.f32.mxu1 %v11783_v3 }
 0x34e   : > { %2274 = vmatmul.mubr.f32.gmra.mrb[34].mxu0 %v9878_v57 }
 0x34f   : > { %3873 = vmatmul.mubr.f32.gmra.mrb[36].mxu1 %v9898_v59  ;;  %2279 = vmatprep.mubr.f32.mxu0 %v11783_v3 }
 0x350   : > { %3878 = vmatprep.mubr.f32.mxu1 %v11783_v3 }
 0x352   : > { %2281 = vmatmul.mubr.f32.gmra.mrb[36].mxu0 %v9898_v59 }
 0x353   : > { %3880 = vmatmul.mubr.f32.gmra.mrb[38].mxu1 %v9906_v26  ;;  %2286 = vmatprep.mubr.f32.mxu0 %v11783_v3 }
 0x354   : > { %3885 = vmatprep.mubr.f32.mxu1 %v11783_v3 }
 0x356   : > { %2288 = vmatmul.mubr.f32.gmra.mrb[38].mxu0 %v9906_v26 }
 0x357   : > { %3887 = vmatmul.mubr.f32.gmra.mrb[40].mxu1 %v9938_v47  ;;  %2293 = vmatprep.mubr.f32.mxu0 %v11783_v3 }
 0x358   : > { %3892 = vmatprep.mubr.f32.mxu1 %v11783_v3 }
 0x35a   : > { %2295 = vmatmul.mubr.f32.gmra.mrb[40].mxu0 %v9938_v47 }
 0x35b   : > { %3894 = vmatmul.mubr.f32.gmra.mrb[42].mxu1 %v9958_v14  ;;  %2300 = vmatprep.mubr.f32.mxu0 %v11783_v3 }
 0x35c   : > { %3899 = vmatprep.mubr.f32.mxu1 %v11783_v3 }
 0x35e   : > { %2302 = vmatmul.mubr.f32.gmra.mrb[42].mxu0 %v9958_v14 }
 0x35f   : > { %3901 = vmatmul.mubr.f32.gmra.mrb[44].mxu1 %v9978_v42  ;;  %2307 = vmatprep.mubr.f32.mxu0 %v11783_v3 }
 0x360   : > { %3906 = vmatprep.mubr.f32.mxu1 %v11783_v3 }
 0x362   : > { %2309 = vmatmul.mubr.f32.gmra.mrb[44].mxu0 %v9978_v42 }
 0x363   : > { %3908 = vmatmul.mubr.f32.gmra.mrb[46].mxu1 %v9995_v56  ;;  %2314 = vmatprep.mubr.f32.mxu0 %v11783_v3 }
 0x364   : > { %3980 = vmatprep.mubr.f32.mxu1 %v11783_v3 }
 0x366   : > { %2316 = vmatmul.mubr.f32.gmra.mrb[46].mxu0 %v9995_v56 }
 0x367   : > { %3982 = vmatmul.mubr.f32.vlgmr.msra.gmra.mrb[0].mxu1 %v11896_v8  ;;  %2388 = vmatprep.mubr.f32.mxu0 %v11783_v3 }
 0x368   : > { %5744 = vmatpush1.msra.mxu1 %v10575_v43  ;;  %3987 = vmatprep.mubr.f32.mxu1 %v11783_v3 }
 0x369   : > { %6077 = vmatprep.subr.mxu1 %v6076_v9  ;;  %v11906_v9 = vld [vmem:[#allocation37_spill] sm:$0xff] }
 0x36a   : > { %2390 = vmatmul.mubr.f32.vlgmr.msra.gmra.mrb[0].mxu0 %v11896_v8 }
 0x36b   : > { %4152 = vmatpush1.msra.mxu0 %v10586_v40  ;;  %3989 = vmatmul.mubr.f32.gmra.mrb[2].mxu1 %v11897_v51 }
 0x36c   : > { %4485 = vmatprep.subr.mxu0 %v4484_v46  ;;  %2395 = vmatprep.mubr.f32.mxu0 %v11783_v3  ;;  %v11907_v46 = vld [vmem:[#allocation39_spill] sm:$0xff] }
 0x36d   : > { %3994 = vmatprep.mubr.f32.mxu1 %v11783_v3 }
 0x36e   : > { %2397 = vmatmul.mubr.f32.gmra.mrb[2].mxu0 %v11897_v51 }
 0x36f   : > { %3996 = vmatmul.mubr.f32.gmra.mrb[4].mxu1 %v11898_v15  ;;  %2402 = vmatprep.mubr.f32.mxu0 %v11783_v3 }
 0x370   : > { %4001 = vmatprep.mubr.f32.mxu1 %v11783_v3 }
 0x372   : > { %2404 = vmatmul.mubr.f32.gmra.mrb[4].mxu0 %v11898_v15 }
 0x373   : > { %4003 = vmatmul.mubr.f32.gmra.mrb[6].mxu1 %v11899_v37  ;;  %2409 = vmatprep.mubr.f32.mxu0 %v11783_v3 }
 0x374   : > { %4008 = vmatprep.mubr.f32.mxu1 %v11783_v3 }
 0x376   : > { %2411 = vmatmul.mubr.f32.gmra.mrb[6].mxu0 %v11899_v37 }
 0x377   : > { %4010 = vmatmul.mubr.f32.gmra.mrb[8].mxu1 %v11900_v49  ;;  %2416 = vmatprep.mubr.f32.mxu0 %v11783_v3 }
 0x378   : > { %4015 = vmatprep.mubr.f32.mxu1 %v11783_v3 }
 0x37a   : > { %2418 = vmatmul.mubr.f32.gmra.mrb[8].mxu0 %v11900_v49 }
 0x37b   : > { %4017 = vmatmul.mubr.f32.gmra.mrb[10].mxu1 %v11901_v61  ;;  %2423 = vmatprep.mubr.f32.mxu0 %v11783_v3 }
 0x37c   : > { %4022 = vmatprep.mubr.f32.mxu1 %v11783_v3 }
 0x37e   : > { %2425 = vmatmul.mubr.f32.gmra.mrb[10].mxu0 %v11901_v61 }
 0x37f   : > { %4024 = vmatmul.mubr.f32.gmra.mrb[12].mxu1 %v9640_v20  ;;  %2430 = vmatprep.mubr.f32.mxu0 %v11783_v3 }
 0x380   : > { %4029 = vmatprep.mubr.f32.mxu1 %v11783_v3 }
 0x382   : > { %2432 = vmatmul.mubr.f32.gmra.mrb[12].mxu0 %v9640_v20 }
 0x383   : > { %4031 = vmatmul.mubr.f32.gmra.mrb[14].mxu1 %v9665_v63  ;;  %2437 = vmatprep.mubr.f32.mxu0 %v11783_v3 }
 0x384   : > { %4036 = vmatprep.mubr.f32.mxu1 %v11783_v3 }
 0x386   : > { %2439 = vmatmul.mubr.f32.gmra.mrb[14].mxu0 %v9665_v63 }
 0x387   : > { %4038 = vmatmul.mubr.f32.gmra.mrb[16].mxu1 %v9690_v54  ;;  %2444 = vmatprep.mubr.f32.mxu0 %v11783_v3 }
 0x388   : > { %4043 = vmatprep.mubr.f32.mxu1 %v11783_v3 }
 0x38a   : > { %2446 = vmatmul.mubr.f32.gmra.mrb[16].mxu0 %v9690_v54 }
 0x38b   : > { %4045 = vmatmul.mubr.f32.gmra.mrb[18].mxu1 %v9704_v0  ;;  %2451 = vmatprep.mubr.f32.mxu0 %v11783_v3 }
 0x38c   : > { %4050 = vmatprep.mubr.f32.mxu1 %v11783_v3 }
 0x38e   : > { %2453 = vmatmul.mubr.f32.gmra.mrb[18].mxu0 %v9704_v0 }
 0x38f   : > { %4052 = vmatmul.mubr.f32.gmra.mrb[20].mxu1 %v9729_v19  ;;  %2458 = vmatprep.mubr.f32.mxu0 %v11783_v3 }
 0x390   : > { %4057 = vmatprep.mubr.f32.mxu1 %v11783_v3 }
 0x392   : > { %2460 = vmatmul.mubr.f32.gmra.mrb[20].mxu0 %v9729_v19 }
 0x393   : > { %4059 = vmatmul.mubr.f32.gmra.mrb[22].mxu1 %v9758_v16  ;;  %2465 = vmatprep.mubr.f32.mxu0 %v11783_v3 }
 0x394   : > { %4064 = vmatprep.mubr.f32.mxu1 %v11783_v3 }
 0x396   : > { %2467 = vmatmul.mubr.f32.gmra.mrb[22].mxu0 %v9758_v16 }
 0x397   : > { %4066 = vmatmul.mubr.f32.gmra.mrb[24].mxu1 %v9778_v53  ;;  %2472 = vmatprep.mubr.f32.mxu0 %v11783_v3 }
 0x398   : > { %4071 = vmatprep.mubr.f32.mxu1 %v11783_v3 }
 0x39a   : > { %2474 = vmatmul.mubr.f32.gmra.mrb[24].mxu0 %v9778_v53 }
 0x39b   : > { %4073 = vmatmul.mubr.f32.gmra.mrb[26].mxu1 %v9798_v35  ;;  %2479 = vmatprep.mubr.f32.mxu0 %v11783_v3 }
 0x39c   : > { %4078 = vmatprep.mubr.f32.mxu1 %v11783_v3 }
 0x39e   : > { %2481 = vmatmul.mubr.f32.gmra.mrb[26].mxu0 %v9798_v35 }
 0x39f   : > { %4080 = vmatmul.mubr.f32.gmra.mrb[28].mxu1 %v9808_v21  ;;  %2486 = vmatprep.mubr.f32.mxu0 %v11783_v3 }
 0x3a0   : > { %4085 = vmatprep.mubr.f32.mxu1 %v11783_v3 }
 0x3a2   : > { %2488 = vmatmul.mubr.f32.gmra.mrb[28].mxu0 %v9808_v21 }
 0x3a3   : > { %4087 = vmatmul.mubr.f32.gmra.mrb[30].mxu1 %v9829_v1  ;;  %2493 = vmatprep.mubr.f32.mxu0 %v11783_v3 }
 0x3a4   : > { %4092 = vmatprep.mubr.f32.mxu1 %v11783_v3 }
 0x3a6   : > { %2495 = vmatmul.mubr.f32.gmra.mrb[30].mxu0 %v9829_v1 }
 0x3a7   : > { %4094 = vmatmul.mubr.f32.gmra.mrb[32].mxu1 %v9858_v33  ;;  %2500 = vmatprep.mubr.f32.mxu0 %v11783_v3 }
 0x3a8   : > { %4099 = vmatprep.mubr.f32.mxu1 %v11783_v3 }
 0x3aa   : > { %2502 = vmatmul.mubr.f32.gmra.mrb[32].mxu0 %v9858_v33 }
 0x3ab   : > { %4101 = vmatmul.mubr.f32.gmra.mrb[34].mxu1 %v9878_v57  ;;  %2507 = vmatprep.mubr.f32.mxu0 %v11783_v3 }
 0x3ac   : > { %4106 = vmatprep.mubr.f32.mxu1 %v11783_v3 }
 0x3ae   : > { %2509 = vmatmul.mubr.f32.gmra.mrb[34].mxu0 %v9878_v57 }
 0x3af   : > { %4108 = vmatmul.mubr.f32.gmra.mrb[36].mxu1 %v9898_v59  ;;  %2514 = vmatprep.mubr.f32.mxu0 %v11783_v3 }
 0x3b0   : > { %4113 = vmatprep.mubr.f32.mxu1 %v11783_v3 }
 0x3b2   : > { %2516 = vmatmul.mubr.f32.gmra.mrb[36].mxu0 %v9898_v59 }
 0x3b3   : > { %4115 = vmatmul.mubr.f32.gmra.mrb[38].mxu1 %v9906_v26  ;;  %2521 = vmatprep.mubr.f32.mxu0 %v11783_v3 }
 0x3b4   : > { %4120 = vmatprep.mubr.f32.mxu1 %v11783_v3 }
 0x3b6   : > { %2523 = vmatmul.mubr.f32.gmra.mrb[38].mxu0 %v9906_v26 }
 0x3b7   : > { %4122 = vmatmul.mubr.f32.gmra.mrb[40].mxu1 %v9938_v47  ;;  %2528 = vmatprep.mubr.f32.mxu0 %v11783_v3 }
 0x3b8   : > { %4127 = vmatprep.mubr.f32.mxu1 %v11783_v3 }
 0x3ba   : > { %2530 = vmatmul.mubr.f32.gmra.mrb[40].mxu0 %v9938_v47 }
 0x3bb   : > { %4129 = vmatmul.mubr.f32.gmra.mrb[42].mxu1 %v9958_v14  ;;  %2535 = vmatprep.mubr.f32.mxu0 %v11783_v3 }
 0x3bc   : > { %4134 = vmatprep.mubr.f32.mxu1 %v11783_v3 }
 0x3be   : > { %2537 = vmatmul.mubr.f32.gmra.mrb[42].mxu0 %v9958_v14 }
 0x3bf   : > { %4136 = vmatmul.mubr.f32.gmra.mrb[44].mxu1 %v9978_v42  ;;  %2542 = vmatprep.mubr.f32.mxu0 %v11783_v3 }
 0x3c0   : > { %4141 = vmatprep.mubr.f32.mxu1 %v11783_v3 }
 0x3c2   : > { %2544 = vmatmul.mubr.f32.gmra.mrb[44].mxu0 %v9978_v42 }
 0x3c3   : > { %4143 = vmatmul.mubr.f32.gmra.mrb[46].mxu1 %v9995_v56  ;;  %2549 = vmatprep.mubr.f32.mxu0 %v11783_v3 }
 0x3c4   : > { %5807 = vmatprep.mubr.f32.mxu1 %v11783_v3 }
 0x3c6   : > { %2551 = vmatmul.mubr.f32.gmra.mrb[46].mxu0 %v9995_v56 }
 0x3c7   : > { %5813 = vmatmul.mubr.f32.vlgmr.msra.gmra.mrb[48].mxu1 %v11902_v22  ;;  %4215 = vmatprep.mubr.f32.mxu0 %v11783_v3 }
 0x3c8   : > { %6083 = vmatpush1.msra.mxu1 %v6082_v30  ;;  %5818 = vmatprep.mubr.f32.mxu1 %v11783_v3  ;;  %v11910_v30 = vld [vmem:[#allocation49_spill] sm:$0xff] }
 0x3c9   : > { %6317 = vmatprep.subr.mxu1 %v10552_v7 }
 0x3ca   : > { %4221 = vmatmul.mubr.f32.vlgmr.msra.gmra.mrb[48].mxu0 %v11902_v22  ;;  %v11911_v22 = vld [vmem:[#allocation51_spill] sm:$0xff] }
 0x3cb   : > { %4491 = vmatpush1.msra.mxu0 %v4490_v24  ;;  %5824 = vmatmul.mubr.f32.gmra.mrb[50].mxu1 %v11903_v10  ;;  %v11912_v24 = vld [vmem:[#allocation54_spill] sm:$0xff] }
 0x3cc   : > { %4725 = vmatprep.subr.mxu0 %v10559_v50  ;;  %4226 = vmatprep.mubr.f32.mxu0 %v11783_v3 }
 0x3cd   : > { %5829 = vmatprep.mubr.f32.mxu1 %v11783_v3 }
 0x3ce   : > { %4232 = vmatmul.mubr.f32.gmra.mrb[50].mxu0 %v11903_v10  ;;  %v11913_v10 = vld [vmem:[#allocation58_spill] sm:$0xff] }
 0x3cf   : > { %5835 = vmatmul.mubr.f32.gmra.mrb[52].mxu1 %v11904_v31  ;;  %4237 = vmatprep.mubr.f32.mxu0 %v11783_v3 }
 0x3d0   : > { %5840 = vmatprep.mubr.f32.mxu1 %v11783_v3 }
 0x3d2   : > { %4243 = vmatmul.mubr.f32.gmra.mrb[52].mxu0 %v11904_v31  ;;  %v11914_v31 = vld [vmem:[#allocation62_spill] sm:$0xff] }
 0x3d3   : > { %5846 = vmatmul.mubr.f32.gmra.mrb[54].mxu1 %v11905_v48  ;;  %4248 = vmatprep.mubr.f32.mxu0 %v11783_v3 }
 0x3d4   : > { %5851 = vmatprep.mubr.f32.mxu1 %v11783_v3 }
 0x3d6   : > { %4254 = vmatmul.mubr.f32.gmra.mrb[54].mxu0 %v11905_v48  ;;  %v11915_v48 = vld [vmem:[#allocation64_spill] sm:$0xff] }
 0x3d7   : > { %5857 = vmatmul.mubr.f32.gmra.mrb[56].mxu1 %v11906_v9  ;;  %4259 = vmatprep.mubr.f32.mxu0 %v11783_v3 }
 0x3d8   : > { %5862 = vmatprep.mubr.f32.mxu1 %v11783_v3 }
 0x3da   : > { %4265 = vmatmul.mubr.f32.gmra.mrb[56].mxu0 %v11906_v9  ;;  %v11916_v9 = vld [vmem:[#allocation66_spill] sm:$0xff] }
 0x3db   : > { %5868 = vmatmul.mubr.f32.gmra.mrb[58].mxu1 %v11907_v46  ;;  %4270 = vmatprep.mubr.f32.mxu0 %v11783_v3 }
 0x3dc   : > { %5873 = vmatprep.mubr.f32.mxu1 %v11783_v3 }
 0x3de   : > { %4276 = vmatmul.mubr.f32.gmra.mrb[58].mxu0 %v11907_v46  ;;  %v11917_v46 = vld [vmem:[#allocation69_spill] sm:$0xff] }
 0x3df   : > { %5879 = vmatmul.mubr.f32.gmra.mrb[60].mxu1 %v11908_v41  ;;  %4281 = vmatprep.mubr.f32.mxu0 %v11783_v3 }
 0x3e0   : > { %5884 = vmatprep.mubr.f32.mxu1 %v11783_v3 }
 0x3e2   : > { %4287 = vmatmul.mubr.f32.gmra.mrb[60].mxu0 %v11908_v41  ;;  %v11918_v41 = vld [vmem:[#allocation73_spill] sm:$0xff] }
 0x3e3   : > { %5890 = vmatmul.mubr.f32.gmra.mrb[62].mxu1 %v11909_v62  ;;  %4292 = vmatprep.mubr.f32.mxu0 %v11783_v3 }
 0x3e4   : > { %5895 = vmatprep.mubr.f32.mxu1 %v11783_v3 }
 0x3e6   : > { %4298 = vmatmul.mubr.f32.gmra.mrb[62].mxu0 %v11909_v62  ;;  %v11919_v62 = vld [vmem:[#allocation76_spill] sm:$0xff] }
 0x3e7   : > { %5901 = vmatmul.mubr.f32.gmra.mrb[64].mxu1 %v11910_v30  ;;  %4303 = vmatprep.mubr.f32.mxu0 %v11783_v3 }
 0x3e8   : > { %5906 = vmatprep.mubr.f32.mxu1 %v11783_v3 }
 0x3ea   : > { %4309 = vmatmul.mubr.f32.gmra.mrb[64].mxu0 %v11910_v30  ;;  %v11920_v30 = vld [vmem:[#allocation78_spill] sm:$0xff] }
 0x3eb   : > { %5912 = vmatmul.mubr.f32.gmra.mrb[66].mxu1 %v11911_v22  ;;  %4314 = vmatprep.mubr.f32.mxu0 %v11783_v3 }
 0x3ec   : > { %5917 = vmatprep.mubr.f32.mxu1 %v11783_v3 }
 0x3ee   : > { %4320 = vmatmul.mubr.f32.gmra.mrb[66].mxu0 %v11911_v22  ;;  %v11921_v22 = vld [vmem:[#allocation81_spill] sm:$0xff] }
 0x3ef   : > { %5923 = vmatmul.mubr.f32.gmra.mrb[68].mxu1 %v11912_v24  ;;  %4325 = vmatprep.mubr.f32.mxu0 %v11783_v3 }
 0x3f0   : > { %5928 = vmatprep.mubr.f32.mxu1 %v11783_v3 }
 0x3f2   : > { %4331 = vmatmul.mubr.f32.gmra.mrb[68].mxu0 %v11912_v24  ;;  %v11922_v24 = vld [vmem:[#allocation84_spill] sm:$0xff] }
 0x3f3   : > { %5934 = vmatmul.mubr.f32.gmra.mrb[70].mxu1 %v11913_v10  ;;  %4336 = vmatprep.mubr.f32.mxu0 %v11783_v3 }
 0x3f4   : > { %5939 = vmatprep.mubr.f32.mxu1 %v11783_v3 }
 0x3f6   : > { %4342 = vmatmul.mubr.f32.gmra.mrb[70].mxu0 %v11913_v10  ;;  %v11923_v10 = vld [vmem:[#allocation87_spill] sm:$0xff] }
 0x3f7   : > { %5945 = vmatmul.mubr.f32.gmra.mrb[72].mxu1 %v11914_v31  ;;  %4347 = vmatprep.mubr.f32.mxu0 %v11783_v3 }
 0x3f8   : > { %5950 = vmatprep.mubr.f32.mxu1 %v11783_v3 }
 0x3fa   : > { %4353 = vmatmul.mubr.f32.gmra.mrb[72].mxu0 %v11914_v31  ;;  %v11924_v31 = vld [vmem:[#allocation89_spill] sm:$0xff] }
 0x3fb   : > { %5956 = vmatmul.mubr.f32.gmra.mrb[74].mxu1 %v11915_v48  ;;  %4358 = vmatprep.mubr.f32.mxu0 %v11783_v3 }
 0x3fc   : > { %5961 = vmatprep.mubr.f32.mxu1 %v11783_v3 }
 0x3fe   : > { %4364 = vmatmul.mubr.f32.gmra.mrb[74].mxu0 %v11915_v48  ;;  %v11925_v48 = vld [vmem:[#allocation90_spill] sm:$0xff] }
 0x3ff   : > { %5967 = vmatmul.mubr.f32.gmra.mrb[76].mxu1 %v11916_v9  ;;  %4369 = vmatprep.mubr.f32.mxu0 %v11783_v3 }
 0x400   : > { %5972 = vmatprep.mubr.f32.mxu1 %v11783_v3 }
 0x402   : > { %4375 = vmatmul.mubr.f32.gmra.mrb[76].mxu0 %v11916_v9 }
 0x403   : > { %5978 = vmatmul.mubr.f32.gmra.mrb[78].mxu1 %v11917_v46  ;;  %4380 = vmatprep.mubr.f32.mxu0 %v11783_v3 }
 0x404   : > { %5983 = vmatprep.mubr.f32.mxu1 %v11783_v3 }
 0x406   : > { %4386 = vmatmul.mubr.f32.gmra.mrb[78].mxu0 %v11917_v46 }
 0x407   : > { %5989 = vmatmul.mubr.f32.gmra.mrb[80].mxu1 %v11918_v41  ;;  %4391 = vmatprep.mubr.f32.mxu0 %v11783_v3 }
 0x408   : > { %5994 = vmatprep.mubr.f32.mxu1 %v11783_v3 }
 0x40a   : > { %4397 = vmatmul.mubr.f32.gmra.mrb[80].mxu0 %v11918_v41 }
 0x40b   : > { %6000 = vmatmul.mubr.f32.gmra.mrb[82].mxu1 %v11919_v62  ;;  %4402 = vmatprep.mubr.f32.mxu0 %v11783_v3 }
 0x40c   : > { %6005 = vmatprep.mubr.f32.mxu1 %v11783_v3 }
 0x40e   : > { %4408 = vmatmul.mubr.f32.gmra.mrb[82].mxu0 %v11919_v62 }
 0x40f   : > { %6011 = vmatmul.mubr.f32.gmra.mrb[84].mxu1 %v11920_v30  ;;  %4413 = vmatprep.mubr.f32.mxu0 %v11783_v3 }
 0x410   : > { %6016 = vmatprep.mubr.f32.mxu1 %v11783_v3 }
 0x412   : > { %4419 = vmatmul.mubr.f32.gmra.mrb[84].mxu0 %v11920_v30 }
 0x413   : > { %6022 = vmatmul.mubr.f32.gmra.mrb[86].mxu1 %v11921_v22  ;;  %4424 = vmatprep.mubr.f32.mxu0 %v11783_v3 }
 0x414   : > { %6027 = vmatprep.mubr.f32.mxu1 %v11783_v3 }
 0x416   : > { %4430 = vmatmul.mubr.f32.gmra.mrb[86].mxu0 %v11921_v22 }
 0x417   : > { %6033 = vmatmul.mubr.f32.gmra.mrb[88].mxu1 %v11922_v24  ;;  %4435 = vmatprep.mubr.f32.mxu0 %v11783_v3 }
 0x418   : > { %6038 = vmatprep.mubr.f32.mxu1 %v11783_v3 }
 0x41a   : > { %4441 = vmatmul.mubr.f32.gmra.mrb[88].mxu0 %v11922_v24 }
 0x41b   : > { %6044 = vmatmul.mubr.f32.gmra.mrb[90].mxu1 %v11923_v10  ;;  %4446 = vmatprep.mubr.f32.mxu0 %v11783_v3 }
 0x41c   : > { %6049 = vmatprep.mubr.f32.mxu1 %v11783_v3 }
 0x41e   : > { %4452 = vmatmul.mubr.f32.gmra.mrb[90].mxu0 %v11923_v10 }
 0x41f   : > { %6055 = vmatmul.mubr.f32.gmra.mrb[92].mxu1 %v11924_v31  ;;  %4457 = vmatprep.mubr.f32.mxu0 %v11783_v3 }
 0x420   : > { %6060 = vmatprep.mubr.f32.mxu1 %v11783_v3 }
 0x422   : > { %4463 = vmatmul.mubr.f32.gmra.mrb[92].mxu0 %v11924_v31 }
 0x423   : > { %6066 = vmatmul.mubr.f32.gmra.mrb[94].mxu1 %v11925_v48  ;;  %4468 = vmatprep.mubr.f32.mxu0 %v11783_v3 }
 0x424   : > { %6146 = vmatprep.mubr.f32.mxu1 %v11783_v3 }
 0x426   : > { %4474 = vmatmul.mubr.f32.gmra.mrb[94].mxu0 %v11925_v48 }
 0x427   : > { %6148 = vmatmul.mubr.f32.vlgmr.msra.gmra.mrb[48].mxu1 %v11896_v8  ;;  %4554 = vmatprep.mubr.f32.mxu0 %v11783_v3 }
 0x428   : > { %6320 = vmatpush1.msra.mxu1 %v10671_v55  ;;  %6153 = vmatprep.mubr.f32.mxu1 %v11783_v3  ;;  %v11938_v55 = vld [vmem:[#allocation26_spill] sm:$0xff] }
 0x429   : > { %6577 = vmatprep.subr.mxu1 %v10457_v11 }
 0x42a   : > { %4556 = vmatmul.mubr.f32.vlgmr.msra.gmra.mrb[48].mxu0 %v11896_v8 }
 0x42b   : > { %4728 = vmatpush1.msra.mxu0 %v10679_v52  ;;  %6155 = vmatmul.mubr.f32.gmra.mrb[50].mxu1 %v11897_v51  ;;  %v11941_v52 = vld [vmem:[#allocation35_spill] sm:$0xff] }
 0x42c   : > { %4985 = vmatprep.subr.mxu0 %v10465_v29  ;;  %4561 = vmatprep.mubr.f32.mxu0 %v11783_v3 }
 0x42d   : > { %6160 = vmatprep.mubr.f32.mxu1 %v11783_v3 }
 0x42e   : > { %4563 = vmatmul.mubr.f32.gmra.mrb[50].mxu0 %v11897_v51 }
 0x42f   : > { %6162 = vmatmul.mubr.f32.gmra.mrb[52].mxu1 %v11898_v15  ;;  %4568 = vmatprep.mubr.f32.mxu0 %v11783_v3 }
 0x430   : > { %6167 = vmatprep.mubr.f32.mxu1 %v11783_v3 }
 0x432   : > { %4570 = vmatmul.mubr.f32.gmra.mrb[52].mxu0 %v11898_v15 }
 0x433   : > { %6169 = vmatmul.mubr.f32.gmra.mrb[54].mxu1 %v11899_v37  ;;  %4575 = vmatprep.mubr.f32.mxu0 %v11783_v3 }
 0x434   : > { %6174 = vmatprep.mubr.f32.mxu1 %v11783_v3 }
 0x436   : > { %4577 = vmatmul.mubr.f32.gmra.mrb[54].mxu0 %v11899_v37 }
 0x437   : > { %6176 = vmatmul.mubr.f32.gmra.mrb[56].mxu1 %v11900_v49  ;;  %4582 = vmatprep.mubr.f32.mxu0 %v11783_v3 }
 0x438   : > { %6181 = vmatprep.mubr.f32.mxu1 %v11783_v3 }
 0x43a   : > { %v3983_v9 = vpop.f32.mrb[0].mxu1  ;;  %4584 = vmatmul.mubr.f32.gmra.mrb[56].mxu0 %v11900_v49 }
 0x43b   : > { %7335 = vst [vmem:[%s10821_s7 + $0x10] sm:$0xff] %v3983_v9  ;;  %v3985_v46 = vpop.f32.mrb[1].mxu1  ;;  %6183 = vmatmul.mubr.f32.gmra.mrb[58].mxu1 %v11901_v61  ;;  %4589 = vmatprep.mubr.f32.mxu0 %v11783_v3 }
 0x43c   : > { %7336 = vst [vmem:[%s10821_s7 + $0x18] sm:$0xff] %v3985_v46  ;;  %6188 = vmatprep.mubr.f32.mxu1 %v11783_v3 }
 0x43d   : > { %v2391_v41 = vpop.f32.mrb[0].mxu0 }
 0x43e   : > { %7333 = vst [vmem:[%s10821_s7] sm:$0xff] %v2391_v41  ;;  %v2393_v62 = vpop.f32.mrb[1].mxu0  ;;  %v3990_v30 = vpop.f32.mrb[2].mxu1  ;;  %4591 = vmatmul.mubr.f32.gmra.mrb[58].mxu0 %v11901_v61 }
 0x43f   : > { %7334 = vst [vmem:[%s10821_s7 + $0x8] sm:$0xff] %v2393_v62  ;;  %7343 = vst [vmem:[%s10821_s7 + $0x50] sm:$0xff] %v3990_v30  ;;  %v3992_v22 = vpop.f32.mrb[3].mxu1  ;;  %6190 = vmatmul.mubr.f32.gmra.mrb[60].mxu1 %v9640_v20  ;;  %4596 = vmatprep.mubr.f32.mxu0 %v11783_v3 }
 0x440   : > { %7344 = vst [vmem:[%s10821_s7 + $0x58] sm:$0xff] %v3992_v22  ;;  %6195 = vmatprep.mubr.f32.mxu1 %v11783_v3 }
 0x441   : > { %v2398_v24 = vpop.f32.mrb[2].mxu0 }
 0x442   : > { %7341 = vst [vmem:[%s10821_s7 + $0x40] sm:$0xff] %v2398_v24  ;;  %v2400_v10 = vpop.f32.mrb[3].mxu0  ;;  %v3997_v31 = vpop.f32.mrb[4].mxu1  ;;  %4598 = vmatmul.mubr.f32.gmra.mrb[60].mxu0 %v9640_v20 }
 0x443   : > { %7342 = vst [vmem:[%s10821_s7 + $0x48] sm:$0xff] %v2400_v10  ;;  %7351 = vst [vmem:[%s10821_s7 + $0x90] sm:$0xff] %v3997_v31  ;;  %v3999_v48 = vpop.f32.mrb[5].mxu1  ;;  %6197 = vmatmul.mubr.f32.gmra.mrb[62].mxu1 %v9665_v63  ;;  %4603 = vmatprep.mubr.f32.mxu0 %v11783_v3 }
 0x444   : > { %7352 = vst [vmem:[%s10821_s7 + $0x98] sm:$0xff] %v3999_v48  ;;  %6202 = vmatprep.mubr.f32.mxu1 %v11783_v3 }
 0x445   : > { %v2405_v9 = vpop.f32.mrb[4].mxu0 }
 0x446   : > { %7349 = vst [vmem:[%s10821_s7 + $0x80] sm:$0xff] %v2405_v9  ;;  %v2407_v46 = vpop.f32.mrb[5].mxu0  ;;  %v4004_v41 = vpop.f32.mrb[6].mxu1  ;;  %4605 = vmatmul.mubr.f32.gmra.mrb[62].mxu0 %v9665_v63 }
 0x447   : > { %7350 = vst [vmem:[%s10821_s7 + $0x88] sm:$0xff] %v2407_v46  ;;  %7359 = vst [vmem:[%s10821_s7 + $0xd0] sm:$0xff] %v4004_v41  ;;  %v4006_v62 = vpop.f32.mrb[7].mxu1  ;;  %6204 = vmatmul.mubr.f32.gmra.mrb[64].mxu1 %v9690_v54  ;;  %4610 = vmatprep.mubr.f32.mxu0 %v11783_v3 }
 0x448   : > { %7360 = vst [vmem:[%s10821_s7 + $0xd8] sm:$0xff] %v4006_v62  ;;  %6209 = vmatprep.mubr.f32.mxu1 %v11783_v3 }
 0x449   : > { %v2412_v30 = vpop.f32.mrb[6].mxu0 }
 0x44a   : > { %7357 = vst [vmem:[%s10821_s7 + $0xc0] sm:$0xff] %v2412_v30  ;;  %v2414_v22 = vpop.f32.mrb[7].mxu0  ;;  %v4011_v24 = vpop.f32.mrb[8].mxu1  ;;  %4612 = vmatmul.mubr.f32.gmra.mrb[64].mxu0 %v9690_v54 }
 0x44b   : > { %7358 = vst [vmem:[%s10821_s7 + $0xc8] sm:$0xff] %v2414_v22  ;;  %7367 = vst [vmem:[%s10821_s7 + $0x110] sm:$0xff] %v4011_v24  ;;  %v4013_v10 = vpop.f32.mrb[9].mxu1  ;;  %6211 = vmatmul.mubr.f32.gmra.mrb[66].mxu1 %v9704_v0  ;;  %4617 = vmatprep.mubr.f32.mxu0 %v11783_v3 }
 0x44c   : > { %7368 = vst [vmem:[%s10821_s7 + $0x118] sm:$0xff] %v4013_v10  ;;  %6216 = vmatprep.mubr.f32.mxu1 %v11783_v3 }
 0x44d   : > { %v2419_v31 = vpop.f32.mrb[8].mxu0 }
 0x44e   : > { %7365 = vst [vmem:[%s10821_s7 + $0x100] sm:$0xff] %v2419_v31  ;;  %v2421_v48 = vpop.f32.mrb[9].mxu0  ;;  %v4018_v9 = vpop.f32.mrb[10].mxu1  ;;  %4619 = vmatmul.mubr.f32.gmra.mrb[66].mxu0 %v9704_v0 }
 0x44f   : > { %7366 = vst [vmem:[%s10821_s7 + $0x108] sm:$0xff] %v2421_v48  ;;  %7375 = vst [vmem:[%s10821_s7 + $0x150] sm:$0xff] %v4018_v9  ;;  %v4020_v46 = vpop.f32.mrb[11].mxu1  ;;  %6218 = vmatmul.mubr.f32.gmra.mrb[68].mxu1 %v9729_v19  ;;  %4624 = vmatprep.mubr.f32.mxu0 %v11783_v3 }
 0x450   : > { %7376 = vst [vmem:[%s10821_s7 + $0x158] sm:$0xff] %v4020_v46  ;;  %6223 = vmatprep.mubr.f32.mxu1 %v11783_v3 }
 0x451   : > { %v2426_v41 = vpop.f32.mrb[10].mxu0 }
 0x452   : > { %7373 = vst [vmem:[%s10821_s7 + $0x140] sm:$0xff] %v2426_v41  ;;  %v2428_v62 = vpop.f32.mrb[11].mxu0  ;;  %v4025_v30 = vpop.f32.mrb[12].mxu1  ;;  %4626 = vmatmul.mubr.f32.gmra.mrb[68].mxu0 %v9729_v19 }
 0x453   : > { %7374 = vst [vmem:[%s10821_s7 + $0x148] sm:$0xff] %v2428_v62  ;;  %7383 = vst [vmem:[%s10821_s7 + $0x190] sm:$0xff] %v4025_v30  ;;  %v4027_v22 = vpop.f32.mrb[13].mxu1  ;;  %6225 = vmatmul.mubr.f32.gmra.mrb[70].mxu1 %v9758_v16  ;;  %4631 = vmatprep.mubr.f32.mxu0 %v11783_v3 }
 0x454   : > { %7384 = vst [vmem:[%s10821_s7 + $0x198] sm:$0xff] %v4027_v22  ;;  %6230 = vmatprep.mubr.f32.mxu1 %v11783_v3 }
 0x455   : > { %v2433_v24 = vpop.f32.mrb[12].mxu0 }
 0x456   : > { %7381 = vst [vmem:[%s10821_s7 + $0x180] sm:$0xff] %v2433_v24  ;;  %v2435_v10 = vpop.f32.mrb[13].mxu0  ;;  %v4032_v31 = vpop.f32.mrb[14].mxu1  ;;  %4633 = vmatmul.mubr.f32.gmra.mrb[70].mxu0 %v9758_v16 }
 0x457   : > { %7382 = vst [vmem:[%s10821_s7 + $0x188] sm:$0xff] %v2435_v10  ;;  %7391 = vst [vmem:[%s10821_s7 + $0x1d0] sm:$0xff] %v4032_v31  ;;  %v4034_v48 = vpop.f32.mrb[15].mxu1  ;;  %6232 = vmatmul.mubr.f32.gmra.mrb[72].mxu1 %v9778_v53  ;;  %4638 = vmatprep.mubr.f32.mxu0 %v11783_v3 }
 0x458   : > { %7392 = vst [vmem:[%s10821_s7 + $0x1d8] sm:$0xff] %v4034_v48  ;;  %6237 = vmatprep.mubr.f32.mxu1 %v11783_v3 }
 0x459   : > { %v2440_v9 = vpop.f32.mrb[14].mxu0 }
 0x45a   : > { %7389 = vst [vmem:[%s10821_s7 + $0x1c0] sm:$0xff] %v2440_v9  ;;  %v2442_v46 = vpop.f32.mrb[15].mxu0  ;;  %v4039_v41 = vpop.f32.mrb[16].mxu1  ;;  %4640 = vmatmul.mubr.f32.gmra.mrb[72].mxu0 %v9778_v53 }
 0x45b   : > { %7390 = vst [vmem:[%s10821_s7 + $0x1c8] sm:$0xff] %v2442_v46  ;;  %7399 = vst [vmem:[%s10821_s7 + $0x210] sm:$0xff] %v4039_v41  ;;  %v4041_v62 = vpop.f32.mrb[17].mxu1  ;;  %6239 = vmatmul.mubr.f32.gmra.mrb[74].mxu1 %v9798_v35  ;;  %4645 = vmatprep.mubr.f32.mxu0 %v11783_v3 }
 0x45c   : > { %7400 = vst [vmem:[%s10821_s7 + $0x218] sm:$0xff] %v4041_v62  ;;  %6244 = vmatprep.mubr.f32.mxu1 %v11783_v3 }
 0x45d   : > { %v2447_v30 = vpop.f32.mrb[16].mxu0 }
 0x45e   : > { %7397 = vst [vmem:[%s10821_s7 + $0x200] sm:$0xff] %v2447_v30  ;;  %v2449_v22 = vpop.f32.mrb[17].mxu0  ;;  %v4046_v24 = vpop.f32.mrb[18].mxu1  ;;  %4647 = vmatmul.mubr.f32.gmra.mrb[74].mxu0 %v9798_v35 }
 0x45f   : > { %7398 = vst [vmem:[%s10821_s7 + $0x208] sm:$0xff] %v2449_v22  ;;  %7407 = vst [vmem:[%s10821_s7 + $0x250] sm:$0xff] %v4046_v24  ;;  %v4048_v10 = vpop.f32.mrb[19].mxu1  ;;  %6246 = vmatmul.mubr.f32.gmra.mrb[76].mxu1 %v9808_v21  ;;  %4652 = vmatprep.mubr.f32.mxu0 %v11783_v3 }
 0x460   : > { %7408 = vst [vmem:[%s10821_s7 + $0x258] sm:$0xff] %v4048_v10  ;;  %6251 = vmatprep.mubr.f32.mxu1 %v11783_v3 }
 0x461   : > { %v2454_v31 = vpop.f32.mrb[18].mxu0 }
 0x462   : > { %7405 = vst [vmem:[%s10821_s7 + $0x240] sm:$0xff] %v2454_v31  ;;  %v2456_v48 = vpop.f32.mrb[19].mxu0  ;;  %v4053_v9 = vpop.f32.mrb[20].mxu1  ;;  %4654 = vmatmul.mubr.f32.gmra.mrb[76].mxu0 %v9808_v21 }
 0x463   : > { %7406 = vst [vmem:[%s10821_s7 + $0x248] sm:$0xff] %v2456_v48  ;;  %7415 = vst [vmem:[%s10821_s7 + $0x290] sm:$0xff] %v4053_v9  ;;  %v4055_v46 = vpop.f32.mrb[21].mxu1  ;;  %6253 = vmatmul.mubr.f32.gmra.mrb[78].mxu1 %v9829_v1  ;;  %4659 = vmatprep.mubr.f32.mxu0 %v11783_v3 }
 0x464   : > { %7416 = vst [vmem:[%s10821_s7 + $0x298] sm:$0xff] %v4055_v46  ;;  %6258 = vmatprep.mubr.f32.mxu1 %v11783_v3 }
 0x465   : > { %v2461_v41 = vpop.f32.mrb[20].mxu0 }
 0x466   : > { %7413 = vst [vmem:[%s10821_s7 + $0x280] sm:$0xff] %v2461_v41  ;;  %v2463_v62 = vpop.f32.mrb[21].mxu0  ;;  %v4060_v30 = vpop.f32.mrb[22].mxu1  ;;  %4661 = vmatmul.mubr.f32.gmra.mrb[78].mxu0 %v9829_v1 }
 0x467   : > { %7414 = vst [vmem:[%s10821_s7 + $0x288] sm:$0xff] %v2463_v62  ;;  %7423 = vst [vmem:[%s10821_s7 + $0x2d0] sm:$0xff] %v4060_v30  ;;  %v4062_v22 = vpop.f32.mrb[23].mxu1  ;;  %6260 = vmatmul.mubr.f32.gmra.mrb[80].mxu1 %v9858_v33  ;;  %4666 = vmatprep.mubr.f32.mxu0 %v11783_v3 }
 0x468   : > { %7424 = vst [vmem:[%s10821_s7 + $0x2d8] sm:$0xff] %v4062_v22  ;;  %6265 = vmatprep.mubr.f32.mxu1 %v11783_v3 }
 0x469   : > { %v2468_v24 = vpop.f32.mrb[22].mxu0 }
 0x46a   : > { %7421 = vst [vmem:[%s10821_s7 + $0x2c0] sm:$0xff] %v2468_v24  ;;  %v2470_v10 = vpop.f32.mrb[23].mxu0  ;;  %v4067_v31 = vpop.f32.mrb[24].mxu1  ;;  %4668 = vmatmul.mubr.f32.gmra.mrb[80].mxu0 %v9858_v33 }
 0x46b   : > { %7422 = vst [vmem:[%s10821_s7 + $0x2c8] sm:$0xff] %v2470_v10  ;;  %7431 = vst [vmem:[%s10821_s7 + $0x310] sm:$0xff] %v4067_v31  ;;  %v4069_v48 = vpop.f32.mrb[25].mxu1  ;;  %6267 = vmatmul.mubr.f32.gmra.mrb[82].mxu1 %v9878_v57  ;;  %4673 = vmatprep.mubr.f32.mxu0 %v11783_v3 }
 0x46c   : > { %7432 = vst [vmem:[%s10821_s7 + $0x318] sm:$0xff] %v4069_v48  ;;  %6272 = vmatprep.mubr.f32.mxu1 %v11783_v3 }
 0x46d   : > { %v2475_v9 = vpop.f32.mrb[24].mxu0 }
 0x46e   : > { %7429 = vst [vmem:[%s10821_s7 + $0x300] sm:$0xff] %v2475_v9  ;;  %v2477_v46 = vpop.f32.mrb[25].mxu0  ;;  %v4074_v41 = vpop.f32.mrb[26].mxu1  ;;  %4675 = vmatmul.mubr.f32.gmra.mrb[82].mxu0 %v9878_v57 }
 0x46f   : > { %7430 = vst [vmem:[%s10821_s7 + $0x308] sm:$0xff] %v2477_v46  ;;  %7439 = vst [vmem:[%s10821_s7 + $0x350] sm:$0xff] %v4074_v41  ;;  %v4076_v62 = vpop.f32.mrb[27].mxu1  ;;  %6274 = vmatmul.mubr.f32.gmra.mrb[84].mxu1 %v9898_v59  ;;  %4680 = vmatprep.mubr.f32.mxu0 %v11783_v3 }
 0x470   : > { %7440 = vst [vmem:[%s10821_s7 + $0x358] sm:$0xff] %v4076_v62  ;;  %6279 = vmatprep.mubr.f32.mxu1 %v11783_v3 }
 0x471   : > { %v2482_v30 = vpop.f32.mrb[26].mxu0 }
 0x472   : > { %7437 = vst [vmem:[%s10821_s7 + $0x340] sm:$0xff] %v2482_v30  ;;  %v2484_v22 = vpop.f32.mrb[27].mxu0  ;;  %v4081_v24 = vpop.f32.mrb[28].mxu1  ;;  %4682 = vmatmul.mubr.f32.gmra.mrb[84].mxu0 %v9898_v59 }
 0x473   : > { %7438 = vst [vmem:[%s10821_s7 + $0x348] sm:$0xff] %v2484_v22  ;;  %7447 = vst [vmem:[%s10821_s7 + $0x390] sm:$0xff] %v4081_v24  ;;  %v4083_v10 = vpop.f32.mrb[29].mxu1  ;;  %6281 = vmatmul.mubr.f32.gmra.mrb[86].mxu1 %v9906_v26  ;;  %4687 = vmatprep.mubr.f32.mxu0 %v11783_v3 }
 0x474   : > { %7448 = vst [vmem:[%s10821_s7 + $0x398] sm:$0xff] %v4083_v10  ;;  %6286 = vmatprep.mubr.f32.mxu1 %v11783_v3 }
 0x475   : > { %v2489_v31 = vpop.f32.mrb[28].mxu0 }
 0x476   : > { %7445 = vst [vmem:[%s10821_s7 + $0x380] sm:$0xff] %v2489_v31  ;;  %v2491_v48 = vpop.f32.mrb[29].mxu0  ;;  %v4088_v9 = vpop.f32.mrb[30].mxu1  ;;  %4689 = vmatmul.mubr.f32.gmra.mrb[86].mxu0 %v9906_v26 }
 0x477   : > { %7446 = vst [vmem:[%s10821_s7 + $0x388] sm:$0xff] %v2491_v48  ;;  %7455 = vst [vmem:[%s10821_s7 + $0x3d0] sm:$0xff] %v4088_v9  ;;  %v4090_v46 = vpop.f32.mrb[31].mxu1  ;;  %6288 = vmatmul.mubr.f32.gmra.mrb[88].mxu1 %v9938_v47  ;;  %4694 = vmatprep.mubr.f32.mxu0 %v11783_v3 }
 0x478   : > { %7456 = vst [vmem:[%s10821_s7 + $0x3d8] sm:$0xff] %v4090_v46  ;;  %6293 = vmatprep.mubr.f32.mxu1 %v11783_v3 }
 0x479   : > { %v2496_v41 = vpop.f32.mrb[30].mxu0 }
 0x47a   : > { %7453 = vst [vmem:[%s10821_s7 + $0x3c0] sm:$0xff] %v2496_v41  ;;  %v2498_v62 = vpop.f32.mrb[31].mxu0  ;;  %v4095_v30 = vpop.f32.mrb[32].mxu1  ;;  %4696 = vmatmul.mubr.f32.gmra.mrb[88].mxu0 %v9938_v47 }
 0x47b   : > { %7454 = vst [vmem:[%s10821_s7 + $0x3c8] sm:$0xff] %v2498_v62  ;;  %7463 = vst [vmem:[%s10821_s7 + $0x410] sm:$0xff] %v4095_v30  ;;  %v4097_v22 = vpop.f32.mrb[33].mxu1  ;;  %6295 = vmatmul.mubr.f32.gmra.mrb[90].mxu1 %v9958_v14  ;;  %4701 = vmatprep.mubr.f32.mxu0 %v11783_v3 }
 0x47c   : > { %7464 = vst [vmem:[%s10821_s7 + $0x418] sm:$0xff] %v4097_v22  ;;  %6300 = vmatprep.mubr.f32.mxu1 %v11783_v3 }
 0x47d   : > { %v2503_v24 = vpop.f32.mrb[32].mxu0 }
 0x47e   : > { %7461 = vst [vmem:[%s10821_s7 + $0x400] sm:$0xff] %v2503_v24  ;;  %v2505_v10 = vpop.f32.mrb[33].mxu0  ;;  %v4102_v31 = vpop.f32.mrb[34].mxu1  ;;  %4703 = vmatmul.mubr.f32.gmra.mrb[90].mxu0 %v9958_v14 }
 0x47f   : > { %7462 = vst [vmem:[%s10821_s7 + $0x408] sm:$0xff] %v2505_v10  ;;  %7471 = vst [vmem:[%s10821_s7 + $0x450] sm:$0xff] %v4102_v31  ;;  %v4104_v48 = vpop.f32.mrb[35].mxu1  ;;  %6302 = vmatmul.mubr.f32.gmra.mrb[92].mxu1 %v9978_v42  ;;  %4708 = vmatprep.mubr.f32.mxu0 %v11783_v3 }
 0x480   : > { %7472 = vst [vmem:[%s10821_s7 + $0x458] sm:$0xff] %v4104_v48  ;;  %6307 = vmatprep.mubr.f32.mxu1 %v11783_v3 }
 0x481   : > { %v2510_v9 = vpop.f32.mrb[34].mxu0 }
 0x482   : > { %7469 = vst [vmem:[%s10821_s7 + $0x440] sm:$0xff] %v2510_v9  ;;  %v2512_v46 = vpop.f32.mrb[35].mxu0  ;;  %v4109_v41 = vpop.f32.mrb[36].mxu1  ;;  %4710 = vmatmul.mubr.f32.gmra.mrb[92].mxu0 %v9978_v42 }
 0x483   : > { %7470 = vst [vmem:[%s10821_s7 + $0x448] sm:$0xff] %v2512_v46  ;;  %7479 = vst [vmem:[%s10821_s7 + $0x490] sm:$0xff] %v4109_v41  ;;  %v4111_v62 = vpop.f32.mrb[37].mxu1  ;;  %6309 = vmatmul.mubr.f32.gmra.mrb[94].mxu1 %v9995_v56  ;;  %4715 = vmatprep.mubr.f32.mxu0 %v11783_v3 }
 0x484   : > { %7480 = vst [vmem:[%s10821_s7 + $0x498] sm:$0xff] %v4111_v62  ;;  %6383 = vmatprep.mubr.f32.mxu1 %v11783_v3 }
 0x485   : > { %v2517_v30 = vpop.f32.mrb[36].mxu0 }
 0x486   : > { %7477 = vst [vmem:[%s10821_s7 + $0x480] sm:$0xff] %v2517_v30  ;;  %v2519_v22 = vpop.f32.mrb[37].mxu0  ;;  %v4116_v24 = vpop.f32.mrb[38].mxu1  ;;  %4717 = vmatmul.mubr.f32.gmra.mrb[94].mxu0 %v9995_v56 }
 0x487   : > { %7478 = vst [vmem:[%s10821_s7 + $0x488] sm:$0xff] %v2519_v22  ;;  %7487 = vst [vmem:[%s10821_s7 + $0x4d0] sm:$0xff] %v4116_v24  ;;  %v4118_v10 = vpop.f32.mrb[39].mxu1  ;;  %6386 = vmatmul.mubr.f32.vlgmr.msra.gmra.mrb[48].mxu1 %v11846_v18  ;;  %4791 = vmatprep.mubr.f32.mxu0 %v11783_v3 }
 0x488   : > { %7488 = vst [vmem:[%s10821_s7 + $0x4d8] sm:$0xff] %v4118_v10  ;;  %6579 = vmatpush1.msra.mxu1 %v10575_v43  ;;  %6391 = vmatprep.mubr.f32.mxu1 %v11783_v3 }
 0x489   : > { %6862 = vmatprep.subr.mxu1 %v6074_v4  ;;  %v2524_v31 = vpop.f32.mrb[38].mxu0 }
 0x48a   : > { %7485 = vst [vmem:[%s10821_s7 + $0x4c0] sm:$0xff] %v2524_v31  ;;  %v2526_v48 = vpop.f32.mrb[39].mxu0  ;;  %v4123_v9 = vpop.f32.mrb[40].mxu1  ;;  %4794 = vmatmul.mubr.f32.vlgmr.msra.gmra.mrb[48].mxu0 %v11846_v18 }
 0x48b   : > { %7486 = vst [vmem:[%s10821_s7 + $0x4c8] sm:$0xff] %v2526_v48  ;;  %7495 = vst [vmem:[%s10821_s7 + $0x510] sm:$0xff] %v4123_v9  ;;  %4987 = vmatpush1.msra.mxu0 %v10586_v40  ;;  %v4125_v46 = vpop.f32.mrb[41].mxu1  ;;  %6394 = vmatmul.mubr.f32.gmra.mrb[50].mxu1 %v11848_v5  ;;  %v11937_v48 = vld [vmem:[#allocation21_spill] sm:$0xff]  ;;  %v11944_v9 = vld [vmem:[#allocation44_spill] sm:$0xff] }
 0x48c   : > { %7496 = vst [vmem:[%s10821_s7 + $0x518] sm:$0xff] %v4125_v46  ;;  %5270 = vmatprep.subr.mxu0 %v4482_v60  ;;  %4799 = vmatprep.mubr.f32.mxu0 %v11783_v3  ;;  %v11945_v46 = vld [vmem:[#allocation45_spill] sm:$0xff] }
 0x48d   : > { %v2531_v7 = vpop.f32.mrb[40].mxu0  ;;  %6399 = vmatprep.mubr.f32.mxu1 %v11783_v3 }
 0x48e   : > { %7493 = vst [vmem:[%s10821_s7 + $0x500] sm:$0xff] %v2531_v7  ;;  %v2533_v18 = vpop.f32.mrb[41].mxu0  ;;  %v4130_v4 = vpop.f32.mrb[42].mxu1  ;;  %4802 = vmatmul.mubr.f32.gmra.mrb[50].mxu0 %v11848_v5  ;;  %v11946_v7 = vld [vmem:[#allocation48_spill] sm:$0xff] }
 0x48f   : > { %7494 = vst [vmem:[%s10821_s7 + $0x508] sm:$0xff] %v2533_v18  ;;  %7503 = vst [vmem:[%s10821_s7 + $0x550] sm:$0xff] %v4130_v4  ;;  %v4132_v41 = vpop.f32.mrb[43].mxu1  ;;  %6402 = vmatmul.mubr.f32.gmra.mrb[52].mxu1 %v9462_v32  ;;  %4807 = vmatprep.mubr.f32.mxu0 %v11783_v3  ;;  %v11947_v18 = vld [vmem:[#allocation52_spill] sm:$0xff]  ;;  %v11948_v4 = vld [vmem:[#allocation55_spill] sm:$0xff] }
 0x490   : > { %7504 = vst [vmem:[%s10821_s7 + $0x558] sm:$0xff] %v4132_v41  ;;  %6407 = vmatprep.mubr.f32.mxu1 %v11783_v3  ;;  %v11949_v41 = vld [vmem:[#allocation59_spill] sm:$0xff] }
 0x491   : > { %v2538_v50 = vpop.f32.mrb[42].mxu0 }
 0x492   : > { %7501 = vst [vmem:[%s10821_s7 + $0x540] sm:$0xff] %v2538_v50  ;;  %v2540_v60 = vpop.f32.mrb[43].mxu0  ;;  %v4137_v62 = vpop.f32.mrb[44].mxu1  ;;  %4810 = vmatmul.mubr.f32.gmra.mrb[52].mxu0 %v9462_v32  ;;  %v11950_v50 = vld [vmem:[#allocation60_spill] sm:$0xff] }
 0x493   : > { %7502 = vst [vmem:[%s10821_s7 + $0x548] sm:$0xff] %v2540_v60  ;;  %7511 = vst [vmem:[%s10821_s7 + $0x590] sm:$0xff] %v4137_v62  ;;  %v4139_v5 = vpop.f32.mrb[45].mxu1  ;;  %6410 = vmatmul.mubr.f32.gmra.mrb[54].mxu1 %v9513_v13  ;;  %4815 = vmatprep.mubr.f32.mxu0 %v11783_v3  ;;  %v11951_v60 = vld [vmem:[#allocation63_spill] sm:$0xff] }
 0x494   : > { %7512 = vst [vmem:[%s10821_s7 + $0x598] sm:$0xff] %v4139_v5  ;;  %6415 = vmatprep.mubr.f32.mxu1 %v11783_v3  ;;  %v11952_v62 = vld [vmem:[#allocation67_spill] sm:$0xff]  ;;  %v11953_v5 = vld [vmem:[#allocation70_spill] sm:$0xff] }
 0x495   : > { %v2545_v30 = vpop.f32.mrb[44].mxu0 }
 0x496   : > { %7509 = vst [vmem:[%s10821_s7 + $0x580] sm:$0xff] %v2545_v30  ;;  %v2547_v22 = vpop.f32.mrb[45].mxu0  ;;  %v4144_v24 = vpop.f32.mrb[46].mxu1  ;;  %4818 = vmatmul.mubr.f32.gmra.mrb[54].mxu0 %v9513_v13  ;;  %v11926_v13 = vld [vmem:[#allocation57_spill] sm:$0xff]  ;;  %v11954_v30 = vld [vmem:[#allocation74_spill] sm:$0xff] }
 0x497   : > { %7510 = vst [vmem:[%s10821_s7 + $0x588] sm:$0xff] %v2547_v22  ;;  %7519 = vst [vmem:[%s10821_s7 + $0x5d0] sm:$0xff] %v4144_v24  ;;  %v4146_v32 = vpop.f32.mrb[47].mxu1  ;;  %6418 = vmatmul.mubr.f32.gmra.mrb[56].mxu1 %v9559_v25  ;;  %4823 = vmatprep.mubr.f32.mxu0 %v11783_v3  ;;  %v11955_v22 = vld [vmem:[#allocation75_spill] sm:$0xff] }
 0x498   : > { %7520 = vst [vmem:[%s10821_s7 + $0x5d8] sm:$0xff] %v4146_v32  ;;  %6423 = vmatprep.mubr.f32.mxu1 %v11783_v3  ;;  %v11956_v24 = vld [vmem:[#allocation79_spill] sm:$0xff] }
 0x499   : > { %v2552_v10 = vpop.f32.mrb[46].mxu0 }
 0x49a   : > { %7517 = vst [vmem:[%s10821_s7 + $0x5c0] sm:$0xff] %v2552_v10  ;;  %v2554_v31 = vpop.f32.mrb[47].mxu0  ;;  %4826 = vmatmul.mubr.f32.gmra.mrb[56].mxu0 %v9559_v25  ;;  %v11927_v25 = vld [vmem:[#allocation61_spill] sm:$0xff] }
 0x49b   : > { %7518 = vst [vmem:[%s10821_s7 + $0x5c8] sm:$0xff] %v2554_v31  ;;  %6426 = vmatmul.mubr.f32.gmra.mrb[58].mxu1 %v9628_v36  ;;  %4831 = vmatprep.mubr.f32.mxu0 %v11783_v3 }
 0x49c   : > { %6431 = vmatprep.mubr.f32.mxu1 %v11783_v3 }
 0x49e   : > { %4834 = vmatmul.mubr.f32.gmra.mrb[58].mxu0 %v9628_v36  ;;  %v11928_v36 = vld [vmem:[#allocation65_spill] sm:$0xff] }
 0x49f   : > { %6434 = vmatmul.mubr.f32.gmra.mrb[60].mxu1 %v9663_v28  ;;  %4839 = vmatprep.mubr.f32.mxu0 %v11783_v3 }
 0x4a0   : > { %6439 = vmatprep.mubr.f32.mxu1 %v11783_v3 }
 0x4a2   : > { %4842 = vmatmul.mubr.f32.gmra.mrb[60].mxu0 %v9663_v28  ;;  %v11929_v28 = vld [vmem:[#allocation68_spill] sm:$0xff] }
 0x4a3   : > { %6442 = vmatmul.mubr.f32.gmra.mrb[62].mxu1 %v9688_v44  ;;  %4847 = vmatprep.mubr.f32.mxu0 %v11783_v3 }
 0x4a4   : > { %6447 = vmatprep.mubr.f32.mxu1 %v11783_v3 }
 0x4a6   : > { %4850 = vmatmul.mubr.f32.gmra.mrb[62].mxu0 %v9688_v44  ;;  %v11930_v44 = vld [vmem:[#allocation71_spill] sm:$0xff] }
 0x4a7   : > { %6450 = vmatmul.mubr.f32.gmra.mrb[64].mxu1 %v11850_v58  ;;  %4855 = vmatprep.mubr.f32.mxu0 %v11783_v3 }
 0x4a8   : > { %6455 = vmatprep.mubr.f32.mxu1 %v11783_v3 }
 0x4aa   : > { %4858 = vmatmul.mubr.f32.gmra.mrb[64].mxu0 %v11850_v58  ;;  %v11931_v58 = vld [vmem:[#allocation72_spill] sm:$0xff] }
 0x4ab   : > { %6458 = vmatmul.mubr.f32.gmra.mrb[66].mxu1 %v11851_v45  ;;  %4863 = vmatprep.mubr.f32.mxu0 %v11783_v3 }
 0x4ac   : > { %6463 = vmatprep.mubr.f32.mxu1 %v11783_v3 }
 0x4ae   : > { %4866 = vmatmul.mubr.f32.gmra.mrb[66].mxu0 %v11851_v45  ;;  %v11932_v45 = vld [vmem:[#allocation77_spill] sm:$0xff] }
 0x4af   : > { %6466 = vmatmul.mubr.f32.gmra.mrb[68].mxu1 %v11852_v6  ;;  %4871 = vmatprep.mubr.f32.mxu0 %v11783_v3 }
 0x4b0   : > { %6471 = vmatprep.mubr.f32.mxu1 %v11783_v3 }
 0x4b2   : > { %4874 = vmatmul.mubr.f32.gmra.mrb[68].mxu0 %v11852_v6  ;;  %v11933_v6 = vld [vmem:[#allocation80_spill] sm:$0xff] }
 0x4b3   : > { %6474 = vmatmul.mubr.f32.gmra.mrb[70].mxu1 %v11853_v2  ;;  %4879 = vmatprep.mubr.f32.mxu0 %v11783_v3 }
 0x4b4   : > { %6479 = vmatprep.mubr.f32.mxu1 %v11783_v3 }
 0x4b6   : > { %4882 = vmatmul.mubr.f32.gmra.mrb[70].mxu0 %v11853_v2  ;;  %v11934_v2 = vld [vmem:[#allocation83_spill] sm:$0xff] }
 0x4b7   : > { %6482 = vmatmul.mubr.f32.gmra.mrb[72].mxu1 %v11854_v12  ;;  %4887 = vmatprep.mubr.f32.mxu0 %v11783_v3 }
 0x4b8   : > { %6487 = vmatprep.mubr.f32.mxu1 %v11783_v3 }
 0x4ba   : > { %4890 = vmatmul.mubr.f32.gmra.mrb[72].mxu0 %v11854_v12  ;;  %v11935_v12 = vld [vmem:[#allocation86_spill] sm:$0xff] }
 0x4bb   : > { %6490 = vmatmul.mubr.f32.gmra.mrb[74].mxu1 %v11855_v27  ;;  %4895 = vmatprep.mubr.f32.mxu0 %v11783_v3 }
 0x4bc   : > { %6495 = vmatprep.mubr.f32.mxu1 %v11783_v3 }
 0x4be   : > { %4898 = vmatmul.mubr.f32.gmra.mrb[74].mxu0 %v11855_v27  ;;  %v11936_v27 = vld [vmem:[#allocation20_spill] sm:$0xff] }
 0x4bf   : > { %6498 = vmatmul.mubr.f32.gmra.mrb[76].mxu1 %v11926_v13  ;;  %4903 = vmatprep.mubr.f32.mxu0 %v11783_v3 }
 0x4c0   : > { %6503 = vmatprep.mubr.f32.mxu1 %v11783_v3 }
 0x4c2   : > { %4906 = vmatmul.mubr.f32.gmra.mrb[76].mxu0 %v11926_v13 }
 0x4c3   : > { %6506 = vmatmul.mubr.f32.gmra.mrb[78].mxu1 %v11927_v25  ;;  %4911 = vmatprep.mubr.f32.mxu0 %v11783_v3 }
 0x4c4   : > { %6511 = vmatprep.mubr.f32.mxu1 %v11783_v3 }
 0x4c6   : > { %4914 = vmatmul.mubr.f32.gmra.mrb[78].mxu0 %v11927_v25 }
 0x4c7   : > { %6514 = vmatmul.mubr.f32.gmra.mrb[80].mxu1 %v11928_v36  ;;  %4919 = vmatprep.mubr.f32.mxu0 %v11783_v3 }
 0x4c8   : > { %6519 = vmatprep.mubr.f32.mxu1 %v11783_v3 }
 0x4ca   : > { %4922 = vmatmul.mubr.f32.gmra.mrb[80].mxu0 %v11928_v36 }
 0x4cb   : > { %6522 = vmatmul.mubr.f32.gmra.mrb[82].mxu1 %v11929_v28  ;;  %4927 = vmatprep.mubr.f32.mxu0 %v11783_v3 }
 0x4cc   : > { %6527 = vmatprep.mubr.f32.mxu1 %v11783_v3 }
 0x4ce   : > { %4930 = vmatmul.mubr.f32.gmra.mrb[82].mxu0 %v11929_v28 }
 0x4cf   : > { %6530 = vmatmul.mubr.f32.gmra.mrb[84].mxu1 %v11930_v44  ;;  %4935 = vmatprep.mubr.f32.mxu0 %v11783_v3 }
 0x4d0   : > { %6535 = vmatprep.mubr.f32.mxu1 %v11783_v3 }
 0x4d2   : > { %4938 = vmatmul.mubr.f32.gmra.mrb[84].mxu0 %v11930_v44 }
 0x4d3   : > { %6538 = vmatmul.mubr.f32.gmra.mrb[86].mxu1 %v11931_v58  ;;  %4943 = vmatprep.mubr.f32.mxu0 %v11783_v3 }
 0x4d4   : > { %6543 = vmatprep.mubr.f32.mxu1 %v11783_v3 }
 0x4d6   : > { %4946 = vmatmul.mubr.f32.gmra.mrb[86].mxu0 %v11931_v58 }
 0x4d7   : > { %6546 = vmatmul.mubr.f32.gmra.mrb[88].mxu1 %v11932_v45  ;;  %4951 = vmatprep.mubr.f32.mxu0 %v11783_v3 }
 0x4d8   : > { %6551 = vmatprep.mubr.f32.mxu1 %v11783_v3 }
 0x4da   : > { %4954 = vmatmul.mubr.f32.gmra.mrb[88].mxu0 %v11932_v45 }
 0x4db   : > { %6554 = vmatmul.mubr.f32.gmra.mrb[90].mxu1 %v11933_v6  ;;  %4959 = vmatprep.mubr.f32.mxu0 %v11783_v3 }
 0x4dc   : > { %6559 = vmatprep.mubr.f32.mxu1 %v11783_v3 }
 0x4de   : > { %4962 = vmatmul.mubr.f32.gmra.mrb[90].mxu0 %v11933_v6 }
 0x4df   : > { %6562 = vmatmul.mubr.f32.gmra.mrb[92].mxu1 %v11934_v2  ;;  %4967 = vmatprep.mubr.f32.mxu0 %v11783_v3 }
 0x4e0   : > { %6567 = vmatprep.mubr.f32.mxu1 %v11783_v3 }
 0x4e2   : > { %4970 = vmatmul.mubr.f32.gmra.mrb[92].mxu0 %v11934_v2 }
 0x4e3   : > { %6570 = vmatmul.mubr.f32.gmra.mrb[94].mxu1 %v11935_v12  ;;  %4975 = vmatprep.mubr.f32.mxu0 %v11783_v3 }
 0x4e4   : > { %6642 = vmatprep.mubr.f32.mxu1 %v11783_v3 }
 0x4e6   : > { %4978 = vmatmul.mubr.f32.gmra.mrb[94].mxu0 %v11935_v12 }
 0x4e7   : > { %6646 = vmatmul.mubr.f32.vlgmr.msra.gmra.mrb[48].mxu1 %v11936_v27  ;;  %5050 = vmatprep.mubr.f32.mxu0 %v11783_v3 }
 0x4e8   : > { %6866 = vmatpush1.msra.mxu1 %v6080_v34  ;;  %6651 = vmatprep.mubr.f32.mxu1 %v11783_v3  ;;  %v11942_v34 = vld [vmem:[#allocation38_spill] sm:$0xff] }
 0x4e9   : > { %7099 = vmatprep.subr.mxu1 %v10457_v11  ;;  %v11939_v11 = vld [vmem:[#allocation30_spill] sm:$0xff] }
 0x4ea   : > { %5054 = vmatmul.mubr.f32.vlgmr.msra.gmra.mrb[48].mxu0 %v11936_v27 }
 0x4eb   : > { %5274 = vmatpush1.msra.mxu0 %v4488_v38  ;;  %6655 = vmatmul.mubr.f32.gmra.mrb[50].mxu1 %v11937_v48  ;;  %v11943_v38 = vld [vmem:[#allocation40_spill] sm:$0xff] }
 0x4ec   : > { %5507 = vmatprep.subr.mxu0 %v10465_v29  ;;  %5059 = vmatprep.mubr.f32.mxu0 %v11783_v3  ;;  %v11940_v29 = vld [vmem:[#allocation32_spill] sm:$0xff] }
 0x4ed   : > { %6660 = vmatprep.mubr.f32.mxu1 %v11783_v3 }
 0x4ee   : > { %5063 = vmatmul.mubr.f32.gmra.mrb[50].mxu0 %v11937_v48 }
 0x4ef   : > { %6664 = vmatmul.mubr.f32.gmra.mrb[52].mxu1 %v11938_v55  ;;  %5068 = vmatprep.mubr.f32.mxu0 %v11783_v3 }
 0x4f0   : > { %6669 = vmatprep.mubr.f32.mxu1 %v11783_v3 }
 0x4f2   : > { %5072 = vmatmul.mubr.f32.gmra.mrb[52].mxu0 %v11938_v55 }
 0x4f3   : > { %6673 = vmatmul.mubr.f32.gmra.mrb[54].mxu1 %v11939_v11  ;;  %5077 = vmatprep.mubr.f32.mxu0 %v11783_v3 }
 0x4f4   : > { %6678 = vmatprep.mubr.f32.mxu1 %v11783_v3 }
 0x4f6   : > { %5081 = vmatmul.mubr.f32.gmra.mrb[54].mxu0 %v11939_v11 }
 0x4f7   : > { %6682 = vmatmul.mubr.f32.gmra.mrb[56].mxu1 %v11940_v29  ;;  %5086 = vmatprep.mubr.f32.mxu0 %v11783_v3 }
 0x4f8   : > { %6687 = vmatprep.mubr.f32.mxu1 %v11783_v3 }
 0x4fa   : > { %5090 = vmatmul.mubr.f32.gmra.mrb[56].mxu0 %v11940_v29 }
 0x4fb   : > { %6691 = vmatmul.mubr.f32.gmra.mrb[58].mxu1 %v11941_v52  ;;  %5095 = vmatprep.mubr.f32.mxu0 %v11783_v3 }
 0x4fc   : > { %6696 = vmatprep.mubr.f32.mxu1 %v11783_v3 }
 0x4fe   : > { %5099 = vmatmul.mubr.f32.gmra.mrb[58].mxu0 %v11941_v52 }
 0x4ff   : > { %6700 = vmatmul.mubr.f32.gmra.mrb[60].mxu1 %v11942_v34  ;;  %5104 = vmatprep.mubr.f32.mxu0 %v11783_v3 }
 0x500   : > { %6705 = vmatprep.mubr.f32.mxu1 %v11783_v3 }
 0x502   : > { %5108 = vmatmul.mubr.f32.gmra.mrb[60].mxu0 %v11942_v34 }
 0x503   : > { %6709 = vmatmul.mubr.f32.gmra.mrb[62].mxu1 %v11943_v38  ;;  %5113 = vmatprep.mubr.f32.mxu0 %v11783_v3 }
 0x504   : > { %6714 = vmatprep.mubr.f32.mxu1 %v11783_v3 }
 0x506   : > { %5117 = vmatmul.mubr.f32.gmra.mrb[62].mxu0 %v11943_v38 }
 0x507   : > { %6718 = vmatmul.mubr.f32.gmra.mrb[64].mxu1 %v11944_v9  ;;  %5122 = vmatprep.mubr.f32.mxu0 %v11783_v3 }
 0x508   : > { %6723 = vmatprep.mubr.f32.mxu1 %v11783_v3 }
 0x50a   : > { %5126 = vmatmul.mubr.f32.gmra.mrb[64].mxu0 %v11944_v9 }
 0x50b   : > { %6727 = vmatmul.mubr.f32.gmra.mrb[66].mxu1 %v11945_v46  ;;  %5131 = vmatprep.mubr.f32.mxu0 %v11783_v3 }
 0x50c   : > { %6732 = vmatprep.mubr.f32.mxu1 %v11783_v3 }
 0x50e   : > { %5135 = vmatmul.mubr.f32.gmra.mrb[66].mxu0 %v11945_v46 }
 0x50f   : > { %6736 = vmatmul.mubr.f32.gmra.mrb[68].mxu1 %v11946_v7  ;;  %5140 = vmatprep.mubr.f32.mxu0 %v11783_v3 }
 0x510   : > { %6741 = vmatprep.mubr.f32.mxu1 %v11783_v3 }
 0x512   : > { %5144 = vmatmul.mubr.f32.gmra.mrb[68].mxu0 %v11946_v7 }
 0x513   : > { %6745 = vmatmul.mubr.f32.gmra.mrb[70].mxu1 %v11947_v18  ;;  %5149 = vmatprep.mubr.f32.mxu0 %v11783_v3 }
 0x514   : > { %6750 = vmatprep.mubr.f32.mxu1 %v11783_v3 }
 0x516   : > { %5153 = vmatmul.mubr.f32.gmra.mrb[70].mxu0 %v11947_v18 }
 0x517   : > { %6754 = vmatmul.mubr.f32.gmra.mrb[72].mxu1 %v11948_v4  ;;  %5158 = vmatprep.mubr.f32.mxu0 %v11783_v3 }
 0x518   : > { %6759 = vmatprep.mubr.f32.mxu1 %v11783_v3 }
 0x51a   : > { %5162 = vmatmul.mubr.f32.gmra.mrb[72].mxu0 %v11948_v4 }
 0x51b   : > { %6763 = vmatmul.mubr.f32.gmra.mrb[74].mxu1 %v11949_v41  ;;  %5167 = vmatprep.mubr.f32.mxu0 %v11783_v3 }
 0x51c   : > { %6768 = vmatprep.mubr.f32.mxu1 %v11783_v3 }
 0x51e   : > { %5171 = vmatmul.mubr.f32.gmra.mrb[74].mxu0 %v11949_v41 }
 0x51f   : > { %6772 = vmatmul.mubr.f32.gmra.mrb[76].mxu1 %v11950_v50  ;;  %5176 = vmatprep.mubr.f32.mxu0 %v11783_v3 }
 0x520   : > { %6777 = vmatprep.mubr.f32.mxu1 %v11783_v3 }
 0x522   : > { %5180 = vmatmul.mubr.f32.gmra.mrb[76].mxu0 %v11950_v50 }
 0x523   : > { %6781 = vmatmul.mubr.f32.gmra.mrb[78].mxu1 %v11951_v60  ;;  %5185 = vmatprep.mubr.f32.mxu0 %v11783_v3 }
 0x524   : > { %6786 = vmatprep.mubr.f32.mxu1 %v11783_v3 }
 0x526   : > { %5189 = vmatmul.mubr.f32.gmra.mrb[78].mxu0 %v11951_v60 }
 0x527   : > { %6790 = vmatmul.mubr.f32.gmra.mrb[80].mxu1 %v11952_v62  ;;  %5194 = vmatprep.mubr.f32.mxu0 %v11783_v3 }
 0x528   : > { %6795 = vmatprep.mubr.f32.mxu1 %v11783_v3 }
 0x52a   : > { %5198 = vmatmul.mubr.f32.gmra.mrb[80].mxu0 %v11952_v62 }
 0x52b   : > { %6799 = vmatmul.mubr.f32.gmra.mrb[82].mxu1 %v11953_v5  ;;  %5203 = vmatprep.mubr.f32.mxu0 %v11783_v3 }
 0x52c   : > { %6804 = vmatprep.mubr.f32.mxu1 %v11783_v3 }
 0x52e   : > { %5207 = vmatmul.mubr.f32.gmra.mrb[82].mxu0 %v11953_v5 }
 0x52f   : > { %6808 = vmatmul.mubr.f32.gmra.mrb[84].mxu1 %v11954_v30  ;;  %5212 = vmatprep.mubr.f32.mxu0 %v11783_v3 }
 0x530   : > { %6813 = vmatprep.mubr.f32.mxu1 %v11783_v3 }
 0x532   : > { %5216 = vmatmul.mubr.f32.gmra.mrb[84].mxu0 %v11954_v30 }
 0x533   : > { %6817 = vmatmul.mubr.f32.gmra.mrb[86].mxu1 %v11955_v22  ;;  %5221 = vmatprep.mubr.f32.mxu0 %v11783_v3 }
 0x534   : > { %6822 = vmatprep.mubr.f32.mxu1 %v11783_v3 }
 0x536   : > { %5225 = vmatmul.mubr.f32.gmra.mrb[86].mxu0 %v11955_v22 }
 0x537   : > { %6826 = vmatmul.mubr.f32.gmra.mrb[88].mxu1 %v11956_v24  ;;  %5230 = vmatprep.mubr.f32.mxu0 %v11783_v3 }
 0x538   : > { %6831 = vmatprep.mubr.f32.mxu1 %v11783_v3 }
 0x53a   : > { %5234 = vmatmul.mubr.f32.gmra.mrb[88].mxu0 %v11956_v24 }
 0x53b   : > { %6835 = vmatmul.mubr.f32.gmra.mrb[90].mxu1 %v11890_v17  ;;  %5239 = vmatprep.mubr.f32.mxu0 %v11783_v3 }
 0x53c   : > { %6840 = vmatprep.mubr.f32.mxu1 %v11783_v3 }
 0x53e   : > { %5243 = vmatmul.mubr.f32.gmra.mrb[90].mxu0 %v11890_v17 }
 0x53f   : > { %6844 = vmatmul.mubr.f32.gmra.mrb[92].mxu1 %v11893_v39  ;;  %5248 = vmatprep.mubr.f32.mxu0 %v11783_v3 }
 0x540   : > { %6849 = vmatprep.mubr.f32.mxu1 %v11783_v3 }
 0x542   : > { %5252 = vmatmul.mubr.f32.gmra.mrb[92].mxu0 %v11893_v39 }
 0x543   : > { %6853 = vmatmul.mubr.f32.gmra.mrb[94].mxu1 %v11895_v23  ;;  %5257 = vmatprep.mubr.f32.mxu0 %v11783_v3 }
 0x544   : > { %6929 = vmatprep.mubr.f32.mxu1 %v11783_v3 }
 0x546   : > { %5261 = vmatmul.mubr.f32.gmra.mrb[94].mxu0 %v11895_v23 }
 0x547   : > { %6931 = vmatmul.mubr.f32.vlgmr.msra.gmra.mrb[48].mxu1 %v11896_v8  ;;  %5337 = vmatprep.mubr.f32.mxu0 %v11783_v3 }
 0x548   : > { %7101 = vmatpush1.msra.mxu1 %v10575_v43  ;;  %6936 = vmatprep.mubr.f32.mxu1 %v11783_v3 }
 0x54a   : > { %5339 = vmatmul.mubr.f32.vlgmr.msra.gmra.mrb[48].mxu0 %v11896_v8 }
 0x54b   : > { %5509 = vmatpush1.msra.mxu0 %v10586_v40  ;;  %6938 = vmatmul.mubr.f32.gmra.mrb[50].mxu1 %v11897_v51 }
 0x54c   : > { %5344 = vmatprep.mubr.f32.mxu0 %v11783_v3  ;;  %6943 = vmatprep.mubr.f32.mxu1 %v11783_v3 }
 0x54e   : > { %5346 = vmatmul.mubr.f32.gmra.mrb[50].mxu0 %v11897_v51 }
 0x54f   : > { %6945 = vmatmul.mubr.f32.gmra.mrb[52].mxu1 %v11898_v15  ;;  %5351 = vmatprep.mubr.f32.mxu0 %v11783_v3 }
 0x550   : > { %6950 = vmatprep.mubr.f32.mxu1 %v11783_v3 }
 0x552   : > { %5353 = vmatmul.mubr.f32.gmra.mrb[52].mxu0 %v11898_v15 }
 0x553   : > { %6952 = vmatmul.mubr.f32.gmra.mrb[54].mxu1 %v11899_v37  ;;  %5358 = vmatprep.mubr.f32.mxu0 %v11783_v3 }
 0x554   : > { %6957 = vmatprep.mubr.f32.mxu1 %v11783_v3 }
 0x556   : > { %5360 = vmatmul.mubr.f32.gmra.mrb[54].mxu0 %v11899_v37 }
 0x557   : > { %6959 = vmatmul.mubr.f32.gmra.mrb[56].mxu1 %v11900_v49  ;;  %5365 = vmatprep.mubr.f32.mxu0 %v11783_v3 }
 0x558   : > { %6964 = vmatprep.mubr.f32.mxu1 %v11783_v3 }
 0x55a   : > { %5367 = vmatmul.mubr.f32.gmra.mrb[56].mxu0 %v11900_v49 }
 0x55b   : > { %6966 = vmatmul.mubr.f32.gmra.mrb[58].mxu1 %v11901_v61  ;;  %5372 = vmatprep.mubr.f32.mxu0 %v11783_v3 }
 0x55c   : > { %6971 = vmatprep.mubr.f32.mxu1 %v11783_v3 }
 0x55e   : > { %5374 = vmatmul.mubr.f32.gmra.mrb[58].mxu0 %v11901_v61 }
 0x55f   : > { %6973 = vmatmul.mubr.f32.gmra.mrb[60].mxu1 %v9640_v20  ;;  %5379 = vmatprep.mubr.f32.mxu0 %v11783_v3 }
 0x560   : > { %6978 = vmatprep.mubr.f32.mxu1 %v11783_v3 }
 0x562   : > { %5381 = vmatmul.mubr.f32.gmra.mrb[60].mxu0 %v9640_v20 }
 0x563   : > { %6980 = vmatmul.mubr.f32.gmra.mrb[62].mxu1 %v9665_v63  ;;  %5386 = vmatprep.mubr.f32.mxu0 %v11783_v3 }
 0x564   : > { %6985 = vmatprep.mubr.f32.mxu1 %v11783_v3 }
 0x566   : > { %5388 = vmatmul.mubr.f32.gmra.mrb[62].mxu0 %v9665_v63 }
 0x567   : > { %6987 = vmatmul.mubr.f32.gmra.mrb[64].mxu1 %v9690_v54  ;;  %5393 = vmatprep.mubr.f32.mxu0 %v11783_v3 }
 0x568   : > { %6992 = vmatprep.mubr.f32.mxu1 %v11783_v3 }
 0x56a   : > { %5395 = vmatmul.mubr.f32.gmra.mrb[64].mxu0 %v9690_v54 }
 0x56b   : > { %6994 = vmatmul.mubr.f32.gmra.mrb[66].mxu1 %v9704_v0  ;;  %5400 = vmatprep.mubr.f32.mxu0 %v11783_v3 }
 0x56c   : > { %6999 = vmatprep.mubr.f32.mxu1 %v11783_v3 }
 0x56e   : > { %5402 = vmatmul.mubr.f32.gmra.mrb[66].mxu0 %v9704_v0 }
 0x56f   : > { %7001 = vmatmul.mubr.f32.gmra.mrb[68].mxu1 %v9729_v19  ;;  %5407 = vmatprep.mubr.f32.mxu0 %v11783_v3 }
 0x570   : > { %7006 = vmatprep.mubr.f32.mxu1 %v11783_v3 }
 0x572   : > { %5409 = vmatmul.mubr.f32.gmra.mrb[68].mxu0 %v9729_v19 }
 0x573   : > { %7008 = vmatmul.mubr.f32.gmra.mrb[70].mxu1 %v9758_v16  ;;  %5414 = vmatprep.mubr.f32.mxu0 %v11783_v3 }
 0x574   : > { %7013 = vmatprep.mubr.f32.mxu1 %v11783_v3 }
 0x576   : > { %5416 = vmatmul.mubr.f32.gmra.mrb[70].mxu0 %v9758_v16 }
 0x577   : > { %7015 = vmatmul.mubr.f32.gmra.mrb[72].mxu1 %v9778_v53  ;;  %5421 = vmatprep.mubr.f32.mxu0 %v11783_v3 }
 0x578   : > { %7020 = vmatprep.mubr.f32.mxu1 %v11783_v3 }
 0x57a   : > { %5423 = vmatmul.mubr.f32.gmra.mrb[72].mxu0 %v9778_v53 }
 0x57b   : > { %7022 = vmatmul.mubr.f32.gmra.mrb[74].mxu1 %v9798_v35  ;;  %5428 = vmatprep.mubr.f32.mxu0 %v11783_v3 }
 0x57c   : > { %7027 = vmatprep.mubr.f32.mxu1 %v11783_v3 }
 0x57e   : > { %5430 = vmatmul.mubr.f32.gmra.mrb[74].mxu0 %v9798_v35 }
 0x57f   : > { %7029 = vmatmul.mubr.f32.gmra.mrb[76].mxu1 %v9808_v21  ;;  %5435 = vmatprep.mubr.f32.mxu0 %v11783_v3 }
 0x580   : > { %7034 = vmatprep.mubr.f32.mxu1 %v11783_v3 }
 0x582   : > { %5437 = vmatmul.mubr.f32.gmra.mrb[76].mxu0 %v9808_v21 }
 0x583   : > { %7036 = vmatmul.mubr.f32.gmra.mrb[78].mxu1 %v9829_v1  ;;  %5442 = vmatprep.mubr.f32.mxu0 %v11783_v3 }
 0x584   : > { %7041 = vmatprep.mubr.f32.mxu1 %v11783_v3 }
 0x586   : > { %5444 = vmatmul.mubr.f32.gmra.mrb[78].mxu0 %v9829_v1 }
 0x587   : > { %7043 = vmatmul.mubr.f32.gmra.mrb[80].mxu1 %v9858_v33  ;;  %5449 = vmatprep.mubr.f32.mxu0 %v11783_v3 }
 0x588   : > { %7048 = vmatprep.mubr.f32.mxu1 %v11783_v3 }
 0x58a   : > { %5451 = vmatmul.mubr.f32.gmra.mrb[80].mxu0 %v9858_v33 }
 0x58b   : > { %7050 = vmatmul.mubr.f32.gmra.mrb[82].mxu1 %v9878_v57  ;;  %5456 = vmatprep.mubr.f32.mxu0 %v11783_v3 }
 0x58c   : > { %7055 = vmatprep.mubr.f32.mxu1 %v11783_v3 }
 0x58e   : > { %5458 = vmatmul.mubr.f32.gmra.mrb[82].mxu0 %v9878_v57 }
 0x58f   : > { %7057 = vmatmul.mubr.f32.gmra.mrb[84].mxu1 %v9898_v59  ;;  %5463 = vmatprep.mubr.f32.mxu0 %v11783_v3 }
 0x590   : > { %7062 = vmatprep.mubr.f32.mxu1 %v11783_v3 }
 0x592   : > { %5465 = vmatmul.mubr.f32.gmra.mrb[84].mxu0 %v9898_v59 }
 0x593   : > { %7064 = vmatmul.mubr.f32.gmra.mrb[86].mxu1 %v9906_v26  ;;  %5470 = vmatprep.mubr.f32.mxu0 %v11783_v3 }
 0x594   : > { %7069 = vmatprep.mubr.f32.mxu1 %v11783_v3 }
 0x596   : > { %5472 = vmatmul.mubr.f32.gmra.mrb[86].mxu0 %v9906_v26 }
 0x597   : > { %7071 = vmatmul.mubr.f32.gmra.mrb[88].mxu1 %v9938_v47  ;;  %5477 = vmatprep.mubr.f32.mxu0 %v11783_v3 }
 0x598   : > { %7076 = vmatprep.mubr.f32.mxu1 %v11783_v3 }
 0x59a   : > { %5479 = vmatmul.mubr.f32.gmra.mrb[88].mxu0 %v9938_v47 }
 0x59b   : > { %7078 = vmatmul.mubr.f32.gmra.mrb[90].mxu1 %v9958_v14  ;;  %5484 = vmatprep.mubr.f32.mxu0 %v11783_v3 }
 0x59c   : > { %7083 = vmatprep.mubr.f32.mxu1 %v11783_v3 }
 0x59e   : > { %5486 = vmatmul.mubr.f32.gmra.mrb[90].mxu0 %v9958_v14 }
 0x59f   : > { %7085 = vmatmul.mubr.f32.gmra.mrb[92].mxu1 %v9978_v42  ;;  %5491 = vmatprep.mubr.f32.mxu0 %v11783_v3 }
 0x5a0   : > { %7090 = vmatprep.mubr.f32.mxu1 %v11783_v3 }
 0x5a2   : > { %5493 = vmatmul.mubr.f32.gmra.mrb[92].mxu0 %v9978_v42 }
 0x5a3   : > { %7092 = vmatmul.mubr.f32.gmra.mrb[94].mxu1 %v9995_v56  ;;  %5498 = vmatprep.mubr.f32.mxu0 %v11783_v3 }
 0x5a4   : > { %7164 = vmatprep.mubr.f32.mxu1 %v11783_v3 }
 0x5a6   : > { %5500 = vmatmul.mubr.f32.gmra.mrb[94].mxu0 %v9995_v56 }
 0x5a7   : > { %7166 = vmatmul.mubr.f32.vlgmr.msra.gmra.mrb[48].mxu1 %v11896_v8  ;;  %5572 = vmatprep.mubr.f32.mxu0 %v11783_v3 }
 0x5a8   : > { %7171 = vmatprep.mubr.f32.mxu1 %v11783_v3 }
 0x5aa   : > { %5574 = vmatmul.mubr.f32.vlgmr.msra.gmra.mrb[48].mxu0 %v11896_v8 }
 0x5ab   : > { %7173 = vmatmul.mubr.f32.gmra.mrb[50].mxu1 %v11897_v51  ;;  %5579 = vmatprep.mubr.f32.mxu0 %v11783_v3 }
 0x5ac   : > { %7178 = vmatprep.mubr.f32.mxu1 %v11783_v3 }
 0x5ae   : > { %5581 = vmatmul.mubr.f32.gmra.mrb[50].mxu0 %v11897_v51 }
 0x5af   : > { %7180 = vmatmul.mubr.f32.gmra.mrb[52].mxu1 %v11898_v15  ;;  %5586 = vmatprep.mubr.f32.mxu0 %v11783_v3 }
 0x5b0   : > { %7185 = vmatprep.mubr.f32.mxu1 %v11783_v3 }
 0x5b2   : > { %5588 = vmatmul.mubr.f32.gmra.mrb[52].mxu0 %v11898_v15 }
 0x5b3   : > { %7187 = vmatmul.mubr.f32.gmra.mrb[54].mxu1 %v11899_v37  ;;  %5593 = vmatprep.mubr.f32.mxu0 %v11783_v3 }
 0x5b4   : > { %7192 = vmatprep.mubr.f32.mxu1 %v11783_v3 }
 0x5b6   : > { %5595 = vmatmul.mubr.f32.gmra.mrb[54].mxu0 %v11899_v37 }
 0x5b7   : > { %7194 = vmatmul.mubr.f32.gmra.mrb[56].mxu1 %v11900_v49  ;;  %5600 = vmatprep.mubr.f32.mxu0 %v11783_v3 }
 0x5b8   : > { %7199 = vmatprep.mubr.f32.mxu1 %v11783_v3 }
 0x5ba   : > { %5602 = vmatmul.mubr.f32.gmra.mrb[56].mxu0 %v11900_v49 }
 0x5bb   : > { %7201 = vmatmul.mubr.f32.gmra.mrb[58].mxu1 %v11901_v61  ;;  %5607 = vmatprep.mubr.f32.mxu0 %v11783_v3 }
 0x5bc   : > { %7206 = vmatprep.mubr.f32.mxu1 %v11783_v3 }
 0x5be   : > { %5609 = vmatmul.mubr.f32.gmra.mrb[58].mxu0 %v11901_v61 }
 0x5bf   : > { %7208 = vmatmul.mubr.f32.gmra.mrb[60].mxu1 %v9640_v20  ;;  %5614 = vmatprep.mubr.f32.mxu0 %v11783_v3 }
 0x5c0   : > { %7213 = vmatprep.mubr.f32.mxu1 %v11783_v3 }
 0x5c2   : > { %5616 = vmatmul.mubr.f32.gmra.mrb[60].mxu0 %v9640_v20 }
 0x5c3   : > { %7215 = vmatmul.mubr.f32.gmra.mrb[62].mxu1 %v9665_v63  ;;  %5621 = vmatprep.mubr.f32.mxu0 %v11783_v3 }
 0x5c4   : > { %7220 = vmatprep.mubr.f32.mxu1 %v11783_v3 }
 0x5c6   : > { %5623 = vmatmul.mubr.f32.gmra.mrb[62].mxu0 %v9665_v63 }
 0x5c7   : > { %7222 = vmatmul.mubr.f32.gmra.mrb[64].mxu1 %v9690_v54  ;;  %5628 = vmatprep.mubr.f32.mxu0 %v11783_v3 }
 0x5c8   : > { %7227 = vmatprep.mubr.f32.mxu1 %v11783_v3 }
 0x5ca   : > { %5630 = vmatmul.mubr.f32.gmra.mrb[64].mxu0 %v9690_v54 }
 0x5cb   : > { %7229 = vmatmul.mubr.f32.gmra.mrb[66].mxu1 %v9704_v0  ;;  %5635 = vmatprep.mubr.f32.mxu0 %v11783_v3 }
 0x5cc   : > { %7234 = vmatprep.mubr.f32.mxu1 %v11783_v3 }
 0x5ce   : > { %5637 = vmatmul.mubr.f32.gmra.mrb[66].mxu0 %v9704_v0 }
 0x5cf   : > { %7236 = vmatmul.mubr.f32.gmra.mrb[68].mxu1 %v9729_v19  ;;  %5642 = vmatprep.mubr.f32.mxu0 %v11783_v3 }
 0x5d0   : > { %7241 = vmatprep.mubr.f32.mxu1 %v11783_v3 }
 0x5d2   : > { %5644 = vmatmul.mubr.f32.gmra.mrb[68].mxu0 %v9729_v19 }
 0x5d3   : > { %7243 = vmatmul.mubr.f32.gmra.mrb[70].mxu1 %v9758_v16  ;;  %5649 = vmatprep.mubr.f32.mxu0 %v11783_v3 }
 0x5d4   : > { %7248 = vmatprep.mubr.f32.mxu1 %v11783_v3 }
 0x5d6   : > { %5651 = vmatmul.mubr.f32.gmra.mrb[70].mxu0 %v9758_v16 }
 0x5d7   : > { %7250 = vmatmul.mubr.f32.gmra.mrb[72].mxu1 %v9778_v53  ;;  %5656 = vmatprep.mubr.f32.mxu0 %v11783_v3 }
 0x5d8   : > { %7255 = vmatprep.mubr.f32.mxu1 %v11783_v3 }
 0x5da   : > { %5658 = vmatmul.mubr.f32.gmra.mrb[72].mxu0 %v9778_v53 }
 0x5db   : > { %7257 = vmatmul.mubr.f32.gmra.mrb[74].mxu1 %v9798_v35  ;;  %5663 = vmatprep.mubr.f32.mxu0 %v11783_v3 }
 0x5dc   : > { %7262 = vmatprep.mubr.f32.mxu1 %v11783_v3 }
 0x5de   : > { %5665 = vmatmul.mubr.f32.gmra.mrb[74].mxu0 %v9798_v35 }
 0x5df   : > { %7264 = vmatmul.mubr.f32.gmra.mrb[76].mxu1 %v9808_v21  ;;  %5670 = vmatprep.mubr.f32.mxu0 %v11783_v3 }
 0x5e0   : > { %7269 = vmatprep.mubr.f32.mxu1 %v11783_v3 }
 0x5e2   : > { %5672 = vmatmul.mubr.f32.gmra.mrb[76].mxu0 %v9808_v21 }
 0x5e3   : > { %7271 = vmatmul.mubr.f32.gmra.mrb[78].mxu1 %v9829_v1  ;;  %5677 = vmatprep.mubr.f32.mxu0 %v11783_v3 }
 0x5e4   : > { %7276 = vmatprep.mubr.f32.mxu1 %v11783_v3 }
 0x5e6   : > { %5679 = vmatmul.mubr.f32.gmra.mrb[78].mxu0 %v9829_v1 }
 0x5e7   : > { %7278 = vmatmul.mubr.f32.gmra.mrb[80].mxu1 %v9858_v33  ;;  %5684 = vmatprep.mubr.f32.mxu0 %v11783_v3 }
 0x5e8   : > { %7283 = vmatprep.mubr.f32.mxu1 %v11783_v3 }
 0x5ea   : > { %5686 = vmatmul.mubr.f32.gmra.mrb[80].mxu0 %v9858_v33 }
 0x5eb   : > { %7285 = vmatmul.mubr.f32.gmra.mrb[82].mxu1 %v9878_v57  ;;  %5691 = vmatprep.mubr.f32.mxu0 %v11783_v3 }
 0x5ec   : > { %7290 = vmatprep.mubr.f32.mxu1 %v11783_v3 }
 0x5ee   : > { %5693 = vmatmul.mubr.f32.gmra.mrb[82].mxu0 %v9878_v57 }
 0x5ef   : > { %7292 = vmatmul.mubr.f32.gmra.mrb[84].mxu1 %v9898_v59  ;;  %5698 = vmatprep.mubr.f32.mxu0 %v11783_v3 }
 0x5f0   : > { %7297 = vmatprep.mubr.f32.mxu1 %v11783_v3 }
 0x5f2   : > { %5700 = vmatmul.mubr.f32.gmra.mrb[84].mxu0 %v9898_v59 }
 0x5f3   : > { %7299 = vmatmul.mubr.f32.gmra.mrb[86].mxu1 %v9906_v26  ;;  %5705 = vmatprep.mubr.f32.mxu0 %v11783_v3 }
 0x5f4   : > { %7304 = vmatprep.mubr.f32.mxu1 %v11783_v3 }
 0x5f6   : > { %5707 = vmatmul.mubr.f32.gmra.mrb[86].mxu0 %v9906_v26 }
 0x5f7   : > { %7306 = vmatmul.mubr.f32.gmra.mrb[88].mxu1 %v9938_v47  ;;  %5712 = vmatprep.mubr.f32.mxu0 %v11783_v3 }
 0x5f8   : > { %7311 = vmatprep.mubr.f32.mxu1 %v11783_v3 }
 0x5fa   : > { %5714 = vmatmul.mubr.f32.gmra.mrb[88].mxu0 %v9938_v47 }
 0x5fb   : > { %7313 = vmatmul.mubr.f32.gmra.mrb[90].mxu1 %v9958_v14  ;;  %5719 = vmatprep.mubr.f32.mxu0 %v11783_v3 }
 0x5fc   : > { %7318 = vmatprep.mubr.f32.mxu1 %v11783_v3 }
 0x5fe   : > { %5721 = vmatmul.mubr.f32.gmra.mrb[90].mxu0 %v9958_v14 }
 0x5ff   : > { %7320 = vmatmul.mubr.f32.gmra.mrb[92].mxu1 %v9978_v42  ;;  %5726 = vmatprep.mubr.f32.mxu0 %v11783_v3 }
 0x600   : > { %7325 = vmatprep.mubr.f32.mxu1 %v11783_v3 }
 0x602   : > { %5728 = vmatmul.mubr.f32.gmra.mrb[92].mxu0 %v9978_v42 }
 0x603   : > { %7327 = vmatmul.mubr.f32.gmra.mrb[94].mxu1 %v9995_v56  ;;  %5733 = vmatprep.mubr.f32.mxu0 %v11783_v3 }
 0x606   : > { %5735 = vmatmul.mubr.f32.gmra.mrb[94].mxu0 %v9995_v56 }
 0x67a   : > { %v7167_v35 = vpop.f32.mrb[48].mxu1 }
 0x67b   : > { %7339 = vst [vmem:[%s10821_s7 + $0x30] sm:$0xff] %v7167_v35  ;;  %v7169_v16 = vpop.f32.mrb[49].mxu1 }
 0x67c   : > { %7340 = vst [vmem:[%s10821_s7 + $0x38] sm:$0xff] %v7169_v16 }
 0x67d   : > { %v5575_v57 = vpop.f32.mrb[48].mxu0 }
 0x67e   : > { %7337 = vst [vmem:[%s10821_s7 + $0x20] sm:$0xff] %v5575_v57  ;;  %v5577_v53 = vpop.f32.mrb[49].mxu0  ;;  %v7174_v33 = vpop.f32.mrb[50].mxu1 }
 0x67f   : > { %7338 = vst [vmem:[%s10821_s7 + $0x28] sm:$0xff] %v5577_v53  ;;  %7347 = vst [vmem:[%s10821_s7 + $0x70] sm:$0xff] %v7174_v33  ;;  %v7176_v20 = vpop.f32.mrb[51].mxu1 }
 0x680   : > { %7348 = vst [vmem:[%s10821_s7 + $0x78] sm:$0xff] %v7176_v20 }
 0x681   : > { %v5582_v3 = vpop.f32.mrb[50].mxu0 }
 0x682   : > { %7345 = vst [vmem:[%s10821_s7 + $0x60] sm:$0xff] %v5582_v3  ;;  %v5584_v56 = vpop.f32.mrb[51].mxu0  ;;  %v7181_v59 = vpop.f32.mrb[52].mxu1 }
 0x683   : > { %7346 = vst [vmem:[%s10821_s7 + $0x68] sm:$0xff] %v5584_v56  ;;  %7355 = vst [vmem:[%s10821_s7 + $0xb0] sm:$0xff] %v7181_v59  ;;  %v7183_v63 = vpop.f32.mrb[53].mxu1 }
 0x684   : > { %7356 = vst [vmem:[%s10821_s7 + $0xb8] sm:$0xff] %v7183_v63 }
 0x685   : > { %v5589_v54 = vpop.f32.mrb[52].mxu0 }
 0x686   : > { %7353 = vst [vmem:[%s10821_s7 + $0xa0] sm:$0xff] %v5589_v54  ;;  %v5591_v0 = vpop.f32.mrb[53].mxu0  ;;  %v7188_v19 = vpop.f32.mrb[54].mxu1 }
 0x687   : > { %7354 = vst [vmem:[%s10821_s7 + $0xa8] sm:$0xff] %v5591_v0  ;;  %7363 = vst [vmem:[%s10821_s7 + $0xf0] sm:$0xff] %v7188_v19  ;;  %v7190_v14 = vpop.f32.mrb[55].mxu1 }
 0x688   : > { %7364 = vst [vmem:[%s10821_s7 + $0xf8] sm:$0xff] %v7190_v14 }
 0x689   : > { %v5596_v21 = vpop.f32.mrb[54].mxu0 }
 0x68a   : > { %7361 = vst [vmem:[%s10821_s7 + $0xe0] sm:$0xff] %v5596_v21  ;;  %v5598_v1 = vpop.f32.mrb[55].mxu0  ;;  %v7195_v26 = vpop.f32.mrb[56].mxu1 }
 0x68b   : > { %7362 = vst [vmem:[%s10821_s7 + $0xe8] sm:$0xff] %v5598_v1  ;;  %7371 = vst [vmem:[%s10821_s7 + $0x130] sm:$0xff] %v7195_v26  ;;  %v7197_v42 = vpop.f32.mrb[57].mxu1 }
 0x68c   : > { %7372 = vst [vmem:[%s10821_s7 + $0x138] sm:$0xff] %v7197_v42 }
 0x68d   : > { %v5603_v47 = vpop.f32.mrb[56].mxu0 }
 0x68e   : > { %7369 = vst [vmem:[%s10821_s7 + $0x120] sm:$0xff] %v5603_v47  ;;  %v5605_v17 = vpop.f32.mrb[57].mxu0  ;;  %v7202_v39 = vpop.f32.mrb[58].mxu1 }
 0x68f   : > { %7370 = vst [vmem:[%s10821_s7 + $0x128] sm:$0xff] %v5605_v17  ;;  %7379 = vst [vmem:[%s10821_s7 + $0x170] sm:$0xff] %v7202_v39  ;;  %v7204_v23 = vpop.f32.mrb[59].mxu1 }
 0x690   : > { %7380 = vst [vmem:[%s10821_s7 + $0x178] sm:$0xff] %v7204_v23 }
 0x691   : > { %v5610_v8 = vpop.f32.mrb[58].mxu0 }
 0x692   : > { %7377 = vst [vmem:[%s10821_s7 + $0x160] sm:$0xff] %v5610_v8  ;;  %v5612_v51 = vpop.f32.mrb[59].mxu0  ;;  %v7209_v15 = vpop.f32.mrb[60].mxu1 }
 0x693   : > { %7378 = vst [vmem:[%s10821_s7 + $0x168] sm:$0xff] %v5612_v51  ;;  %7387 = vst [vmem:[%s10821_s7 + $0x1b0] sm:$0xff] %v7209_v15  ;;  %v7211_v37 = vpop.f32.mrb[61].mxu1 }
 0x694   : > { %7388 = vst [vmem:[%s10821_s7 + $0x1b8] sm:$0xff] %v7211_v37 }
 0x695   : > { %v5617_v49 = vpop.f32.mrb[60].mxu0 }
 0x696   : > { %7385 = vst [vmem:[%s10821_s7 + $0x1a0] sm:$0xff] %v5617_v49  ;;  %v5619_v61 = vpop.f32.mrb[61].mxu0  ;;  %v7216_v43 = vpop.f32.mrb[62].mxu1 }
 0x697   : > { %7386 = vst [vmem:[%s10821_s7 + $0x1a8] sm:$0xff] %v5619_v61  ;;  %7395 = vst [vmem:[%s10821_s7 + $0x1f0] sm:$0xff] %v7216_v43  ;;  %v7218_v40 = vpop.f32.mrb[63].mxu1 }
 0x698   : > { %7396 = vst [vmem:[%s10821_s7 + $0x1f8] sm:$0xff] %v7218_v40 }
 0x699   : > { %v5624_v32 = vpop.f32.mrb[62].mxu0 }
 0x69a   : > { %7393 = vst [vmem:[%s10821_s7 + $0x1e0] sm:$0xff] %v5624_v32  ;;  %v5626_v10 = vpop.f32.mrb[63].mxu0  ;;  %v7223_v31 = vpop.f32.mrb[64].mxu1 }
 0x69b   : > { %7394 = vst [vmem:[%s10821_s7 + $0x1e8] sm:$0xff] %v5626_v10  ;;  %7403 = vst [vmem:[%s10821_s7 + $0x230] sm:$0xff] %v7223_v31  ;;  %v7225_v13 = vpop.f32.mrb[65].mxu1 }
 0x69c   : > { %7404 = vst [vmem:[%s10821_s7 + $0x238] sm:$0xff] %v7225_v13 }
 0x69d   : > { %v5631_v25 = vpop.f32.mrb[64].mxu0 }
 0x69e   : > { %7401 = vst [vmem:[%s10821_s7 + $0x220] sm:$0xff] %v5631_v25  ;;  %v5633_v36 = vpop.f32.mrb[65].mxu0  ;;  %v7230_v28 = vpop.f32.mrb[66].mxu1 }
 0x69f   : > { %7402 = vst [vmem:[%s10821_s7 + $0x228] sm:$0xff] %v5633_v36  ;;  %7411 = vst [vmem:[%s10821_s7 + $0x270] sm:$0xff] %v7230_v28  ;;  %v7232_v44 = vpop.f32.mrb[67].mxu1 }
 0x6a0   : > { %7412 = vst [vmem:[%s10821_s7 + $0x278] sm:$0xff] %v7232_v44 }
 0x6a1   : > { %v5638_v58 = vpop.f32.mrb[66].mxu0 }
 0x6a2   : > { %7409 = vst [vmem:[%s10821_s7 + $0x260] sm:$0xff] %v5638_v58  ;;  %v5640_v45 = vpop.f32.mrb[67].mxu0  ;;  %v7237_v6 = vpop.f32.mrb[68].mxu1 }
 0x6a3   : > { %7410 = vst [vmem:[%s10821_s7 + $0x268] sm:$0xff] %v5640_v45  ;;  %7419 = vst [vmem:[%s10821_s7 + $0x2b0] sm:$0xff] %v7237_v6  ;;  %v7239_v2 = vpop.f32.mrb[69].mxu1 }
 0x6a4   : > { %7420 = vst [vmem:[%s10821_s7 + $0x2b8] sm:$0xff] %v7239_v2 }
 0x6a5   : > { %v5645_v12 = vpop.f32.mrb[68].mxu0 }
 0x6a6   : > { %7417 = vst [vmem:[%s10821_s7 + $0x2a0] sm:$0xff] %v5645_v12  ;;  %v5647_v27 = vpop.f32.mrb[69].mxu0  ;;  %v7244_v48 = vpop.f32.mrb[70].mxu1 }
 0x6a7   : > { %7418 = vst [vmem:[%s10821_s7 + $0x2a8] sm:$0xff] %v5647_v27  ;;  %7427 = vst [vmem:[%s10821_s7 + $0x2f0] sm:$0xff] %v7244_v48  ;;  %v7246_v55 = vpop.f32.mrb[71].mxu1 }
 0x6a8   : > { %7428 = vst [vmem:[%s10821_s7 + $0x2f8] sm:$0xff] %v7246_v55 }
 0x6a9   : > { %v5652_v11 = vpop.f32.mrb[70].mxu0 }
 0x6aa   : > { %7425 = vst [vmem:[%s10821_s7 + $0x2e0] sm:$0xff] %v5652_v11  ;;  %v5654_v29 = vpop.f32.mrb[71].mxu0  ;;  %v7251_v52 = vpop.f32.mrb[72].mxu1 }
 0x6ab   : > { %7426 = vst [vmem:[%s10821_s7 + $0x2e8] sm:$0xff] %v5654_v29  ;;  %7435 = vst [vmem:[%s10821_s7 + $0x330] sm:$0xff] %v7251_v52  ;;  %v7253_v34 = vpop.f32.mrb[73].mxu1 }
 0x6ac   : > { %7436 = vst [vmem:[%s10821_s7 + $0x338] sm:$0xff] %v7253_v34 }
 0x6ad   : > { %v5659_v38 = vpop.f32.mrb[72].mxu0 }
 0x6ae   : > { %7433 = vst [vmem:[%s10821_s7 + $0x320] sm:$0xff] %v5659_v38  ;;  %v5661_v9 = vpop.f32.mrb[73].mxu0  ;;  %v7258_v46 = vpop.f32.mrb[74].mxu1 }
 0x6af   : > { %7434 = vst [vmem:[%s10821_s7 + $0x328] sm:$0xff] %v5661_v9  ;;  %7443 = vst [vmem:[%s10821_s7 + $0x370] sm:$0xff] %v7258_v46  ;;  %v7260_v7 = vpop.f32.mrb[75].mxu1 }
 0x6b0   : > { %7444 = vst [vmem:[%s10821_s7 + $0x378] sm:$0xff] %v7260_v7 }
 0x6b1   : > { %v5666_v18 = vpop.f32.mrb[74].mxu0 }
 0x6b2   : > { %7441 = vst [vmem:[%s10821_s7 + $0x360] sm:$0xff] %v5666_v18  ;;  %v5668_v4 = vpop.f32.mrb[75].mxu0  ;;  %v7265_v41 = vpop.f32.mrb[76].mxu1 }
 0x6b3   : > { %7442 = vst [vmem:[%s10821_s7 + $0x368] sm:$0xff] %v5668_v4  ;;  %7451 = vst [vmem:[%s10821_s7 + $0x3b0] sm:$0xff] %v7265_v41  ;;  %v7267_v50 = vpop.f32.mrb[77].mxu1 }
 0x6b4   : > { %7452 = vst [vmem:[%s10821_s7 + $0x3b8] sm:$0xff] %v7267_v50 }
 0x6b5   : > { %v5673_v60 = vpop.f32.mrb[76].mxu0 }
 0x6b6   : > { %7449 = vst [vmem:[%s10821_s7 + $0x3a0] sm:$0xff] %v5673_v60  ;;  %v5675_v62 = vpop.f32.mrb[77].mxu0  ;;  %v7272_v5 = vpop.f32.mrb[78].mxu1 }
 0x6b7   : > { %7450 = vst [vmem:[%s10821_s7 + $0x3a8] sm:$0xff] %v5675_v62  ;;  %7459 = vst [vmem:[%s10821_s7 + $0x3f0] sm:$0xff] %v7272_v5  ;;  %v7274_v30 = vpop.f32.mrb[79].mxu1 }
 0x6b8   : > { %7460 = vst [vmem:[%s10821_s7 + $0x3f8] sm:$0xff] %v7274_v30 }
 0x6b9   : > { %v5680_v22 = vpop.f32.mrb[78].mxu0 }
 0x6ba   : > { %7457 = vst [vmem:[%s10821_s7 + $0x3e0] sm:$0xff] %v5680_v22  ;;  %v5682_v24 = vpop.f32.mrb[79].mxu0  ;;  %v7279_v35 = vpop.f32.mrb[80].mxu1 }
 0x6bb   : > { %7458 = vst [vmem:[%s10821_s7 + $0x3e8] sm:$0xff] %v5682_v24  ;;  %7467 = vst [vmem:[%s10821_s7 + $0x430] sm:$0xff] %v7279_v35  ;;  %v7281_v16 = vpop.f32.mrb[81].mxu1 }
 0x6bc   : > { %7468 = vst [vmem:[%s10821_s7 + $0x438] sm:$0xff] %v7281_v16 }
 0x6bd   : > { %v5687_v57 = vpop.f32.mrb[80].mxu0 }
 0x6be   : > { %7465 = vst [vmem:[%s10821_s7 + $0x420] sm:$0xff] %v5687_v57  ;;  %v5689_v53 = vpop.f32.mrb[81].mxu0  ;;  %v7286_v33 = vpop.f32.mrb[82].mxu1 }
 0x6bf   : > { %7466 = vst [vmem:[%s10821_s7 + $0x428] sm:$0xff] %v5689_v53  ;;  %7475 = vst [vmem:[%s10821_s7 + $0x470] sm:$0xff] %v7286_v33  ;;  %v7288_v20 = vpop.f32.mrb[83].mxu1 }
 0x6c0   : > { %7476 = vst [vmem:[%s10821_s7 + $0x478] sm:$0xff] %v7288_v20 }
 0x6c1   : > { %v5694_v3 = vpop.f32.mrb[82].mxu0 }
 0x6c2   : > { %7473 = vst [vmem:[%s10821_s7 + $0x460] sm:$0xff] %v5694_v3  ;;  %v5696_v56 = vpop.f32.mrb[83].mxu0  ;;  %v7293_v59 = vpop.f32.mrb[84].mxu1 }
 0x6c3   : > { %7474 = vst [vmem:[%s10821_s7 + $0x468] sm:$0xff] %v5696_v56  ;;  %7483 = vst [vmem:[%s10821_s7 + $0x4b0] sm:$0xff] %v7293_v59  ;;  %v7295_v63 = vpop.f32.mrb[85].mxu1 }
 0x6c4   : > { %7484 = vst [vmem:[%s10821_s7 + $0x4b8] sm:$0xff] %v7295_v63 }
 0x6c5   : > { %v5701_v54 = vpop.f32.mrb[84].mxu0 }
 0x6c6   : > { %7481 = vst [vmem:[%s10821_s7 + $0x4a0] sm:$0xff] %v5701_v54  ;;  %v5703_v0 = vpop.f32.mrb[85].mxu0  ;;  %v7300_v19 = vpop.f32.mrb[86].mxu1 }
 0x6c7   : > { %7482 = vst [vmem:[%s10821_s7 + $0x4a8] sm:$0xff] %v5703_v0  ;;  %7491 = vst [vmem:[%s10821_s7 + $0x4f0] sm:$0xff] %v7300_v19  ;;  %v7302_v14 = vpop.f32.mrb[87].mxu1 }
 0x6c8   : > { %7492 = vst [vmem:[%s10821_s7 + $0x4f8] sm:$0xff] %v7302_v14 }
 0x6c9   : > { %v5708_v21 = vpop.f32.mrb[86].mxu0 }
 0x6ca   : > { %7489 = vst [vmem:[%s10821_s7 + $0x4e0] sm:$0xff] %v5708_v21  ;;  %v5710_v1 = vpop.f32.mrb[87].mxu0  ;;  %v7307_v26 = vpop.f32.mrb[88].mxu1 }
 0x6cb   : > { %7490 = vst [vmem:[%s10821_s7 + $0x4e8] sm:$0xff] %v5710_v1  ;;  %7499 = vst [vmem:[%s10821_s7 + $0x530] sm:$0xff] %v7307_v26  ;;  %v7309_v42 = vpop.f32.mrb[89].mxu1 }
 0x6cc   : > { %7500 = vst [vmem:[%s10821_s7 + $0x538] sm:$0xff] %v7309_v42 }
 0x6cd   : > { %v5715_v47 = vpop.f32.mrb[88].mxu0 }
 0x6ce   : > { %7497 = vst [vmem:[%s10821_s7 + $0x520] sm:$0xff] %v5715_v47  ;;  %v5717_v17 = vpop.f32.mrb[89].mxu0  ;;  %v7314_v39 = vpop.f32.mrb[90].mxu1 }
 0x6cf   : > { %7498 = vst [vmem:[%s10821_s7 + $0x528] sm:$0xff] %v5717_v17  ;;  %7507 = vst [vmem:[%s10821_s7 + $0x570] sm:$0xff] %v7314_v39  ;;  %v7316_v23 = vpop.f32.mrb[91].mxu1 }
 0x6d0   : > { %7508 = vst [vmem:[%s10821_s7 + $0x578] sm:$0xff] %v7316_v23 }
 0x6d1   : > { %v5722_v8 = vpop.f32.mrb[90].mxu0 }
 0x6d2   : > { %7505 = vst [vmem:[%s10821_s7 + $0x560] sm:$0xff] %v5722_v8  ;;  %v5724_v51 = vpop.f32.mrb[91].mxu0  ;;  %v7321_v15 = vpop.f32.mrb[92].mxu1 }
 0x6d3   : > { %7506 = vst [vmem:[%s10821_s7 + $0x568] sm:$0xff] %v5724_v51  ;;  %7515 = vst [vmem:[%s10821_s7 + $0x5b0] sm:$0xff] %v7321_v15  ;;  %v7323_v37 = vpop.f32.mrb[93].mxu1 }
 0x6d4   : > { %7516 = vst [vmem:[%s10821_s7 + $0x5b8] sm:$0xff] %v7323_v37 }
 0x6d5   : > { %v5729_v49 = vpop.f32.mrb[92].mxu0 }
 0x6d6   : > { %7513 = vst [vmem:[%s10821_s7 + $0x5a0] sm:$0xff] %v5729_v49  ;;  %v5731_v61 = vpop.f32.mrb[93].mxu0  ;;  %v7328_v43 = vpop.f32.mrb[94].mxu1 }
 0x6d7   : > { %7514 = vst [vmem:[%s10821_s7 + $0x5a8] sm:$0xff] %v5731_v61  ;;  %7523 = vst [vmem:[%s10821_s7 + $0x5f0] sm:$0xff] %v7328_v43  ;;  %v7330_v40 = vpop.f32.mrb[95].mxu1 }
 0x6d8   : > { %7524 = vst [vmem:[%s10821_s7 + $0x5f8] sm:$0xff] %v7330_v40 }
 0x6d9   : > { %v5736_v32 = vpop.f32.mrb[94].mxu0 }
 0x6da   : > { %7521 = vst [vmem:[%s10821_s7 + $0x5e0] sm:$0xff] %v5736_v32  ;;  %v5738_v10 = vpop.f32.mrb[95].mxu0 }
 0x6db   : > { %7522 = vst [vmem:[%s10821_s7 + $0x5e8] sm:$0xff] %v5738_v10 }
 0x6dc   : > { %8781 = shalt.err (!%p8778_p5)
}
 0x6dd   : > { %s8782_s26 = scalar_lea.hbm %s11491_s10, 24576  ;;  %s8786_s6 = scalar_lea.hbm %s11548_s3, 49152 }
 0x6de   : > { %p8783_p10 = scmp.ne.s32.totalorder %s11491_s10, %s8782_s26  ;;  %p8787_p7 = scmp.lt.u32.totalorder %s11491_s10, %s11548_s3 }
 0x6df   : > { %p8788_p3 = scmp.lt.u32.totalorder %s8786_s6, %s8782_s26  ;;  %p8790_p2 = scmp.lt.u32.totalorder %s8782_s26, %s11491_s10 }
 0x6e0   : > { %p8784_p4 = pnand %p8783_p10, %p8988_p13 }
 0x6e1   : > { %p8789_p11 = por %p8788_p3, %p8787_p7 }
 0x6e2   : > { %p8785_p1 = pneg %p8784_p4 }
 0x6e3   : > { %p8791_p6 = por %p8790_p2, %p8789_p11 }
 0x6e5   : > { %p8792_p8 = pnand %p8791_p6, %p8785_p1 }
 0x6e7   : > { %8795 = shalt.err (!%p8792_p8)
}
 0x6e8   : > { %s8866_s21 = smov 1024  }
 0x6e9   : > { %8635 = dma.vmem_to_hbm [thread:$0]  (%p8988_p13), %s11493_s18, 24576, %s11491_s10, %s7526_s15, %s8866_s21, %s8866_s21, %s8862_s9  }
 0x6ea PF: > { %s7557_s19 = sand.u32 1, %s8834_s12   ;;  %p11957_p9 = scmp.ne.s32.totalorder %s11744_s23, 0 }
 0x6eb   : > { %p11958_p12 = scmp.ge.s32.totalorder %s8854_s17, 2  ;;  %s7558_s25 = scalar_lea.sflag [#allocation4], %s7557_s19 }
 0x6ed   : > { %p8646_p0 = pnand %p11958_p12, %p11957_p9 }
 0x6ef   : > { %8829 = dma.done.wait (!%p8646_p0), %s7558_s25, 24576  }
 0x6f0   : > { %8831 = vsyncadd (!%p8646_p0), %s7558_s25, 4294942720  ;;  %s20_s17 = sadd.s32 1, %s8854_s17   ;;  %s11959_s12 = smov %s8838_s13 }
 0x6f1   : > { %p17_p5 = scmp.ge.s32.totalorder %s20_s17, 4   ;;  %s11960_s13 = smov %s8842_s14 }
 0x6f2   : > { %s11961_s14 = smov %s8996_s5  ;;  %s11962_s15 = smov %s8850_s16 }
 0x6f3   : > { %s11963_s16 = smov %s11965_s28  ;;  %19 = sbr.rel (!%p17_p5) target bundleno = 7 (0x7), region = 91 }
 0x6fa   :  { %7563 = vsyncpa [#allocation3], 1 }
 0x6fb   :  { %7565 = vsyncpa [#allocation3 + $0x1], 1 }
 0x6fc   :  { %7566 = vsyncpa [#allocation6], 1 }
 0x6fd   :  { %7567 = vsyncpa [#allocation4], 1 }
 0x6fe   :  { %7569 = vsyncpa [#allocation4 + $0x1], 1 }

</bundles_post_ra>
